<compile_context>
chip_gen: v7x
topology: tpu7x:2x2x1
jax: 0.10.0
libtpu: 0.0.40
codegen_flags: <defaults>
</compile_context>

<pallas_src>
import functools

import jax
import jax.numpy as jnp
from jax import lax
from jax.experimental import pallas as pl
from jax.experimental.pallas import tpu as pltpu


def _round_up(n, m):
    return ((n + m - 1) // m) * m


def _sigmoid_via_tanh(x):
    # sigmoid(x) = 0.5*(1 + tanh(x/2)): one EUP push instead of exp + reciprocal (two);
    # the extra mul/add ride in spare VALU slots.
    return 0.5 * (1.0 + jnp.tanh(0.5 * x))


def _lstm_fc_kernel(x_ref,        # (T, Bb, 1)  f32  (time, batch-tile, input=1)
                    w0row_ref,    # (1, 4H)     f32  layer-0 input weights (I=1 -> one row)
                    whh0_ref,     # (H, 4H)     bf16 layer-0 recurrent weights (pre-transposed)
                    b0_ref,       # (1, 4H)     f32  b_ih0 + b_hh0
                    w1_ref,       # (2H, 4H)    bf16 [w_ih1^T ; w_hh1^T] stacked (fused matmul)
                    b1_ref,       # (1, 4H)     f32  b_ih1 + b_hh1
                    wfc_ref,      # (1, H)      f32  fc weight row
                    bfc_ref,      # (1,)        f32  fc bias (SMEM scalar)
                    out_ref):     # (Bb, 1)     f32
    T = x_ref.shape[0]
    Bb = x_ref.shape[1]
    H = whh0_ref.shape[0]

    # Hoist loop-invariant row loads once.  They stay in their (1, N) replicated-sublane
    # layout (a handful of vregs); explicitly materializing (Bb, 4H) broadcasts here
    # would hold ~50 vregs live at Bb=32 and force spills.
    w0_row = w0row_ref[...]      # (1, 4H)
    b0_row = b0_ref[...]         # (1, 4H)
    b1_row = b1_ref[...]         # (1, 4H)
    wfc_row = wfc_ref[...]       # (1, H)
    # NOTE: the large recurrent weight tiles (H,4H)/(2H,4H) are intentionally read
    # inside the loop: ~96 vregs (bf16) cannot stay live in the 64-entry register file.

    def gates_to_hc(gates, c_prev):
        # PyTorch gate order: input, forget, cell (g), output; slices are 128-lane aligned.
        i_g = _sigmoid_via_tanh(gates[:, 0 * H:1 * H])
        f_g = _sigmoid_via_tanh(gates[:, 1 * H:2 * H])
        g_g = jnp.tanh(gates[:, 2 * H:3 * H])
        o_g = _sigmoid_via_tanh(gates[:, 3 * H:4 * H])
        c = f_g * c_prev + i_g * g_g
        h = o_g * jnp.tanh(c)
        return h, c

    def body(t, carry):
        h0, c0, h1, c1 = carry
        # ---- layer 0: input_size == 1, so the input projection is an outer product.
        # Do it on the VPU as a broadcast-multiply instead of a K=1 MXU matmul.
        x_t = x_ref[t]                                            # (Bb, 1) f32
        h0b = h0.astype(jnp.bfloat16)
        g0 = (x_t * w0_row + b0_row
              + jnp.dot(h0b, whh0_ref[...], preferred_element_type=jnp.float32))
        h0, c0 = gates_to_hc(g0, c0)
        # ---- layer 1: single fused (Bb, 2H) @ (2H, 4H) bf16 MXU pass for both the
        # input-to-hidden and hidden-to-hidden contributions (f32 accumulation).
        h01 = jnp.concatenate(
            [h0.astype(jnp.bfloat16), h1.astype(jnp.bfloat16)], axis=1)   # (Bb, 2H)
        g1 = jnp.dot(h01, w1_ref[...], preferred_element_type=jnp.float32) + b1_row
        h1, c1 = gates_to_hc(g1, c1)
        return (h0, c0, h1, c1)

    z = jnp.zeros((Bb, H), jnp.float32)
    # Short static recurrences: full unroll gives the scheduler visibility to overlap
    # the MXU matmul of step t+1 (layer 0) with the EUP work of step t (layer 1).
    # Long sequences: cap the unroll so code size / vreg live ranges stay bounded.
    unroll = T if T <= 16 else 8
    _, _, h1, _ = lax.fori_loop(0, T, body, (z, z, z, z), unroll=unroll)

    # fc(lstm_out[:, -1, :]) with output width 1: VPU multiply + lane reduction instead
    # of a degenerate N=1 MXU matmul.  The (Bb, 1) masked store is epilogue noise.
    out_ref[...] = jnp.sum(h1 * wfc_row, axis=1, keepdims=True) + bfc_ref[0]


@functools.partial(jax.jit, static_argnames=("hidden_size", "batch_tile"))
def lstm_model_forward(x, params, hidden_size=128, batch_tile=32):
    """x: (B, T, I=1) float32 (batch_first, like PyTorch). Returns (B, 1).

    Inference semantics only (module.eval()): inter-layer dropout is not applied.
    """
    B, T, I = x.shape
    assert I == 1, "LSTMModel is specified with input_size=1"
    H = hidden_size

    # ---- batch-tile selection -------------------------------------------------
    # Bigger tiles amortize per-timestep weight traffic / MXU start latency over more
    # rows; keep >= 2 grid iterations when the batch spans more than one 8-row group
    # so the "parallel" grid axis can shard across both v7x TensorCores.
    B8 = _round_up(B, 8)
    Bb = min(_round_up(batch_tile, 8), B8)
    if 8 < B8 <= Bb:
        Bb = max(8, _round_up(B8 // 2, 8))
    B_pad = _round_up(B, Bb)

    # (B, T, 1) -> (T, B_pad, 1), zero-padded batch (padded rows are sliced off below).
    x_tb = jnp.transpose(x.astype(jnp.float32), (1, 0, 2))
    x_tb = jnp.pad(x_tb, ((0, 0), (0, B_pad - B), (0, 0)))

    # Pre-transpose / pre-fuse weights so every in-kernel matmul is (B, K) @ (K, 4H),
    # and fold the two bias vectors per layer into one row.  Recurrent-matmul operands
    # are bf16 (MXU-native on v5e/v6e/v7x, f32 accumulation); VPU-side operands stay f32.
    w0row = params["w_ih0"].T.astype(jnp.float32)                          # (1, 4H)
    whh0 = params["w_hh0"].T.astype(jnp.bfloat16)                          # (H, 4H)
    b0 = (params["b_ih0"] + params["b_hh0"]).reshape(1, 4 * H).astype(jnp.float32)
    w1 = jnp.concatenate([params["w_ih1"].T, params["w_hh1"].T],
                         axis=0).astype(jnp.bfloat16)                      # (2H, 4H)
    b1 = (params["b_ih1"] + params["b_hh1"]).reshape(1, 4 * H).astype(jnp.float32)
    wfc = params["w_fc"].reshape(1, H).astype(jnp.float32)                 # (1, H)
    bfc = params["b_fc"].reshape(1).astype(jnp.float32)                    # (1,)

    rep = lambda i: (0, 0)   # replicated weight blocks
    out = pl.pallas_call(
        _lstm_fc_kernel,
        out_shape=jax.ShapeDtypeStruct((B_pad, 1), jnp.float32),
        grid_spec=pltpu.PrefetchScalarGridSpec(
            num_scalar_prefetch=0,
            grid=(B_pad // Bb,),
            in_specs=[
                pl.BlockSpec((T, Bb, 1), lambda i: (0, i, 0)),      # x (batch-tiled)
                pl.BlockSpec((1, 4 * H), rep),                      # w0 row (f32)
                pl.BlockSpec((H, 4 * H), rep),                      # whh0 (bf16)
                pl.BlockSpec((1, 4 * H), rep),                      # b0 (f32)
                pl.BlockSpec((2 * H, 4 * H), rep),                  # fused w1 (bf16)
                pl.BlockSpec((1, 4 * H), rep),                      # b1 (f32)
                pl.BlockSpec((1, H), rep),                          # fc weight row (f32)
                pl.BlockSpec(memory_space=pltpu.MemorySpace.SMEM),  # fc bias scalar
            ],
            out_specs=pl.BlockSpec((Bb, 1), lambda i: (i, 0)),
        ),
        compiler_params=pltpu.CompilerParams(
            dimension_semantics=("parallel",)),   # batch tiles shard across v7x cores
    )(x_tb, w0row, whh0, b0, w1, b1, wfc, bfc)
    return out[:B]


def init_params(key, input_size=1, hidden_size=128):
    """Deterministic init matching PyTorch LSTM/Linear parameter shapes."""
    H = hidden_size
    k = 1.0 / jnp.sqrt(H)
    keys = jax.random.split(key, 10)
    u = lambda kk, shape: jax.random.uniform(kk, shape, jnp.float32, -k, k)
    return {
        "w_ih0": u(keys[0], (4 * H, input_size)),
        "w_hh0": u(keys[1], (4 * H, H)),
        "b_ih0": u(keys[2], (4 * H,)),
        "b_hh0": u(keys[3], (4 * H,)),
        "w_ih1": u(keys[4], (4 * H, H)),
        "w_hh1": u(keys[5], (4 * H, H)),
        "b_ih1": u(keys[6], (4 * H,)),
        "b_hh1": u(keys[7], (4 * H,)),
        "w_fc":  u(keys[8], (1, H)),
        "b_fc":  u(keys[9], (1,)),
    }


def reference_forward(x, params, hidden_size=128):
    """Pure-JAX f32 reference of the same forward pass (for a sanity check)."""
    B, T, I = x.shape
    H = hidden_size

    def cell(x_t, h, c, w_ih, w_hh, b_ih, b_hh):
        g = x_t @ w_ih.T + h @ w_hh.T + b_ih + b_hh
        i = jax.nn.sigmoid(g[:, 0 * H:1 * H])
        f = jax.nn.sigmoid(g[:, 1 * H:2 * H])
        gg = jnp.tanh(g[:, 2 * H:3 * H])
        o = jax.nn.sigmoid(g[:, 3 * H:4 * H])
        c = f * c + i * gg
        h = o * jnp.tanh(c)
        return h, c

    h0 = c0 = h1 = c1 = jnp.zeros((B, H), jnp.float32)
    for t in range(T):
        h0, c0 = cell(x[:, t, :], h0, c0,
                      params["w_ih0"], params["w_hh0"],
                      params["b_ih0"], params["b_hh0"])
        h1, c1 = cell(h0, h1, c1,
                      params["w_ih1"], params["w_hh1"],
                      params["b_ih1"], params["b_hh1"])
    return h1 @ params["w_fc"].T + params["b_fc"]


if __name__ == "__main__":
    B, T, I, H = 2, 8, 1, 128
    key = jax.random.PRNGKey(0)
    kx, kp = jax.random.split(key)
    x = jax.random.normal(kx, (B, T, I), jnp.float32)
    params = init_params(kp, input_size=I, hidden_size=H)

    out = lstm_model_forward(x, params, hidden_size=H)
    out = jax.block_until_ready(out)

    ref = reference_forward(x, params, hidden_size=H)
    assert out.shape == (B, 1), out.shape
    # Tolerance loosened vs a pure-f32 check: the kernel uses bf16 MXU operands
    # (f32 accumulation), which perturbs the recurrence at the ~1e-3..1e-2 level.
    assert jnp.allclose(out, ref, atol=5e-2, rtol=5e-2), (out, ref)
    print("KERNEL_OK")
</pallas_src>

<mosaic_0001>
module attributes {stable_mosaic.version = 11 : i64} {
  func.func @_lstm_fc_kernel(%arg0: i32, %arg1: memref<8x8x1xf32, #tpu.memory_space<vmem>>, %arg2: memref<1x512xf32, #tpu.memory_space<vmem>>, %arg3: memref<128x512xbf16, #tpu.memory_space<vmem>>, %arg4: memref<1x512xf32, #tpu.memory_space<vmem>>, %arg5: memref<256x512xbf16, #tpu.memory_space<vmem>>, %arg6: memref<1x512xf32, #tpu.memory_space<vmem>>, %arg7: memref<1x128xf32, #tpu.memory_space<vmem>>, %arg8: memref<1xf32, #tpu.memory_space<smem>>, %arg9: memref<8x1xf32, #tpu.memory_space<vmem>>) attributes {dimension_semantics = [#tpu.dimension_semantics<parallel>], iteration_bounds = array<i64: 1>, scalar_prefetch = 0 : i64, scratch_operands = 0 : i64, tpu.core_type = #tpu.core_type<tc>, window_params = [{transform_indices = @transform_0, window_bounds = array<i64: 8, 8, 1>}, {pipeline_mode = #tpu.pipeline_mode<synchronous>, transform_indices = @transform_1, window_bounds = array<i64: 1, 512>}, {pipeline_mode = #tpu.pipeline_mode<synchronous>, transform_indices = @transform_2, window_bounds = array<i64: 128, 512>}, {pipeline_mode = #tpu.pipeline_mode<synchronous>, transform_indices = @transform_3, window_bounds = array<i64: 1, 512>}, {pipeline_mode = #tpu.pipeline_mode<synchronous>, transform_indices = @transform_4, window_bounds = array<i64: 256, 512>}, {pipeline_mode = #tpu.pipeline_mode<synchronous>, transform_indices = @transform_5, window_bounds = array<i64: 1, 512>}, {pipeline_mode = #tpu.pipeline_mode<synchronous>, transform_indices = @transform_6, window_bounds = array<i64: 1, 128>}, {transform_indices = @transform_7, window_bounds = array<i64: 1>}, {transform_indices = @transform_8, window_bounds = array<i64: 8, 1>}]} {
    %c0 = arith.constant 0 : index
    %c0_0 = arith.constant 0 : index
    %0 = vector.load %arg2[%c0, %c0_0] : memref<1x512xf32, #tpu.memory_space<vmem>>, vector<1x512xf32>
    %c0_1 = arith.constant 0 : index
    %c0_2 = arith.constant 0 : index
    %1 = vector.load %arg4[%c0_1, %c0_2] : memref<1x512xf32, #tpu.memory_space<vmem>>, vector<1x512xf32>
    %c0_3 = arith.constant 0 : index
    %c0_4 = arith.constant 0 : index
    %2 = vector.load %arg6[%c0_3, %c0_4] : memref<1x512xf32, #tpu.memory_space<vmem>>, vector<1x512xf32>
    %c0_5 = arith.constant 0 : index
    %c0_6 = arith.constant 0 : index
    %3 = vector.load %arg7[%c0_5, %c0_6] : memref<1x128xf32, #tpu.memory_space<vmem>>, vector<1x128xf32>
    %cst = arith.constant 0.000000e+00 : f32
    %4 = vector.broadcast %cst : f32 to vector<8x128xf32>
    %c0_i32 = arith.constant 0 : i32
    %5 = arith.index_cast %c0_i32 : i32 to index
    %c0_7 = arith.constant 0 : index
    %c0_8 = arith.constant 0 : index
    %6 = vector.load %arg1[%5, %c0_7, %c0_8] : memref<8x8x1xf32, #tpu.memory_space<vmem>>, vector<1x8x1xf32>
    %7 = vector.shape_cast %6 : vector<1x8x1xf32> to vector<8x1xf32>
    %8 = arith.truncf %4 : vector<8x128xf32> to vector<8x128xbf16>
    %9 = vector.broadcast %7 : vector<8x1xf32> to vector<8x512xf32>
    %10 = vector.broadcast %0 : vector<1x512xf32> to vector<8x512xf32>
    %11 = arith.mulf %9, %10 : vector<8x512xf32>
    %12 = vector.broadcast %1 : vector<1x512xf32> to vector<8x512xf32>
    %13 = arith.addf %11, %12 : vector<8x512xf32>
    %c0_9 = arith.constant 0 : index
    %c0_10 = arith.constant 0 : index
    %14 = vector.load %arg3[%c0_9, %c0_10] : memref<128x512xbf16, #tpu.memory_space<vmem>>, vector<128x512xbf16>
    %cst_11 = arith.constant dense<0.000000e+00> : vector<8x512xf32>
    %15 = tpu.matmul %8, %14, %cst_11 {dimension_numbers = #tpu.dot_dimension_numbers<[1], [0], [0], [1], [0, 0, 1, 1], [], []>} : vector<8x128xbf16>, vector<128x512xbf16>, vector<8x512xf32> -> vector<8x512xf32>
    %16 = arith.addf %13, %15 : vector<8x512xf32>
    %17 = vector.extract_strided_slice %16 {offsets = [0, 0], sizes = [8, 128], strides = [1, 1]} : vector<8x512xf32> to vector<8x128xf32>
    %cst_12 = arith.constant 5.000000e-01 : f32
    %18 = vector.broadcast %cst_12 : f32 to vector<8x128xf32>
    %19 = arith.mulf %18, %17 : vector<8x128xf32>
    %20 = math.tanh %19 : vector<8x128xf32>
    %cst_13 = arith.constant 1.000000e+00 : f32
    %21 = vector.broadcast %cst_13 : f32 to vector<8x128xf32>
    %22 = arith.addf %21, %20 : vector<8x128xf32>
    %cst_14 = arith.constant 5.000000e-01 : f32
    %23 = vector.broadcast %cst_14 : f32 to vector<8x128xf32>
    %24 = arith.mulf %23, %22 : vector<8x128xf32>
    %25 = vector.extract_strided_slice %16 {offsets = [0, 128], sizes = [8, 128], strides = [1, 1]} : vector<8x512xf32> to vector<8x128xf32>
    %cst_15 = arith.constant 5.000000e-01 : f32
    %26 = vector.broadcast %cst_15 : f32 to vector<8x128xf32>
    %27 = arith.mulf %26, %25 : vector<8x128xf32>
    %28 = math.tanh %27 : vector<8x128xf32>
    %cst_16 = arith.constant 1.000000e+00 : f32
    %29 = vector.broadcast %cst_16 : f32 to vector<8x128xf32>
    %30 = arith.addf %29, %28 : vector<8x128xf32>
    %cst_17 = arith.constant 5.000000e-01 : f32
    %31 = vector.broadcast %cst_17 : f32 to vector<8x128xf32>
    %32 = arith.mulf %31, %30 : vector<8x128xf32>
    %33 = vector.extract_strided_slice %16 {offsets = [0, 256], sizes = [8, 128], strides = [1, 1]} : vector<8x512xf32> to vector<8x128xf32>
    %34 = math.tanh %33 : vector<8x128xf32>
    %35 = vector.extract_strided_slice %16 {offsets = [0, 384], sizes = [8, 128], strides = [1, 1]} : vector<8x512xf32> to vector<8x128xf32>
    %cst_18 = arith.constant 5.000000e-01 : f32
    %36 = vector.broadcast %cst_18 : f32 to vector<8x128xf32>
    %37 = arith.mulf %36, %35 : vector<8x128xf32>
    %38 = math.tanh %37 : vector<8x128xf32>
    %cst_19 = arith.constant 1.000000e+00 : f32
    %39 = vector.broadcast %cst_19 : f32 to vector<8x128xf32>
    %40 = arith.addf %39, %38 : vector<8x128xf32>
    %cst_20 = arith.constant 5.000000e-01 : f32
    %41 = vector.broadcast %cst_20 : f32 to vector<8x128xf32>
    %42 = arith.mulf %41, %40 : vector<8x128xf32>
    %43 = arith.mulf %32, %4 : vector<8x128xf32>
    %44 = arith.mulf %24, %34 : vector<8x128xf32>
    %45 = arith.addf %43, %44 : vector<8x128xf32>
    %46 = math.tanh %45 : vector<8x128xf32>
    %47 = arith.mulf %42, %46 : vector<8x128xf32>
    %48 = arith.truncf %47 : vector<8x128xf32> to vector<8x128xbf16>
    %49 = arith.truncf %4 : vector<8x128xf32> to vector<8x128xbf16>
    %50 = tpu.concatenate %48, %49 in 1 : vector<8x128xbf16>, vector<8x128xbf16> -> vector<8x256xbf16>
    %c0_21 = arith.constant 0 : index
    %c0_22 = arith.constant 0 : index
    %51 = vector.load %arg5[%c0_21, %c0_22] : memref<256x512xbf16, #tpu.memory_space<vmem>>, vector<256x512xbf16>
    %cst_23 = arith.constant dense<0.000000e+00> : vector<8x512xf32>
    %52 = tpu.matmul %50, %51, %cst_23 {dimension_numbers = #tpu.dot_dimension_numbers<[1], [0], [0], [1], [0, 0, 1, 1], [], []>} : vector<8x256xbf16>, vector<256x512xbf16>, vector<8x512xf32> -> vector<8x512xf32>
    %53 = vector.broadcast %2 : vector<1x512xf32> to vector<8x512xf32>
    %54 = arith.addf %52, %53 : vector<8x512xf32>
    %55 = vector.extract_strided_slice %54 {offsets = [0, 0], sizes = [8, 128], strides = [1, 1]} : vector<8x512xf32> to vector<8x128xf32>
    %cst_24 = arith.constant 5.000000e-01 : f32
    %56 = vector.broadcast %cst_24 : f32 to vector<8x128xf32>
    %57 = arith.mulf %56, %55 : vector<8x128xf32>
    %58 = math.tanh %57 : vector<8x128xf32>
    %cst_25 = arith.constant 1.000000e+00 : f32
    %59 = vector.broadcast %cst_25 : f32 to vector<8x128xf32>
    %60 = arith.addf %59, %58 : vector<8x128xf32>
    %cst_26 = arith.constant 5.000000e-01 : f32
    %61 = vector.broadcast %cst_26 : f32 to vector<8x128xf32>
    %62 = arith.mulf %61, %60 : vector<8x128xf32>
    %63 = vector.extract_strided_slice %54 {offsets = [0, 128], sizes = [8, 128], strides = [1, 1]} : vector<8x512xf32> to vector<8x128xf32>
    %cst_27 = arith.constant 5.000000e-01 : f32
    %64 = vector.broadcast %cst_27 : f32 to vector<8x128xf32>
    %65 = arith.mulf %64, %63 : vector<8x128xf32>
    %66 = math.tanh %65 : vector<8x128xf32>
    %cst_28 = arith.constant 1.000000e+00 : f32
    %67 = vector.broadcast %cst_28 : f32 to vector<8x128xf32>
    %68 = arith.addf %67, %66 : vector<8x128xf32>
    %cst_29 = arith.constant 5.000000e-01 : f32
    %69 = vector.broadcast %cst_29 : f32 to vector<8x128xf32>
    %70 = arith.mulf %69, %68 : vector<8x128xf32>
    %71 = vector.extract_strided_slice %54 {offsets = [0, 256], sizes = [8, 128], strides = [1, 1]} : vector<8x512xf32> to vector<8x128xf32>
    %72 = math.tanh %71 : vector<8x128xf32>
    %73 = vector.extract_strided_slice %54 {offsets = [0, 384], sizes = [8, 128], strides = [1, 1]} : vector<8x512xf32> to vector<8x128xf32>
    %cst_30 = arith.constant 5.000000e-01 : f32
    %74 = vector.broadcast %cst_30 : f32 to vector<8x128xf32>
    %75 = arith.mulf %74, %73 : vector<8x128xf32>
    %76 = math.tanh %75 : vector<8x128xf32>
    %cst_31 = arith.constant 1.000000e+00 : f32
    %77 = vector.broadcast %cst_31 : f32 to vector<8x128xf32>
    %78 = arith.addf %77, %76 : vector<8x128xf32>
    %cst_32 = arith.constant 5.000000e-01 : f32
    %79 = vector.broadcast %cst_32 : f32 to vector<8x128xf32>
    %80 = arith.mulf %79, %78 : vector<8x128xf32>
    %81 = arith.mulf %70, %4 : vector<8x128xf32>
    %82 = arith.mulf %62, %72 : vector<8x128xf32>
    %83 = arith.addf %81, %82 : vector<8x128xf32>
    %84 = math.tanh %83 : vector<8x128xf32>
    %85 = arith.mulf %80, %84 : vector<8x128xf32>
    %c1_i32 = arith.constant 1 : i32
    %86 = arith.index_cast %c1_i32 : i32 to index
    %c0_33 = arith.constant 0 : index
    %c0_34 = arith.constant 0 : index
    %87 = vector.load %arg1[%86, %c0_33, %c0_34] : memref<8x8x1xf32, #tpu.memory_space<vmem>>, vector<1x8x1xf32>
    %88 = vector.shape_cast %87 : vector<1x8x1xf32> to vector<8x1xf32>
    %89 = arith.truncf %47 : vector<8x128xf32> to vector<8x128xbf16>
    %90 = vector.broadcast %88 : vector<8x1xf32> to vector<8x512xf32>
    %91 = vector.broadcast %0 : vector<1x512xf32> to vector<8x512xf32>
    %92 = arith.mulf %90, %91 : vector<8x512xf32>
    %93 = vector.broadcast %1 : vector<1x512xf32> to vector<8x512xf32>
    %94 = arith.addf %92, %93 : vector<8x512xf32>
    %c0_35 = arith.constant 0 : index
    %c0_36 = arith.constant 0 : index
    %95 = vector.load %arg3[%c0_35, %c0_36] : memref<128x512xbf16, #tpu.memory_space<vmem>>, vector<128x512xbf16>
    %cst_37 = arith.constant dense<0.000000e+00> : vector<8x512xf32>
    %96 = tpu.matmul %89, %95, %cst_37 {dimension_numbers = #tpu.dot_dimension_numbers<[1], [0], [0], [1], [0, 0, 1, 1], [], []>} : vector<8x128xbf16>, vector<128x512xbf16>, vector<8x512xf32> -> vector<8x512xf32>
    %97 = arith.addf %94, %96 : vector<8x512xf32>
    %98 = vector.extract_strided_slice %97 {offsets = [0, 0], sizes = [8, 128], strides = [1, 1]} : vector<8x512xf32> to vector<8x128xf32>
    %cst_38 = arith.constant 5.000000e-01 : f32
    %99 = vector.broadcast %cst_38 : f32 to vector<8x128xf32>
    %100 = arith.mulf %99, %98 : vector<8x128xf32>
    %101 = math.tanh %100 : vector<8x128xf32>
    %cst_39 = arith.constant 1.000000e+00 : f32
    %102 = vector.broadcast %cst_39 : f32 to vector<8x128xf32>
    %103 = arith.addf %102, %101 : vector<8x128xf32>
    %cst_40 = arith.constant 5.000000e-01 : f32
    %104 = vector.broadcast %cst_40 : f32 to vector<8x128xf32>
    %105 = arith.mulf %104, %103 : vector<8x128xf32>
    %106 = vector.extract_strided_slice %97 {offsets = [0, 128], sizes = [8, 128], strides = [1, 1]} : vector<8x512xf32> to vector<8x128xf32>
    %cst_41 = arith.constant 5.000000e-01 : f32
    %107 = vector.broadcast %cst_41 : f32 to vector<8x128xf32>
    %108 = arith.mulf %107, %106 : vector<8x128xf32>
    %109 = math.tanh %108 : vector<8x128xf32>
    %cst_42 = arith.constant 1.000000e+00 : f32
    %110 = vector.broadcast %cst_42 : f32 to vector<8x128xf32>
    %111 = arith.addf %110, %109 : vector<8x128xf32>
    %cst_43 = arith.constant 5.000000e-01 : f32
    %112 = vector.broadcast %cst_43 : f32 to vector<8x128xf32>
    %113 = arith.mulf %112, %111 : vector<8x128xf32>
    %114 = vector.extract_strided_slice %97 {offsets = [0, 256], sizes = [8, 128], strides = [1, 1]} : vector<8x512xf32> to vector<8x128xf32>
    %115 = math.tanh %114 : vector<8x128xf32>
    %116 = vector.extract_strided_slice %97 {offsets = [0, 384], sizes = [8, 128], strides = [1, 1]} : vector<8x512xf32> to vector<8x128xf32>
    %cst_44 = arith.constant 5.000000e-01 : f32
    %117 = vector.broadcast %cst_44 : f32 to vector<8x128xf32>
    %118 = arith.mulf %117, %116 : vector<8x128xf32>
    %119 = math.tanh %118 : vector<8x128xf32>
    %cst_45 = arith.constant 1.000000e+00 : f32
    %120 = vector.broadcast %cst_45 : f32 to vector<8x128xf32>
    %121 = arith.addf %120, %119 : vector<8x128xf32>
    %cst_46 = arith.constant 5.000000e-01 : f32
    %122 = vector.broadcast %cst_46 : f32 to vector<8x128xf32>
    %123 = arith.mulf %122, %121 : vector<8x128xf32>
    %124 = arith.mulf %113, %45 : vector<8x128xf32>
    %125 = arith.mulf %105, %115 : vector<8x128xf32>
    %126 = arith.addf %124, %125 : vector<8x128xf32>
    %127 = math.tanh %126 : vector<8x128xf32>
    %128 = arith.mulf %123, %127 : vector<8x128xf32>
    %129 = arith.truncf %128 : vector<8x128xf32> to vector<8x128xbf16>
    %130 = arith.truncf %85 : vector<8x128xf32> to vector<8x128xbf16>
    %131 = tpu.concatenate %129, %130 in 1 : vector<8x128xbf16>, vector<8x128xbf16> -> vector<8x256xbf16>
    %c0_47 = arith.constant 0 : index
    %c0_48 = arith.constant 0 : index
    %132 = vector.load %arg5[%c0_47, %c0_48] : memref<256x512xbf16, #tpu.memory_space<vmem>>, vector<256x512xbf16>
    %cst_49 = arith.constant dense<0.000000e+00> : vector<8x512xf32>
    %133 = tpu.matmul %131, %132, %cst_49 {dimension_numbers = #tpu.dot_dimension_numbers<[1], [0], [0], [1], [0, 0, 1, 1], [], []>} : vector<8x256xbf16>, vector<256x512xbf16>, vector<8x512xf32> -> vector<8x512xf32>
    %134 = vector.broadcast %2 : vector<1x512xf32> to vector<8x512xf32>
    %135 = arith.addf %133, %134 : vector<8x512xf32>
    %136 = vector.extract_strided_slice %135 {offsets = [0, 0], sizes = [8, 128], strides = [1, 1]} : vector<8x512xf32> to vector<8x128xf32>
    %cst_50 = arith.constant 5.000000e-01 : f32
    %137 = vector.broadcast %cst_50 : f32 to vector<8x128xf32>
    %138 = arith.mulf %137, %136 : vector<8x128xf32>
    %139 = math.tanh %138 : vector<8x128xf32>
    %cst_51 = arith.constant 1.000000e+00 : f32
    %140 = vector.broadcast %cst_51 : f32 to vector<8x128xf32>
    %141 = arith.addf %140, %139 : vector<8x128xf32>
    %cst_52 = arith.constant 5.000000e-01 : f32
    %142 = vector.broadcast %cst_52 : f32 to vector<8x128xf32>
    %143 = arith.mulf %142, %141 : vector<8x128xf32>
    %144 = vector.extract_strided_slice %135 {offsets = [0, 128], sizes = [8, 128], strides = [1, 1]} : vector<8x512xf32> to vector<8x128xf32>
    %cst_53 = arith.constant 5.000000e-01 : f32
    %145 = vector.broadcast %cst_53 : f32 to vector<8x128xf32>
    %146 = arith.mulf %145, %144 : vector<8x128xf32>
    %147 = math.tanh %146 : vector<8x128xf32>
    %cst_54 = arith.constant 1.000000e+00 : f32
    %148 = vector.broadcast %cst_54 : f32 to vector<8x128xf32>
    %149 = arith.addf %148, %147 : vector<8x128xf32>
    %cst_55 = arith.constant 5.000000e-01 : f32
    %150 = vector.broadcast %cst_55 : f32 to vector<8x128xf32>
    %151 = arith.mulf %150, %149 : vector<8x128xf32>
    %152 = vector.extract_strided_slice %135 {offsets = [0, 256], sizes = [8, 128], strides = [1, 1]} : vector<8x512xf32> to vector<8x128xf32>
    %153 = math.tanh %152 : vector<8x128xf32>
    %154 = vector.extract_strided_slice %135 {offsets = [0, 384], sizes = [8, 128], strides = [1, 1]} : vector<8x512xf32> to vector<8x128xf32>
    %cst_56 = arith.constant 5.000000e-01 : f32
    %155 = vector.broadcast %cst_56 : f32 to vector<8x128xf32>
    %156 = arith.mulf %155, %154 : vector<8x128xf32>
    %157 = math.tanh %156 : vector<8x128xf32>
    %cst_57 = arith.constant 1.000000e+00 : f32
    %158 = vector.broadcast %cst_57 : f32 to vector<8x128xf32>
    %159 = arith.addf %158, %157 : vector<8x128xf32>
    %cst_58 = arith.constant 5.000000e-01 : f32
    %160 = vector.broadcast %cst_58 : f32 to vector<8x128xf32>
    %161 = arith.mulf %160, %159 : vector<8x128xf32>
    %162 = arith.mulf %151, %83 : vector<8x128xf32>
    %163 = arith.mulf %143, %153 : vector<8x128xf32>
    %164 = arith.addf %162, %163 : vector<8x128xf32>
    %165 = math.tanh %164 : vector<8x128xf32>
    %166 = arith.mulf %161, %165 : vector<8x128xf32>
    %c2_i32 = arith.constant 2 : i32
    %167 = arith.index_cast %c2_i32 : i32 to index
    %c0_59 = arith.constant 0 : index
    %c0_60 = arith.constant 0 : index
    %168 = vector.load %arg1[%167, %c0_59, %c0_60] : memref<8x8x1xf32, #tpu.memory_space<vmem>>, vector<1x8x1xf32>
    %169 = vector.shape_cast %168 : vector<1x8x1xf32> to vector<8x1xf32>
    %170 = arith.truncf %128 : vector<8x128xf32> to vector<8x128xbf16>
    %171 = vector.broadcast %169 : vector<8x1xf32> to vector<8x512xf32>
    %172 = vector.broadcast %0 : vector<1x512xf32> to vector<8x512xf32>
    %173 = arith.mulf %171, %172 : vector<8x512xf32>
    %174 = vector.broadcast %1 : vector<1x512xf32> to vector<8x512xf32>
    %175 = arith.addf %173, %174 : vector<8x512xf32>
    %c0_61 = arith.constant 0 : index
    %c0_62 = arith.constant 0 : index
    %176 = vector.load %arg3[%c0_61, %c0_62] : memref<128x512xbf16, #tpu.memory_space<vmem>>, vector<128x512xbf16>
    %cst_63 = arith.constant dense<0.000000e+00> : vector<8x512xf32>
    %177 = tpu.matmul %170, %176, %cst_63 {dimension_numbers = #tpu.dot_dimension_numbers<[1], [0], [0], [1], [0, 0, 1, 1], [], []>} : vector<8x128xbf16>, vector<128x512xbf16>, vector<8x512xf32> -> vector<8x512xf32>
    %178 = arith.addf %175, %177 : vector<8x512xf32>
    %179 = vector.extract_strided_slice %178 {offsets = [0, 0], sizes = [8, 128], strides = [1, 1]} : vector<8x512xf32> to vector<8x128xf32>
    %cst_64 = arith.constant 5.000000e-01 : f32
    %180 = vector.broadcast %cst_64 : f32 to vector<8x128xf32>
    %181 = arith.mulf %180, %179 : vector<8x128xf32>
    %182 = math.tanh %181 : vector<8x128xf32>
    %cst_65 = arith.constant 1.000000e+00 : f32
    %183 = vector.broadcast %cst_65 : f32 to vector<8x128xf32>
    %184 = arith.addf %183, %182 : vector<8x128xf32>
    %cst_66 = arith.constant 5.000000e-01 : f32
    %185 = vector.broadcast %cst_66 : f32 to vector<8x128xf32>
    %186 = arith.mulf %185, %184 : vector<8x128xf32>
    %187 = vector.extract_strided_slice %178 {offsets = [0, 128], sizes = [8, 128], strides = [1, 1]} : vector<8x512xf32> to vector<8x128xf32>
    %cst_67 = arith.constant 5.000000e-01 : f32
    %188 = vector.broadcast %cst_67 : f32 to vector<8x128xf32>
    %189 = arith.mulf %188, %187 : vector<8x128xf32>
    %190 = math.tanh %189 : vector<8x128xf32>
    %cst_68 = arith.constant 1.000000e+00 : f32
    %191 = vector.broadcast %cst_68 : f32 to vector<8x128xf32>
    %192 = arith.addf %191, %190 : vector<8x128xf32>
    %cst_69 = arith.constant 5.000000e-01 : f32
    %193 = vector.broadcast %cst_69 : f32 to vector<8x128xf32>
    %194 = arith.mulf %193, %192 : vector<8x128xf32>
    %195 = vector.extract_strided_slice %178 {offsets = [0, 256], sizes = [8, 128], strides = [1, 1]} : vector<8x512xf32> to vector<8x128xf32>
    %196 = math.tanh %195 : vector<8x128xf32>
    %197 = vector.extract_strided_slice %178 {offsets = [0, 384], sizes = [8, 128], strides = [1, 1]} : vector<8x512xf32> to vector<8x128xf32>
    %cst_70 = arith.constant 5.000000e-01 : f32
    %198 = vector.broadcast %cst_70 : f32 to vector<8x128xf32>
    %199 = arith.mulf %198, %197 : vector<8x128xf32>
    %200 = math.tanh %199 : vector<8x128xf32>
    %cst_71 = arith.constant 1.000000e+00 : f32
    %201 = vector.broadcast %cst_71 : f32 to vector<8x128xf32>
    %202 = arith.addf %201, %200 : vector<8x128xf32>
    %cst_72 = arith.constant 5.000000e-01 : f32
    %203 = vector.broadcast %cst_72 : f32 to vector<8x128xf32>
    %204 = arith.mulf %203, %202 : vector<8x128xf32>
    %205 = arith.mulf %194, %126 : vector<8x128xf32>
    %206 = arith.mulf %186, %196 : vector<8x128xf32>
    %207 = arith.addf %205, %206 : vector<8x128xf32>
    %208 = math.tanh %207 : vector<8x128xf32>
    %209 = arith.mulf %204, %208 : vector<8x128xf32>
    %210 = arith.truncf %209 : vector<8x128xf32> to vector<8x128xbf16>
    %211 = arith.truncf %166 : vector<8x128xf32> to vector<8x128xbf16>
    %212 = tpu.concatenate %210, %211 in 1 : vector<8x128xbf16>, vector<8x128xbf16> -> vector<8x256xbf16>
    %c0_73 = arith.constant 0 : index
    %c0_74 = arith.constant 0 : index
    %213 = vector.load %arg5[%c0_73, %c0_74] : memref<256x512xbf16, #tpu.memory_space<vmem>>, vector<256x512xbf16>
    %cst_75 = arith.constant dense<0.000000e+00> : vector<8x512xf32>
    %214 = tpu.matmul %212, %213, %cst_75 {dimension_numbers = #tpu.dot_dimension_numbers<[1], [0], [0], [1], [0, 0, 1, 1], [], []>} : vector<8x256xbf16>, vector<256x512xbf16>, vector<8x512xf32> -> vector<8x512xf32>
    %215 = vector.broadcast %2 : vector<1x512xf32> to vector<8x512xf32>
    %216 = arith.addf %214, %215 : vector<8x512xf32>
    %217 = vector.extract_strided_slice %216 {offsets = [0, 0], sizes = [8, 128], strides = [1, 1]} : vector<8x512xf32> to vector<8x128xf32>
    %cst_76 = arith.constant 5.000000e-01 : f32
    %218 = vector.broadcast %cst_76 : f32 to vector<8x128xf32>
    %219 = arith.mulf %218, %217 : vector<8x128xf32>
    %220 = math.tanh %219 : vector<8x128xf32>
    %cst_77 = arith.constant 1.000000e+00 : f32
    %221 = vector.broadcast %cst_77 : f32 to vector<8x128xf32>
    %222 = arith.addf %221, %220 : vector<8x128xf32>
    %cst_78 = arith.constant 5.000000e-01 : f32
    %223 = vector.broadcast %cst_78 : f32 to vector<8x128xf32>
    %224 = arith.mulf %223, %222 : vector<8x128xf32>
    %225 = vector.extract_strided_slice %216 {offsets = [0, 128], sizes = [8, 128], strides = [1, 1]} : vector<8x512xf32> to vector<8x128xf32>
    %cst_79 = arith.constant 5.000000e-01 : f32
    %226 = vector.broadcast %cst_79 : f32 to vector<8x128xf32>
    %227 = arith.mulf %226, %225 : vector<8x128xf32>
    %228 = math.tanh %227 : vector<8x128xf32>
    %cst_80 = arith.constant 1.000000e+00 : f32
    %229 = vector.broadcast %cst_80 : f32 to vector<8x128xf32>
    %230 = arith.addf %229, %228 : vector<8x128xf32>
    %cst_81 = arith.constant 5.000000e-01 : f32
    %231 = vector.broadcast %cst_81 : f32 to vector<8x128xf32>
    %232 = arith.mulf %231, %230 : vector<8x128xf32>
    %233 = vector.extract_strided_slice %216 {offsets = [0, 256], sizes = [8, 128], strides = [1, 1]} : vector<8x512xf32> to vector<8x128xf32>
    %234 = math.tanh %233 : vector<8x128xf32>
    %235 = vector.extract_strided_slice %216 {offsets = [0, 384], sizes = [8, 128], strides = [1, 1]} : vector<8x512xf32> to vector<8x128xf32>
    %cst_82 = arith.constant 5.000000e-01 : f32
    %236 = vector.broadcast %cst_82 : f32 to vector<8x128xf32>
    %237 = arith.mulf %236, %235 : vector<8x128xf32>
    %238 = math.tanh %237 : vector<8x128xf32>
    %cst_83 = arith.constant 1.000000e+00 : f32
    %239 = vector.broadcast %cst_83 : f32 to vector<8x128xf32>
    %240 = arith.addf %239, %238 : vector<8x128xf32>
    %cst_84 = arith.constant 5.000000e-01 : f32
    %241 = vector.broadcast %cst_84 : f32 to vector<8x128xf32>
    %242 = arith.mulf %241, %240 : vector<8x128xf32>
    %243 = arith.mulf %232, %164 : vector<8x128xf32>
    %244 = arith.mulf %224, %234 : vector<8x128xf32>
    %245 = arith.addf %243, %244 : vector<8x128xf32>
    %246 = math.tanh %245 : vector<8x128xf32>
    %247 = arith.mulf %242, %246 : vector<8x128xf32>
    %c3_i32 = arith.constant 3 : i32
    %248 = arith.index_cast %c3_i32 : i32 to index
    %c0_85 = arith.constant 0 : index
    %c0_86 = arith.constant 0 : index
    %249 = vector.load %arg1[%248, %c0_85, %c0_86] : memref<8x8x1xf32, #tpu.memory_space<vmem>>, vector<1x8x1xf32>
    %250 = vector.shape_cast %249 : vector<1x8x1xf32> to vector<8x1xf32>
    %251 = arith.truncf %209 : vector<8x128xf32> to vector<8x128xbf16>
    %252 = vector.broadcast %250 : vector<8x1xf32> to vector<8x512xf32>
    %253 = vector.broadcast %0 : vector<1x512xf32> to vector<8x512xf32>
    %254 = arith.mulf %252, %253 : vector<8x512xf32>
    %255 = vector.broadcast %1 : vector<1x512xf32> to vector<8x512xf32>
    %256 = arith.addf %254, %255 : vector<8x512xf32>
    %c0_87 = arith.constant 0 : index
    %c0_88 = arith.constant 0 : index
    %257 = vector.load %arg3[%c0_87, %c0_88] : memref<128x512xbf16, #tpu.memory_space<vmem>>, vector<128x512xbf16>
    %cst_89 = arith.constant dense<0.000000e+00> : vector<8x512xf32>
    %258 = tpu.matmul %251, %257, %cst_89 {dimension_numbers = #tpu.dot_dimension_numbers<[1], [0], [0], [1], [0, 0, 1, 1], [], []>} : vector<8x128xbf16>, vector<128x512xbf16>, vector<8x512xf32> -> vector<8x512xf32>
    %259 = arith.addf %256, %258 : vector<8x512xf32>
    %260 = vector.extract_strided_slice %259 {offsets = [0, 0], sizes = [8, 128], strides = [1, 1]} : vector<8x512xf32> to vector<8x128xf32>
    %cst_90 = arith.constant 5.000000e-01 : f32
    %261 = vector.broadcast %cst_90 : f32 to vector<8x128xf32>
    %262 = arith.mulf %261, %260 : vector<8x128xf32>
    %263 = math.tanh %262 : vector<8x128xf32>
    %cst_91 = arith.constant 1.000000e+00 : f32
    %264 = vector.broadcast %cst_91 : f32 to vector<8x128xf32>
    %265 = arith.addf %264, %263 : vector<8x128xf32>
    %cst_92 = arith.constant 5.000000e-01 : f32
    %266 = vector.broadcast %cst_92 : f32 to vector<8x128xf32>
    %267 = arith.mulf %266, %265 : vector<8x128xf32>
    %268 = vector.extract_strided_slice %259 {offsets = [0, 128], sizes = [8, 128], strides = [1, 1]} : vector<8x512xf32> to vector<8x128xf32>
    %cst_93 = arith.constant 5.000000e-01 : f32
    %269 = vector.broadcast %cst_93 : f32 to vector<8x128xf32>
    %270 = arith.mulf %269, %268 : vector<8x128xf32>
    %271 = math.tanh %270 : vector<8x128xf32>
    %cst_94 = arith.constant 1.000000e+00 : f32
    %272 = vector.broadcast %cst_94 : f32 to vector<8x128xf32>
    %273 = arith.addf %272, %271 : vector<8x128xf32>
    %cst_95 = arith.constant 5.000000e-01 : f32
    %274 = vector.broadcast %cst_95 : f32 to vector<8x128xf32>
    %275 = arith.mulf %274, %273 : vector<8x128xf32>
    %276 = vector.extract_strided_slice %259 {offsets = [0, 256], sizes = [8, 128], strides = [1, 1]} : vector<8x512xf32> to vector<8x128xf32>
    %277 = math.tanh %276 : vector<8x128xf32>
    %278 = vector.extract_strided_slice %259 {offsets = [0, 384], sizes = [8, 128], strides = [1, 1]} : vector<8x512xf32> to vector<8x128xf32>
    %cst_96 = arith.constant 5.000000e-01 : f32
    %279 = vector.broadcast %cst_96 : f32 to vector<8x128xf32>
    %280 = arith.mulf %279, %278 : vector<8x128xf32>
    %281 = math.tanh %280 : vector<8x128xf32>
    %cst_97 = arith.constant 1.000000e+00 : f32
    %282 = vector.broadcast %cst_97 : f32 to vector<8x128xf32>
    %283 = arith.addf %282, %281 : vector<8x128xf32>
    %cst_98 = arith.constant 5.000000e-01 : f32
    %284 = vector.broadcast %cst_98 : f32 to vector<8x128xf32>
    %285 = arith.mulf %284, %283 : vector<8x128xf32>
    %286 = arith.mulf %275, %207 : vector<8x128xf32>
    %287 = arith.mulf %267, %277 : vector<8x128xf32>
    %288 = arith.addf %286, %287 : vector<8x128xf32>
    %289 = math.tanh %288 : vector<8x128xf32>
    %290 = arith.mulf %285, %289 : vector<8x128xf32>
    %291 = arith.truncf %290 : vector<8x128xf32> to vector<8x128xbf16>
    %292 = arith.truncf %247 : vector<8x128xf32> to vector<8x128xbf16>
    %293 = tpu.concatenate %291, %292 in 1 : vector<8x128xbf16>, vector<8x128xbf16> -> vector<8x256xbf16>
    %c0_99 = arith.constant 0 : index
    %c0_100 = arith.constant 0 : index
    %294 = vector.load %arg5[%c0_99, %c0_100] : memref<256x512xbf16, #tpu.memory_space<vmem>>, vector<256x512xbf16>
    %cst_101 = arith.constant dense<0.000000e+00> : vector<8x512xf32>
    %295 = tpu.matmul %293, %294, %cst_101 {dimension_numbers = #tpu.dot_dimension_numbers<[1], [0], [0], [1], [0, 0, 1, 1], [], []>} : vector<8x256xbf16>, vector<256x512xbf16>, vector<8x512xf32> -> vector<8x512xf32>
    %296 = vector.broadcast %2 : vector<1x512xf32> to vector<8x512xf32>
    %297 = arith.addf %295, %296 : vector<8x512xf32>
    %298 = vector.extract_strided_slice %297 {offsets = [0, 0], sizes = [8, 128], strides = [1, 1]} : vector<8x512xf32> to vector<8x128xf32>
    %cst_102 = arith.constant 5.000000e-01 : f32
    %299 = vector.broadcast %cst_102 : f32 to vector<8x128xf32>
    %300 = arith.mulf %299, %298 : vector<8x128xf32>
    %301 = math.tanh %300 : vector<8x128xf32>
    %cst_103 = arith.constant 1.000000e+00 : f32
    %302 = vector.broadcast %cst_103 : f32 to vector<8x128xf32>
    %303 = arith.addf %302, %301 : vector<8x128xf32>
    %cst_104 = arith.constant 5.000000e-01 : f32
    %304 = vector.broadcast %cst_104 : f32 to vector<8x128xf32>
    %305 = arith.mulf %304, %303 : vector<8x128xf32>
    %306 = vector.extract_strided_slice %297 {offsets = [0, 128], sizes = [8, 128], strides = [1, 1]} : vector<8x512xf32> to vector<8x128xf32>
    %cst_105 = arith.constant 5.000000e-01 : f32
    %307 = vector.broadcast %cst_105 : f32 to vector<8x128xf32>
    %308 = arith.mulf %307, %306 : vector<8x128xf32>
    %309 = math.tanh %308 : vector<8x128xf32>
    %cst_106 = arith.constant 1.000000e+00 : f32
    %310 = vector.broadcast %cst_106 : f32 to vector<8x128xf32>
    %311 = arith.addf %310, %309 : vector<8x128xf32>
    %cst_107 = arith.constant 5.000000e-01 : f32
    %312 = vector.broadcast %cst_107 : f32 to vector<8x128xf32>
    %313 = arith.mulf %312, %311 : vector<8x128xf32>
    %314 = vector.extract_strided_slice %297 {offsets = [0, 256], sizes = [8, 128], strides = [1, 1]} : vector<8x512xf32> to vector<8x128xf32>
    %315 = math.tanh %314 : vector<8x128xf32>
    %316 = vector.extract_strided_slice %297 {offsets = [0, 384], sizes = [8, 128], strides = [1, 1]} : vector<8x512xf32> to vector<8x128xf32>
    %cst_108 = arith.constant 5.000000e-01 : f32
    %317 = vector.broadcast %cst_108 : f32 to vector<8x128xf32>
    %318 = arith.mulf %317, %316 : vector<8x128xf32>
    %319 = math.tanh %318 : vector<8x128xf32>
    %cst_109 = arith.constant 1.000000e+00 : f32
    %320 = vector.broadcast %cst_109 : f32 to vector<8x128xf32>
    %321 = arith.addf %320, %319 : vector<8x128xf32>
    %cst_110 = arith.constant 5.000000e-01 : f32
    %322 = vector.broadcast %cst_110 : f32 to vector<8x128xf32>
    %323 = arith.mulf %322, %321 : vector<8x128xf32>
    %324 = arith.mulf %313, %245 : vector<8x128xf32>
    %325 = arith.mulf %305, %315 : vector<8x128xf32>
    %326 = arith.addf %324, %325 : vector<8x128xf32>
    %327 = math.tanh %326 : vector<8x128xf32>
    %328 = arith.mulf %323, %327 : vector<8x128xf32>
    %c4_i32 = arith.constant 4 : i32
    %329 = arith.index_cast %c4_i32 : i32 to index
    %c0_111 = arith.constant 0 : index
    %c0_112 = arith.constant 0 : index
    %330 = vector.load %arg1[%329, %c0_111, %c0_112] : memref<8x8x1xf32, #tpu.memory_space<vmem>>, vector<1x8x1xf32>
    %331 = vector.shape_cast %330 : vector<1x8x1xf32> to vector<8x1xf32>
    %332 = arith.truncf %290 : vector<8x128xf32> to vector<8x128xbf16>
    %333 = vector.broadcast %331 : vector<8x1xf32> to vector<8x512xf32>
    %334 = vector.broadcast %0 : vector<1x512xf32> to vector<8x512xf32>
    %335 = arith.mulf %333, %334 : vector<8x512xf32>
    %336 = vector.broadcast %1 : vector<1x512xf32> to vector<8x512xf32>
    %337 = arith.addf %335, %336 : vector<8x512xf32>
    %c0_113 = arith.constant 0 : index
    %c0_114 = arith.constant 0 : index
    %338 = vector.load %arg3[%c0_113, %c0_114] : memref<128x512xbf16, #tpu.memory_space<vmem>>, vector<128x512xbf16>
    %cst_115 = arith.constant dense<0.000000e+00> : vector<8x512xf32>
    %339 = tpu.matmul %332, %338, %cst_115 {dimension_numbers = #tpu.dot_dimension_numbers<[1], [0], [0], [1], [0, 0, 1, 1], [], []>} : vector<8x128xbf16>, vector<128x512xbf16>, vector<8x512xf32> -> vector<8x512xf32>
    %340 = arith.addf %337, %339 : vector<8x512xf32>
    %341 = vector.extract_strided_slice %340 {offsets = [0, 0], sizes = [8, 128], strides = [1, 1]} : vector<8x512xf32> to vector<8x128xf32>
    %cst_116 = arith.constant 5.000000e-01 : f32
    %342 = vector.broadcast %cst_116 : f32 to vector<8x128xf32>
    %343 = arith.mulf %342, %341 : vector<8x128xf32>
    %344 = math.tanh %343 : vector<8x128xf32>
    %cst_117 = arith.constant 1.000000e+00 : f32
    %345 = vector.broadcast %cst_117 : f32 to vector<8x128xf32>
    %346 = arith.addf %345, %344 : vector<8x128xf32>
    %cst_118 = arith.constant 5.000000e-01 : f32
    %347 = vector.broadcast %cst_118 : f32 to vector<8x128xf32>
    %348 = arith.mulf %347, %346 : vector<8x128xf32>
    %349 = vector.extract_strided_slice %340 {offsets = [0, 128], sizes = [8, 128], strides = [1, 1]} : vector<8x512xf32> to vector<8x128xf32>
    %cst_119 = arith.constant 5.000000e-01 : f32
    %350 = vector.broadcast %cst_119 : f32 to vector<8x128xf32>
    %351 = arith.mulf %350, %349 : vector<8x128xf32>
    %352 = math.tanh %351 : vector<8x128xf32>
    %cst_120 = arith.constant 1.000000e+00 : f32
    %353 = vector.broadcast %cst_120 : f32 to vector<8x128xf32>
    %354 = arith.addf %353, %352 : vector<8x128xf32>
    %cst_121 = arith.constant 5.000000e-01 : f32
    %355 = vector.broadcast %cst_121 : f32 to vector<8x128xf32>
    %356 = arith.mulf %355, %354 : vector<8x128xf32>
    %357 = vector.extract_strided_slice %340 {offsets = [0, 256], sizes = [8, 128], strides = [1, 1]} : vector<8x512xf32> to vector<8x128xf32>
    %358 = math.tanh %357 : vector<8x128xf32>
    %359 = vector.extract_strided_slice %340 {offsets = [0, 384], sizes = [8, 128], strides = [1, 1]} : vector<8x512xf32> to vector<8x128xf32>
    %cst_122 = arith.constant 5.000000e-01 : f32
    %360 = vector.broadcast %cst_122 : f32 to vector<8x128xf32>
    %361 = arith.mulf %360, %359 : vector<8x128xf32>
    %362 = math.tanh %361 : vector<8x128xf32>
    %cst_123 = arith.constant 1.000000e+00 : f32
    %363 = vector.broadcast %cst_123 : f32 to vector<8x128xf32>
    %364 = arith.addf %363, %362 : vector<8x128xf32>
    %cst_124 = arith.constant 5.000000e-01 : f32
    %365 = vector.broadcast %cst_124 : f32 to vector<8x128xf32>
    %366 = arith.mulf %365, %364 : vector<8x128xf32>
    %367 = arith.mulf %356, %288 : vector<8x128xf32>
    %368 = arith.mulf %348, %358 : vector<8x128xf32>
    %369 = arith.addf %367, %368 : vector<8x128xf32>
    %370 = math.tanh %369 : vector<8x128xf32>
    %371 = arith.mulf %366, %370 : vector<8x128xf32>
    %372 = arith.truncf %371 : vector<8x128xf32> to vector<8x128xbf16>
    %373 = arith.truncf %328 : vector<8x128xf32> to vector<8x128xbf16>
    %374 = tpu.concatenate %372, %373 in 1 : vector<8x128xbf16>, vector<8x128xbf16> -> vector<8x256xbf16>
    %c0_125 = arith.constant 0 : index
    %c0_126 = arith.constant 0 : index
    %375 = vector.load %arg5[%c0_125, %c0_126] : memref<256x512xbf16, #tpu.memory_space<vmem>>, vector<256x512xbf16>
    %cst_127 = arith.constant dense<0.000000e+00> : vector<8x512xf32>
    %376 = tpu.matmul %374, %375, %cst_127 {dimension_numbers = #tpu.dot_dimension_numbers<[1], [0], [0], [1], [0, 0, 1, 1], [], []>} : vector<8x256xbf16>, vector<256x512xbf16>, vector<8x512xf32> -> vector<8x512xf32>
    %377 = vector.broadcast %2 : vector<1x512xf32> to vector<8x512xf32>
    %378 = arith.addf %376, %377 : vector<8x512xf32>
    %379 = vector.extract_strided_slice %378 {offsets = [0, 0], sizes = [8, 128], strides = [1, 1]} : vector<8x512xf32> to vector<8x128xf32>
    %cst_128 = arith.constant 5.000000e-01 : f32
    %380 = vector.broadcast %cst_128 : f32 to vector<8x128xf32>
    %381 = arith.mulf %380, %379 : vector<8x128xf32>
    %382 = math.tanh %381 : vector<8x128xf32>
    %cst_129 = arith.constant 1.000000e+00 : f32
    %383 = vector.broadcast %cst_129 : f32 to vector<8x128xf32>
    %384 = arith.addf %383, %382 : vector<8x128xf32>
    %cst_130 = arith.constant 5.000000e-01 : f32
    %385 = vector.broadcast %cst_130 : f32 to vector<8x128xf32>
    %386 = arith.mulf %385, %384 : vector<8x128xf32>
    %387 = vector.extract_strided_slice %378 {offsets = [0, 128], sizes = [8, 128], strides = [1, 1]} : vector<8x512xf32> to vector<8x128xf32>
    %cst_131 = arith.constant 5.000000e-01 : f32
    %388 = vector.broadcast %cst_131 : f32 to vector<8x128xf32>
    %389 = arith.mulf %388, %387 : vector<8x128xf32>
    %390 = math.tanh %389 : vector<8x128xf32>
    %cst_132 = arith.constant 1.000000e+00 : f32
    %391 = vector.broadcast %cst_132 : f32 to vector<8x128xf32>
    %392 = arith.addf %391, %390 : vector<8x128xf32>
    %cst_133 = arith.constant 5.000000e-01 : f32
    %393 = vector.broadcast %cst_133 : f32 to vector<8x128xf32>
    %394 = arith.mulf %393, %392 : vector<8x128xf32>
    %395 = vector.extract_strided_slice %378 {offsets = [0, 256], sizes = [8, 128], strides = [1, 1]} : vector<8x512xf32> to vector<8x128xf32>
    %396 = math.tanh %395 : vector<8x128xf32>
    %397 = vector.extract_strided_slice %378 {offsets = [0, 384], sizes = [8, 128], strides = [1, 1]} : vector<8x512xf32> to vector<8x128xf32>
    %cst_134 = arith.constant 5.000000e-01 : f32
    %398 = vector.broadcast %cst_134 : f32 to vector<8x128xf32>
    %399 = arith.mulf %398, %397 : vector<8x128xf32>
    %400 = math.tanh %399 : vector<8x128xf32>
    %cst_135 = arith.constant 1.000000e+00 : f32
    %401 = vector.broadcast %cst_135 : f32 to vector<8x128xf32>
    %402 = arith.addf %401, %400 : vector<8x128xf32>
    %cst_136 = arith.constant 5.000000e-01 : f32
    %403 = vector.broadcast %cst_136 : f32 to vector<8x128xf32>
    %404 = arith.mulf %403, %402 : vector<8x128xf32>
    %405 = arith.mulf %394, %326 : vector<8x128xf32>
    %406 = arith.mulf %386, %396 : vector<8x128xf32>
    %407 = arith.addf %405, %406 : vector<8x128xf32>
    %408 = math.tanh %407 : vector<8x128xf32>
    %409 = arith.mulf %404, %408 : vector<8x128xf32>
    %c5_i32 = arith.constant 5 : i32
    %410 = arith.index_cast %c5_i32 : i32 to index
    %c0_137 = arith.constant 0 : index
    %c0_138 = arith.constant 0 : index
    %411 = vector.load %arg1[%410, %c0_137, %c0_138] : memref<8x8x1xf32, #tpu.memory_space<vmem>>, vector<1x8x1xf32>
    %412 = vector.shape_cast %411 : vector<1x8x1xf32> to vector<8x1xf32>
    %413 = arith.truncf %371 : vector<8x128xf32> to vector<8x128xbf16>
    %414 = vector.broadcast %412 : vector<8x1xf32> to vector<8x512xf32>
    %415 = vector.broadcast %0 : vector<1x512xf32> to vector<8x512xf32>
    %416 = arith.mulf %414, %415 : vector<8x512xf32>
    %417 = vector.broadcast %1 : vector<1x512xf32> to vector<8x512xf32>
    %418 = arith.addf %416, %417 : vector<8x512xf32>
    %c0_139 = arith.constant 0 : index
    %c0_140 = arith.constant 0 : index
    %419 = vector.load %arg3[%c0_139, %c0_140] : memref<128x512xbf16, #tpu.memory_space<vmem>>, vector<128x512xbf16>
    %cst_141 = arith.constant dense<0.000000e+00> : vector<8x512xf32>
    %420 = tpu.matmul %413, %419, %cst_141 {dimension_numbers = #tpu.dot_dimension_numbers<[1], [0], [0], [1], [0, 0, 1, 1], [], []>} : vector<8x128xbf16>, vector<128x512xbf16>, vector<8x512xf32> -> vector<8x512xf32>
    %421 = arith.addf %418, %420 : vector<8x512xf32>
    %422 = vector.extract_strided_slice %421 {offsets = [0, 0], sizes = [8, 128], strides = [1, 1]} : vector<8x512xf32> to vector<8x128xf32>
    %cst_142 = arith.constant 5.000000e-01 : f32
    %423 = vector.broadcast %cst_142 : f32 to vector<8x128xf32>
    %424 = arith.mulf %423, %422 : vector<8x128xf32>
    %425 = math.tanh %424 : vector<8x128xf32>
    %cst_143 = arith.constant 1.000000e+00 : f32
    %426 = vector.broadcast %cst_143 : f32 to vector<8x128xf32>
    %427 = arith.addf %426, %425 : vector<8x128xf32>
    %cst_144 = arith.constant 5.000000e-01 : f32
    %428 = vector.broadcast %cst_144 : f32 to vector<8x128xf32>
    %429 = arith.mulf %428, %427 : vector<8x128xf32>
    %430 = vector.extract_strided_slice %421 {offsets = [0, 128], sizes = [8, 128], strides = [1, 1]} : vector<8x512xf32> to vector<8x128xf32>
    %cst_145 = arith.constant 5.000000e-01 : f32
    %431 = vector.broadcast %cst_145 : f32 to vector<8x128xf32>
    %432 = arith.mulf %431, %430 : vector<8x128xf32>
    %433 = math.tanh %432 : vector<8x128xf32>
    %cst_146 = arith.constant 1.000000e+00 : f32
    %434 = vector.broadcast %cst_146 : f32 to vector<8x128xf32>
    %435 = arith.addf %434, %433 : vector<8x128xf32>
    %cst_147 = arith.constant 5.000000e-01 : f32
    %436 = vector.broadcast %cst_147 : f32 to vector<8x128xf32>
    %437 = arith.mulf %436, %435 : vector<8x128xf32>
    %438 = vector.extract_strided_slice %421 {offsets = [0, 256], sizes = [8, 128], strides = [1, 1]} : vector<8x512xf32> to vector<8x128xf32>
    %439 = math.tanh %438 : vector<8x128xf32>
    %440 = vector.extract_strided_slice %421 {offsets = [0, 384], sizes = [8, 128], strides = [1, 1]} : vector<8x512xf32> to vector<8x128xf32>
    %cst_148 = arith.constant 5.000000e-01 : f32
    %441 = vector.broadcast %cst_148 : f32 to vector<8x128xf32>
    %442 = arith.mulf %441, %440 : vector<8x128xf32>
    %443 = math.tanh %442 : vector<8x128xf32>
    %cst_149 = arith.constant 1.000000e+00 : f32
    %444 = vector.broadcast %cst_149 : f32 to vector<8x128xf32>
    %445 = arith.addf %444, %443 : vector<8x128xf32>
    %cst_150 = arith.constant 5.000000e-01 : f32
    %446 = vector.broadcast %cst_150 : f32 to vector<8x128xf32>
    %447 = arith.mulf %446, %445 : vector<8x128xf32>
    %448 = arith.mulf %437, %369 : vector<8x128xf32>
    %449 = arith.mulf %429, %439 : vector<8x128xf32>
    %450 = arith.addf %448, %449 : vector<8x128xf32>
    %451 = math.tanh %450 : vector<8x128xf32>
    %452 = arith.mulf %447, %451 : vector<8x128xf32>
    %453 = arith.truncf %452 : vector<8x128xf32> to vector<8x128xbf16>
    %454 = arith.truncf %409 : vector<8x128xf32> to vector<8x128xbf16>
    %455 = tpu.concatenate %453, %454 in 1 : vector<8x128xbf16>, vector<8x128xbf16> -> vector<8x256xbf16>
    %c0_151 = arith.constant 0 : index
    %c0_152 = arith.constant 0 : index
    %456 = vector.load %arg5[%c0_151, %c0_152] : memref<256x512xbf16, #tpu.memory_space<vmem>>, vector<256x512xbf16>
    %cst_153 = arith.constant dense<0.000000e+00> : vector<8x512xf32>
    %457 = tpu.matmul %455, %456, %cst_153 {dimension_numbers = #tpu.dot_dimension_numbers<[1], [0], [0], [1], [0, 0, 1, 1], [], []>} : vector<8x256xbf16>, vector<256x512xbf16>, vector<8x512xf32> -> vector<8x512xf32>
    %458 = vector.broadcast %2 : vector<1x512xf32> to vector<8x512xf32>
    %459 = arith.addf %457, %458 : vector<8x512xf32>
    %460 = vector.extract_strided_slice %459 {offsets = [0, 0], sizes = [8, 128], strides = [1, 1]} : vector<8x512xf32> to vector<8x128xf32>
    %cst_154 = arith.constant 5.000000e-01 : f32
    %461 = vector.broadcast %cst_154 : f32 to vector<8x128xf32>
    %462 = arith.mulf %461, %460 : vector<8x128xf32>
    %463 = math.tanh %462 : vector<8x128xf32>
    %cst_155 = arith.constant 1.000000e+00 : f32
    %464 = vector.broadcast %cst_155 : f32 to vector<8x128xf32>
    %465 = arith.addf %464, %463 : vector<8x128xf32>
    %cst_156 = arith.constant 5.000000e-01 : f32
    %466 = vector.broadcast %cst_156 : f32 to vector<8x128xf32>
    %467 = arith.mulf %466, %465 : vector<8x128xf32>
    %468 = vector.extract_strided_slice %459 {offsets = [0, 128], sizes = [8, 128], strides = [1, 1]} : vector<8x512xf32> to vector<8x128xf32>
    %cst_157 = arith.constant 5.000000e-01 : f32
    %469 = vector.broadcast %cst_157 : f32 to vector<8x128xf32>
    %470 = arith.mulf %469, %468 : vector<8x128xf32>
    %471 = math.tanh %470 : vector<8x128xf32>
    %cst_158 = arith.constant 1.000000e+00 : f32
    %472 = vector.broadcast %cst_158 : f32 to vector<8x128xf32>
    %473 = arith.addf %472, %471 : vector<8x128xf32>
    %cst_159 = arith.constant 5.000000e-01 : f32
    %474 = vector.broadcast %cst_159 : f32 to vector<8x128xf32>
    %475 = arith.mulf %474, %473 : vector<8x128xf32>
    %476 = vector.extract_strided_slice %459 {offsets = [0, 256], sizes = [8, 128], strides = [1, 1]} : vector<8x512xf32> to vector<8x128xf32>
    %477 = math.tanh %476 : vector<8x128xf32>
    %478 = vector.extract_strided_slice %459 {offsets = [0, 384], sizes = [8, 128], strides = [1, 1]} : vector<8x512xf32> to vector<8x128xf32>
    %cst_160 = arith.constant 5.000000e-01 : f32
    %479 = vector.broadcast %cst_160 : f32 to vector<8x128xf32>
    %480 = arith.mulf %479, %478 : vector<8x128xf32>
    %481 = math.tanh %480 : vector<8x128xf32>
    %cst_161 = arith.constant 1.000000e+00 : f32
    %482 = vector.broadcast %cst_161 : f32 to vector<8x128xf32>
    %483 = arith.addf %482, %481 : vector<8x128xf32>
    %cst_162 = arith.constant 5.000000e-01 : f32
    %484 = vector.broadcast %cst_162 : f32 to vector<8x128xf32>
    %485 = arith.mulf %484, %483 : vector<8x128xf32>
    %486 = arith.mulf %475, %407 : vector<8x128xf32>
    %487 = arith.mulf %467, %477 : vector<8x128xf32>
    %488 = arith.addf %486, %487 : vector<8x128xf32>
    %489 = math.tanh %488 : vector<8x128xf32>
    %490 = arith.mulf %485, %489 : vector<8x128xf32>
    %c6_i32 = arith.constant 6 : i32
    %491 = arith.index_cast %c6_i32 : i32 to index
    %c0_163 = arith.constant 0 : index
    %c0_164 = arith.constant 0 : index
    %492 = vector.load %arg1[%491, %c0_163, %c0_164] : memref<8x8x1xf32, #tpu.memory_space<vmem>>, vector<1x8x1xf32>
    %493 = vector.shape_cast %492 : vector<1x8x1xf32> to vector<8x1xf32>
    %494 = arith.truncf %452 : vector<8x128xf32> to vector<8x128xbf16>
    %495 = vector.broadcast %493 : vector<8x1xf32> to vector<8x512xf32>
    %496 = vector.broadcast %0 : vector<1x512xf32> to vector<8x512xf32>
    %497 = arith.mulf %495, %496 : vector<8x512xf32>
    %498 = vector.broadcast %1 : vector<1x512xf32> to vector<8x512xf32>
    %499 = arith.addf %497, %498 : vector<8x512xf32>
    %c0_165 = arith.constant 0 : index
    %c0_166 = arith.constant 0 : index
    %500 = vector.load %arg3[%c0_165, %c0_166] : memref<128x512xbf16, #tpu.memory_space<vmem>>, vector<128x512xbf16>
    %cst_167 = arith.constant dense<0.000000e+00> : vector<8x512xf32>
    %501 = tpu.matmul %494, %500, %cst_167 {dimension_numbers = #tpu.dot_dimension_numbers<[1], [0], [0], [1], [0, 0, 1, 1], [], []>} : vector<8x128xbf16>, vector<128x512xbf16>, vector<8x512xf32> -> vector<8x512xf32>
    %502 = arith.addf %499, %501 : vector<8x512xf32>
    %503 = vector.extract_strided_slice %502 {offsets = [0, 0], sizes = [8, 128], strides = [1, 1]} : vector<8x512xf32> to vector<8x128xf32>
    %cst_168 = arith.constant 5.000000e-01 : f32
    %504 = vector.broadcast %cst_168 : f32 to vector<8x128xf32>
    %505 = arith.mulf %504, %503 : vector<8x128xf32>
    %506 = math.tanh %505 : vector<8x128xf32>
    %cst_169 = arith.constant 1.000000e+00 : f32
    %507 = vector.broadcast %cst_169 : f32 to vector<8x128xf32>
    %508 = arith.addf %507, %506 : vector<8x128xf32>
    %cst_170 = arith.constant 5.000000e-01 : f32
    %509 = vector.broadcast %cst_170 : f32 to vector<8x128xf32>
    %510 = arith.mulf %509, %508 : vector<8x128xf32>
    %511 = vector.extract_strided_slice %502 {offsets = [0, 128], sizes = [8, 128], strides = [1, 1]} : vector<8x512xf32> to vector<8x128xf32>
    %cst_171 = arith.constant 5.000000e-01 : f32
    %512 = vector.broadcast %cst_171 : f32 to vector<8x128xf32>
    %513 = arith.mulf %512, %511 : vector<8x128xf32>
    %514 = math.tanh %513 : vector<8x128xf32>
    %cst_172 = arith.constant 1.000000e+00 : f32
    %515 = vector.broadcast %cst_172 : f32 to vector<8x128xf32>
    %516 = arith.addf %515, %514 : vector<8x128xf32>
    %cst_173 = arith.constant 5.000000e-01 : f32
    %517 = vector.broadcast %cst_173 : f32 to vector<8x128xf32>
    %518 = arith.mulf %517, %516 : vector<8x128xf32>
    %519 = vector.extract_strided_slice %502 {offsets = [0, 256], sizes = [8, 128], strides = [1, 1]} : vector<8x512xf32> to vector<8x128xf32>
    %520 = math.tanh %519 : vector<8x128xf32>
    %521 = vector.extract_strided_slice %502 {offsets = [0, 384], sizes = [8, 128], strides = [1, 1]} : vector<8x512xf32> to vector<8x128xf32>
    %cst_174 = arith.constant 5.000000e-01 : f32
    %522 = vector.broadcast %cst_174 : f32 to vector<8x128xf32>
    %523 = arith.mulf %522, %521 : vector<8x128xf32>
    %524 = math.tanh %523 : vector<8x128xf32>
    %cst_175 = arith.constant 1.000000e+00 : f32
    %525 = vector.broadcast %cst_175 : f32 to vector<8x128xf32>
    %526 = arith.addf %525, %524 : vector<8x128xf32>
    %cst_176 = arith.constant 5.000000e-01 : f32
    %527 = vector.broadcast %cst_176 : f32 to vector<8x128xf32>
    %528 = arith.mulf %527, %526 : vector<8x128xf32>
    %529 = arith.mulf %518, %450 : vector<8x128xf32>
    %530 = arith.mulf %510, %520 : vector<8x128xf32>
    %531 = arith.addf %529, %530 : vector<8x128xf32>
    %532 = math.tanh %531 : vector<8x128xf32>
    %533 = arith.mulf %528, %532 : vector<8x128xf32>
    %534 = arith.truncf %533 : vector<8x128xf32> to vector<8x128xbf16>
    %535 = arith.truncf %490 : vector<8x128xf32> to vector<8x128xbf16>
    %536 = tpu.concatenate %534, %535 in 1 : vector<8x128xbf16>, vector<8x128xbf16> -> vector<8x256xbf16>
    %c0_177 = arith.constant 0 : index
    %c0_178 = arith.constant 0 : index
    %537 = vector.load %arg5[%c0_177, %c0_178] : memref<256x512xbf16, #tpu.memory_space<vmem>>, vector<256x512xbf16>
    %cst_179 = arith.constant dense<0.000000e+00> : vector<8x512xf32>
    %538 = tpu.matmul %536, %537, %cst_179 {dimension_numbers = #tpu.dot_dimension_numbers<[1], [0], [0], [1], [0, 0, 1, 1], [], []>} : vector<8x256xbf16>, vector<256x512xbf16>, vector<8x512xf32> -> vector<8x512xf32>
    %539 = vector.broadcast %2 : vector<1x512xf32> to vector<8x512xf32>
    %540 = arith.addf %538, %539 : vector<8x512xf32>
    %541 = vector.extract_strided_slice %540 {offsets = [0, 0], sizes = [8, 128], strides = [1, 1]} : vector<8x512xf32> to vector<8x128xf32>
    %cst_180 = arith.constant 5.000000e-01 : f32
    %542 = vector.broadcast %cst_180 : f32 to vector<8x128xf32>
    %543 = arith.mulf %542, %541 : vector<8x128xf32>
    %544 = math.tanh %543 : vector<8x128xf32>
    %cst_181 = arith.constant 1.000000e+00 : f32
    %545 = vector.broadcast %cst_181 : f32 to vector<8x128xf32>
    %546 = arith.addf %545, %544 : vector<8x128xf32>
    %cst_182 = arith.constant 5.000000e-01 : f32
    %547 = vector.broadcast %cst_182 : f32 to vector<8x128xf32>
    %548 = arith.mulf %547, %546 : vector<8x128xf32>
    %549 = vector.extract_strided_slice %540 {offsets = [0, 128], sizes = [8, 128], strides = [1, 1]} : vector<8x512xf32> to vector<8x128xf32>
    %cst_183 = arith.constant 5.000000e-01 : f32
    %550 = vector.broadcast %cst_183 : f32 to vector<8x128xf32>
    %551 = arith.mulf %550, %549 : vector<8x128xf32>
    %552 = math.tanh %551 : vector<8x128xf32>
    %cst_184 = arith.constant 1.000000e+00 : f32
    %553 = vector.broadcast %cst_184 : f32 to vector<8x128xf32>
    %554 = arith.addf %553, %552 : vector<8x128xf32>
    %cst_185 = arith.constant 5.000000e-01 : f32
    %555 = vector.broadcast %cst_185 : f32 to vector<8x128xf32>
    %556 = arith.mulf %555, %554 : vector<8x128xf32>
    %557 = vector.extract_strided_slice %540 {offsets = [0, 256], sizes = [8, 128], strides = [1, 1]} : vector<8x512xf32> to vector<8x128xf32>
    %558 = math.tanh %557 : vector<8x128xf32>
    %559 = vector.extract_strided_slice %540 {offsets = [0, 384], sizes = [8, 128], strides = [1, 1]} : vector<8x512xf32> to vector<8x128xf32>
    %cst_186 = arith.constant 5.000000e-01 : f32
    %560 = vector.broadcast %cst_186 : f32 to vector<8x128xf32>
    %561 = arith.mulf %560, %559 : vector<8x128xf32>
    %562 = math.tanh %561 : vector<8x128xf32>
    %cst_187 = arith.constant 1.000000e+00 : f32
    %563 = vector.broadcast %cst_187 : f32 to vector<8x128xf32>
    %564 = arith.addf %563, %562 : vector<8x128xf32>
    %cst_188 = arith.constant 5.000000e-01 : f32
    %565 = vector.broadcast %cst_188 : f32 to vector<8x128xf32>
    %566 = arith.mulf %565, %564 : vector<8x128xf32>
    %567 = arith.mulf %556, %488 : vector<8x128xf32>
    %568 = arith.mulf %548, %558 : vector<8x128xf32>
    %569 = arith.addf %567, %568 : vector<8x128xf32>
    %570 = math.tanh %569 : vector<8x128xf32>
    %571 = arith.mulf %566, %570 : vector<8x128xf32>
    %c7_i32 = arith.constant 7 : i32
    %572 = arith.index_cast %c7_i32 : i32 to index
    %c0_189 = arith.constant 0 : index
    %c0_190 = arith.constant 0 : index
    %573 = vector.load %arg1[%572, %c0_189, %c0_190] : memref<8x8x1xf32, #tpu.memory_space<vmem>>, vector<1x8x1xf32>
    %574 = vector.shape_cast %573 : vector<1x8x1xf32> to vector<8x1xf32>
    %575 = arith.truncf %533 : vector<8x128xf32> to vector<8x128xbf16>
    %576 = vector.broadcast %574 : vector<8x1xf32> to vector<8x512xf32>
    %577 = vector.broadcast %0 : vector<1x512xf32> to vector<8x512xf32>
    %578 = arith.mulf %576, %577 : vector<8x512xf32>
    %579 = vector.broadcast %1 : vector<1x512xf32> to vector<8x512xf32>
    %580 = arith.addf %578, %579 : vector<8x512xf32>
    %c0_191 = arith.constant 0 : index
    %c0_192 = arith.constant 0 : index
    %581 = vector.load %arg3[%c0_191, %c0_192] : memref<128x512xbf16, #tpu.memory_space<vmem>>, vector<128x512xbf16>
    %cst_193 = arith.constant dense<0.000000e+00> : vector<8x512xf32>
    %582 = tpu.matmul %575, %581, %cst_193 {dimension_numbers = #tpu.dot_dimension_numbers<[1], [0], [0], [1], [0, 0, 1, 1], [], []>} : vector<8x128xbf16>, vector<128x512xbf16>, vector<8x512xf32> -> vector<8x512xf32>
    %583 = arith.addf %580, %582 : vector<8x512xf32>
    %584 = vector.extract_strided_slice %583 {offsets = [0, 0], sizes = [8, 128], strides = [1, 1]} : vector<8x512xf32> to vector<8x128xf32>
    %cst_194 = arith.constant 5.000000e-01 : f32
    %585 = vector.broadcast %cst_194 : f32 to vector<8x128xf32>
    %586 = arith.mulf %585, %584 : vector<8x128xf32>
    %587 = math.tanh %586 : vector<8x128xf32>
    %cst_195 = arith.constant 1.000000e+00 : f32
    %588 = vector.broadcast %cst_195 : f32 to vector<8x128xf32>
    %589 = arith.addf %588, %587 : vector<8x128xf32>
    %cst_196 = arith.constant 5.000000e-01 : f32
    %590 = vector.broadcast %cst_196 : f32 to vector<8x128xf32>
    %591 = arith.mulf %590, %589 : vector<8x128xf32>
    %592 = vector.extract_strided_slice %583 {offsets = [0, 128], sizes = [8, 128], strides = [1, 1]} : vector<8x512xf32> to vector<8x128xf32>
    %cst_197 = arith.constant 5.000000e-01 : f32
    %593 = vector.broadcast %cst_197 : f32 to vector<8x128xf32>
    %594 = arith.mulf %593, %592 : vector<8x128xf32>
    %595 = math.tanh %594 : vector<8x128xf32>
    %cst_198 = arith.constant 1.000000e+00 : f32
    %596 = vector.broadcast %cst_198 : f32 to vector<8x128xf32>
    %597 = arith.addf %596, %595 : vector<8x128xf32>
    %cst_199 = arith.constant 5.000000e-01 : f32
    %598 = vector.broadcast %cst_199 : f32 to vector<8x128xf32>
    %599 = arith.mulf %598, %597 : vector<8x128xf32>
    %600 = vector.extract_strided_slice %583 {offsets = [0, 256], sizes = [8, 128], strides = [1, 1]} : vector<8x512xf32> to vector<8x128xf32>
    %601 = math.tanh %600 : vector<8x128xf32>
    %602 = vector.extract_strided_slice %583 {offsets = [0, 384], sizes = [8, 128], strides = [1, 1]} : vector<8x512xf32> to vector<8x128xf32>
    %cst_200 = arith.constant 5.000000e-01 : f32
    %603 = vector.broadcast %cst_200 : f32 to vector<8x128xf32>
    %604 = arith.mulf %603, %602 : vector<8x128xf32>
    %605 = math.tanh %604 : vector<8x128xf32>
    %cst_201 = arith.constant 1.000000e+00 : f32
    %606 = vector.broadcast %cst_201 : f32 to vector<8x128xf32>
    %607 = arith.addf %606, %605 : vector<8x128xf32>
    %cst_202 = arith.constant 5.000000e-01 : f32
    %608 = vector.broadcast %cst_202 : f32 to vector<8x128xf32>
    %609 = arith.mulf %608, %607 : vector<8x128xf32>
    %610 = arith.mulf %599, %531 : vector<8x128xf32>
    %611 = arith.mulf %591, %601 : vector<8x128xf32>
    %612 = arith.addf %610, %611 : vector<8x128xf32>
    %613 = math.tanh %612 : vector<8x128xf32>
    %614 = arith.mulf %609, %613 : vector<8x128xf32>
    %615 = arith.truncf %614 : vector<8x128xf32> to vector<8x128xbf16>
    %616 = arith.truncf %571 : vector<8x128xf32> to vector<8x128xbf16>
    %617 = tpu.concatenate %615, %616 in 1 : vector<8x128xbf16>, vector<8x128xbf16> -> vector<8x256xbf16>
    %c0_203 = arith.constant 0 : index
    %c0_204 = arith.constant 0 : index
    %618 = vector.load %arg5[%c0_203, %c0_204] : memref<256x512xbf16, #tpu.memory_space<vmem>>, vector<256x512xbf16>
    %cst_205 = arith.constant dense<0.000000e+00> : vector<8x512xf32>
    %619 = tpu.matmul %617, %618, %cst_205 {dimension_numbers = #tpu.dot_dimension_numbers<[1], [0], [0], [1], [0, 0, 1, 1], [], []>} : vector<8x256xbf16>, vector<256x512xbf16>, vector<8x512xf32> -> vector<8x512xf32>
    %620 = vector.broadcast %2 : vector<1x512xf32> to vector<8x512xf32>
    %621 = arith.addf %619, %620 : vector<8x512xf32>
    %622 = vector.extract_strided_slice %621 {offsets = [0, 0], sizes = [8, 128], strides = [1, 1]} : vector<8x512xf32> to vector<8x128xf32>
    %cst_206 = arith.constant 5.000000e-01 : f32
    %623 = vector.broadcast %cst_206 : f32 to vector<8x128xf32>
    %624 = arith.mulf %623, %622 : vector<8x128xf32>
    %625 = math.tanh %624 : vector<8x128xf32>
    %cst_207 = arith.constant 1.000000e+00 : f32
    %626 = vector.broadcast %cst_207 : f32 to vector<8x128xf32>
    %627 = arith.addf %626, %625 : vector<8x128xf32>
    %cst_208 = arith.constant 5.000000e-01 : f32
    %628 = vector.broadcast %cst_208 : f32 to vector<8x128xf32>
    %629 = arith.mulf %628, %627 : vector<8x128xf32>
    %630 = vector.extract_strided_slice %621 {offsets = [0, 128], sizes = [8, 128], strides = [1, 1]} : vector<8x512xf32> to vector<8x128xf32>
    %cst_209 = arith.constant 5.000000e-01 : f32
    %631 = vector.broadcast %cst_209 : f32 to vector<8x128xf32>
    %632 = arith.mulf %631, %630 : vector<8x128xf32>
    %633 = math.tanh %632 : vector<8x128xf32>
    %cst_210 = arith.constant 1.000000e+00 : f32
    %634 = vector.broadcast %cst_210 : f32 to vector<8x128xf32>
    %635 = arith.addf %634, %633 : vector<8x128xf32>
    %cst_211 = arith.constant 5.000000e-01 : f32
    %636 = vector.broadcast %cst_211 : f32 to vector<8x128xf32>
    %637 = arith.mulf %636, %635 : vector<8x128xf32>
    %638 = vector.extract_strided_slice %621 {offsets = [0, 256], sizes = [8, 128], strides = [1, 1]} : vector<8x512xf32> to vector<8x128xf32>
    %639 = math.tanh %638 : vector<8x128xf32>
    %640 = vector.extract_strided_slice %621 {offsets = [0, 384], sizes = [8, 128], strides = [1, 1]} : vector<8x512xf32> to vector<8x128xf32>
    %cst_212 = arith.constant 5.000000e-01 : f32
    %641 = vector.broadcast %cst_212 : f32 to vector<8x128xf32>
    %642 = arith.mulf %641, %640 : vector<8x128xf32>
    %643 = math.tanh %642 : vector<8x128xf32>
    %cst_213 = arith.constant 1.000000e+00 : f32
    %644 = vector.broadcast %cst_213 : f32 to vector<8x128xf32>
    %645 = arith.addf %644, %643 : vector<8x128xf32>
    %cst_214 = arith.constant 5.000000e-01 : f32
    %646 = vector.broadcast %cst_214 : f32 to vector<8x128xf32>
    %647 = arith.mulf %646, %645 : vector<8x128xf32>
    %648 = arith.mulf %637, %569 : vector<8x128xf32>
    %649 = arith.mulf %629, %639 : vector<8x128xf32>
    %650 = arith.addf %648, %649 : vector<8x128xf32>
    %651 = math.tanh %650 : vector<8x128xf32>
    %652 = arith.mulf %647, %651 : vector<8x128xf32>
    %c8_i32 = arith.constant 8 : i32
    %653 = vector.broadcast %3 : vector<1x128xf32> to vector<8x128xf32>
    %654 = arith.mulf %652, %653 : vector<8x128xf32>
    %cst_215 = arith.constant dense<0.000000e+00> : vector<8xf32>
    %655 = vector.multi_reduction <add>, %654, %cst_215 [1] : vector<8x128xf32> to vector<8xf32>
    %656 = vector.shape_cast %655 : vector<8xf32> to vector<8x1xf32>
    %c0_216 = arith.constant 0 : index
    %657 = memref.load %arg8[%c0_216] : memref<1xf32, #tpu.memory_space<smem>>
    %658 = vector.broadcast %657 : f32 to vector<8x1xf32>
    %659 = arith.addf %656, %658 : vector<8x1xf32>
    %c0_217 = arith.constant 0 : index
    %c0_218 = arith.constant 0 : index
    %660 = vector.load %arg9[%c0_217, %c0_218] : memref<8x1xf32, #tpu.memory_space<vmem>>, vector<8x1xf32>
    tpu.vector_store %arg9[%c0_217, %c0_218], %659 {strides = array<i32>} : memref<8x1xf32, #tpu.memory_space<vmem>>, vector<8x1xf32>,
    return
  }
  func.func @transform_0(%arg0: i32) -> (i32, i32, i32) {
    %c0_i32 = arith.constant 0 : i32
    %c0_i32_0 = arith.constant 0 : i32
    %c0_i32_1 = arith.constant 0 : i32
    return %c0_i32, %arg0, %c0_i32_0 : i32, i32, i32
  }
  func.func @transform_1(%arg0: i32) -> (i32, i32) {
    %c0_i32 = arith.constant 0 : i32
    %c0_i32_0 = arith.constant 0 : i32
    %c0_i32_1 = arith.constant 0 : i32
    return %c0_i32, %c0_i32_0 : i32, i32
  }
  func.func @transform_2(%arg0: i32) -> (i32, i32) {
    %c0_i32 = arith.constant 0 : i32
    %c0_i32_0 = arith.constant 0 : i32
    %c0_i32_1 = arith.constant 0 : i32
    return %c0_i32, %c0_i32_0 : i32, i32
  }
  func.func @transform_3(%arg0: i32) -> (i32, i32) {
    %c0_i32 = arith.constant 0 : i32
    %c0_i32_0 = arith.constant 0 : i32
    %c0_i32_1 = arith.constant 0 : i32
    return %c0_i32, %c0_i32_0 : i32, i32
  }
  func.func @transform_4(%arg0: i32) -> (i32, i32) {
    %c0_i32 = arith.constant 0 : i32
    %c0_i32_0 = arith.constant 0 : i32
    %c0_i32_1 = arith.constant 0 : i32
    return %c0_i32, %c0_i32_0 : i32, i32
  }
  func.func @transform_5(%arg0: i32) -> (i32, i32) {
    %c0_i32 = arith.constant 0 : i32
    %c0_i32_0 = arith.constant 0 : i32
    %c0_i32_1 = arith.constant 0 : i32
    return %c0_i32, %c0_i32_0 : i32, i32
  }
  func.func @transform_6(%arg0: i32) -> (i32, i32) {
    %c0_i32 = arith.constant 0 : i32
    %c0_i32_0 = arith.constant 0 : i32
    %c0_i32_1 = arith.constant 0 : i32
    return %c0_i32, %c0_i32_0 : i32, i32
  }
  func.func @transform_7(%arg0: i32) -> i32 {
    %c0_i32 = arith.constant 0 : i32
    %c0_i32_0 = arith.constant 0 : i32
    return %c0_i32 : i32
  }
  func.func @transform_8(%arg0: i32) -> (i32, i32) {
    %c0_i32 = arith.constant 0 : i32
    %c0_i32_0 = arith.constant 0 : i32
    return %arg0, %c0_i32 : i32, i32
  }
}

</mosaic_0001>

<bundles_post_ra>
// kernel: lstm_model_forward.1
= control target key start
LH: loop header
LB: loop body
LE: loop exit
PB: predicated region body
PF: predicated region fallthrough
CT: control target
= control target key end

     0   :  { %v5584_v1 = vmov 0   ;;  %vm2452_vm0 = vcmask 7168   ;;  %s5575_s2 = inlined_call_operand.vmem [shape: bf16[128,512], index: 2, kind: input, shape index: {}]   ;;  %s5576_s0 = inlined_call_operand.vmem [shape: f32[8,8,1], index: 0, kind: input, shape index: {}]   ;;  %s5577_s4 = inlined_call_operand.vmem [shape: bf16[256,512], index: 4, kind: input, shape index: {}]   ;;  %s5578_s1 = inlined_call_operand.vmem [shape: f32[1,512], index: 1, kind: input, shape index: {}]   ;;  %s5579_s3 = inlined_call_operand.vmem [shape: f32[1,512], index: 3, kind: input, shape index: {}]   ;;  %s5580_s5 = inlined_call_operand.vmem [shape: f32[1,512], index: 5, kind: input, shape index: {}]   ;;  %s5581_s6 = inlined_call_operand.vmem [shape: f32[1,128], index: 6, kind: input, shape index: {}]   ;;  %s5582_s7 = inlined_call_operand.<no memory space> [shape: f32[1], index: 7, kind: input, shape index: {}]   ;;  %s5583_s8 = inlined_call_operand.vmem [shape: f32[8,1], index: 8, kind: output, shape index: {}]  }
   0x1   :  { %v3110_v0 = vld [vmem:[%s5575_s2 + $0x4] ss:$16 sps:$4 sm:$0xff]   ;;  %315 = vmatprep.mubr.bf16.mxu0 %v5584_v1  ;;  %356 = vmatprep.mubr.bf16.mxu1 %v5584_v1  ;;  %v3117_v2 = vld [vmem:[%s5575_s2 + $0xc] ss:$16 sps:$4 sm:$0xff]   ;;  %v3125_v3 = vld [vmem:[%s5575_s2] ss:$16 sps:$4 sm:$0xff]  }
   0x2   :  { %5931 = vst [vmem:[#allocation3_spill] sm:$0xff] %v3110_v0  ;;  %5932 = vst [vmem:[#allocation4_spill] sm:$0xff] %v3117_v2  ;;  %2563 = vset.pattern.permute.xlu0 %v5584_v1  ;;  %2564 = vset.pattern.permute.xlu1 %v5584_v1  ;;  %v3130_v4 = vld [vmem:[%s5575_s2 + $0x8] ss:$16 sps:$4 sm:$0xff]   ;;  %v3136_v5 = vld [vmem:[%s5575_s2 + $0x24] ss:$16 sps:$4 sm:$0xff]  }
   0x3   :  { %283 = vmatprep.subr.bf16.mxu0 %v3110_v0  ;;  %324 = vmatprep.subr.bf16.mxu1 %v3117_v2  ;;  %v3143_v6 = vld [vmem:[%s5575_s2 + $0x2c] ss:$16 sps:$4 sm:$0xff]   ;;  %v3148_v7 = vld [vmem:[%s5575_s2 + $0x20] ss:$16 sps:$4 sm:$0xff]   ;;  %v3154_v8 = vld [vmem:[%s5575_s2 + $0x28] ss:$16 sps:$4 sm:$0xff]  }
   0x4   :  { %284 = vmatpush1.bf16.msra.mxu0 %v3125_v3  ;;  %325 = vmatpush1.bf16.msra.mxu1 %v3130_v4  ;;  %v3160_v9 = vld [vmem:[%s5575_s2 + $0x44] ss:$16 sps:$4 sm:$0xff]   ;;  %v3165_v10 = vld [vmem:[%s5575_s2 + $0x4c] ss:$16 sps:$4 sm:$0xff]   ;;  %v3170_v11 = vld [vmem:[%s5575_s2 + $0x40] ss:$16 sps:$4 sm:$0xff]  }
   0x5   :  { %285 = vmatprep.subr.bf16.mxu0 %v3136_v5  ;;  %326 = vmatprep.subr.bf16.mxu1 %v3143_v6  ;;  %v3175_v12 = vld [vmem:[%s5575_s2 + $0x48] ss:$16 sps:$4 sm:$0xff]   ;;  %v3182_v13 = vld [vmem:[%s5575_s2 + $0x64] ss:$16 sps:$4 sm:$0xff]   ;;  %v3189_v14 = vld [vmem:[%s5575_s2 + $0x6c] ss:$16 sps:$4 sm:$0xff]  }
   0x6   :  { %v3194_v15 = vld [vmem:[%s5575_s2 + $0x60] ss:$16 sps:$4 sm:$0xff]   ;;  %v3201_v16 = vld [vmem:[%s5575_s2 + $0x68] ss:$16 sps:$4 sm:$0xff]   ;;  %v3206_v17 = vld [vmem:[%s5575_s2 + $0x84] ss:$16 sps:$4 sm:$0xff]  }
   0x7   :  { %v3213_v18 = vld [vmem:[%s5575_s2 + $0x8c] ss:$16 sps:$4 sm:$0xff]   ;;  %v3218_v19 = vld [vmem:[%s5575_s2 + $0x80] ss:$16 sps:$4 sm:$0xff]   ;;  %v3223_v20 = vld [vmem:[%s5575_s2 + $0x88] ss:$16 sps:$4 sm:$0xff]  }
   0x8   :  { %286 = vmatpush1.bf16.msra.mxu0 %v3148_v7  ;;  %327 = vmatpush1.bf16.msra.mxu1 %v3154_v8  ;;  %v3230_v21 = vld [vmem:[%s5575_s2 + $0xa4] ss:$16 sps:$4 sm:$0xff]   ;;  %v3237_v22 = vld [vmem:[%s5575_s2 + $0xac] ss:$16 sps:$4 sm:$0xff]   ;;  %v3244_v23 = vld [vmem:[%s5575_s2 + $0xa0] ss:$16 sps:$4 sm:$0xff]  }
   0x9   :  { %287 = vmatprep.subr.bf16.mxu0 %v3160_v9  ;;  %328 = vmatprep.subr.bf16.mxu1 %v3165_v10  ;;  %v3249_v24 = vld [vmem:[%s5575_s2 + $0xa8] ss:$16 sps:$4 sm:$0xff]   ;;  %v3256_v25 = vld [vmem:[%s5575_s2 + $0xc4] ss:$16 sps:$4 sm:$0xff]   ;;  %v3261_v26 = vld [vmem:[%s5575_s2 + $0xcc] ss:$16 sps:$4 sm:$0xff]  }
   0xa   :  { %v35_v27 = vld [vmem:[%s5576_s0] sm:$0xff]  ;;  %v2554_v29 = vld [vmem:[%s5576_s0 + $0x8] sm:$0xff]  ;;  %v2559_v38 = vld [vmem:[%s5576_s0 + $0x30] sm:$0xff] }
   0xb   :  { %v3269_v28 = vld [vmem:[%s5575_s2 + $0xc0] ss:$16 sps:$4 sm:$0xff]   ;;  %38 = vperm.xlu0 %2563, %v35_v27   ;;  %v3279_v30 = vld [vmem:[%s5575_s2 + $0xc8] ss:$16 sps:$4 sm:$0xff]   ;;  %v3284_v31 = vld [vmem:[%s5575_s2 + $0xe4] ss:$16 sps:$4 sm:$0xff]  }
   0xc   :  { %288 = vmatpush1.bf16.msra.mxu0 %v3170_v11  ;;  %329 = vmatpush1.bf16.msra.mxu1 %v3175_v12  ;;  %v3291_v32 = vld [vmem:[%s5575_s2 + $0xec] ss:$16 sps:$4 sm:$0xff]   ;;  %v3296_v33 = vld [vmem:[%s5575_s2 + $0xe0] ss:$16 sps:$4 sm:$0xff]   ;;  %v3301_v34 = vld [vmem:[%s5575_s2 + $0xe8] ss:$16 sps:$4 sm:$0xff]  }
   0xd   :  { %289 = vmatprep.subr.bf16.mxu0 %v3182_v13  ;;  %330 = vmatprep.subr.bf16.mxu1 %v3189_v14  ;;  %v2557_v35 = vld [vmem:[%s5576_s0 + $0x20] sm:$0xff]  ;;  %v3318_v37 = vld [vmem:[%s5577_s4 + $0xc] ss:$16 sps:$4 sm:$0xff]   ;;  %v3333_v40 = vld [vmem:[%s5577_s4 + $0x8] ss:$16 sps:$4 sm:$0xff]  }
   0xe   :  { %v3311_v36 = vld [vmem:[%s5577_s4 + $0x4] ss:$16 sps:$4 sm:$0xff]   ;;  %v3326_v39 = vld [vmem:[%s5577_s4] ss:$16 sps:$4 sm:$0xff]   ;;  %v3345_v42 = vld [vmem:[%s5577_s4 + $0x2c] ss:$16 sps:$4 sm:$0xff]  }
   0xf   :  { %897 = vperm.xlu0 %2563, %v2554_v29   ;;  %v3338_v41 = vld [vmem:[%s5577_s4 + $0x24] ss:$16 sps:$4 sm:$0xff]   ;;  %v3352_v43 = vld [vmem:[%s5577_s4 + $0x20] ss:$16 sps:$4 sm:$0xff]   ;;  %v3357_v44 = vld [vmem:[%s5577_s4 + $0x28] ss:$16 sps:$4 sm:$0xff]  }
  0x10   :  { %290 = vmatpush1.bf16.msra.mxu0 %v3194_v15  ;;  %331 = vmatpush1.bf16.msra.mxu1 %v3201_v16  ;;  %v3364_v45 = vld [vmem:[%s5577_s4 + $0x44] ss:$16 sps:$4 sm:$0xff]   ;;  %v3371_v46 = vld [vmem:[%s5577_s4 + $0x4c] ss:$16 sps:$4 sm:$0xff]   ;;  %v3378_v47 = vld [vmem:[%s5577_s4 + $0x40] ss:$16 sps:$4 sm:$0xff]  }
  0x11   :  { %291 = vmatprep.subr.bf16.mxu0 %v3206_v17  ;;  %332 = vmatprep.subr.bf16.mxu1 %v3213_v18  ;;  %5933 = vst [vmem:[#allocation5_spill] sm:$0xff] %v3371_v46  ;;  %5934 = vst [vmem:[#allocation6_spill] sm:$0xff] %v3378_v47  ;;  %v3385_v48 = vld [vmem:[%s5577_s4 + $0x48] ss:$16 sps:$4 sm:$0xff]   ;;  %v3390_v49 = vld [vmem:[%s5577_s4 + $0x64] ss:$16 sps:$4 sm:$0xff]  }
  0x12   :  { %5935 = vst [vmem:[#allocation7_spill] sm:$0xff] %v3385_v48  ;;  %5936 = vst [vmem:[#allocation8_spill] sm:$0xff] %v3390_v49  ;;  %v3397_v50 = vld [vmem:[%s5577_s4 + $0x6c] ss:$16 sps:$4 sm:$0xff]   ;;  %v3402_v51 = vld [vmem:[%s5577_s4 + $0x60] ss:$16 sps:$4 sm:$0xff]  }
  0x13   :  { %1560 = vperm.xlu0 %2563, %v2557_v35   ;;  %5937 = vst [vmem:[#allocation9_spill] sm:$0xff] %v3397_v50  ;;  %5938 = vst [vmem:[#allocation10_spill] sm:$0xff] %v3402_v51  ;;  %v3407_v52 = vld [vmem:[%s5577_s4 + $0x68] ss:$16 sps:$4 sm:$0xff]   ;;  %v3412_v53 = vld [vmem:[%s5577_s4 + $0x84] ss:$16 sps:$4 sm:$0xff]  }
  0x14   :  { %292 = vmatpush1.bf16.msra.mxu0 %v3218_v19  ;;  %333 = vmatpush1.bf16.msra.mxu1 %v3223_v20  ;;  %5939 = vst [vmem:[#allocation11_spill] sm:$0xff] %v3407_v52  ;;  %5940 = vst [vmem:[#allocation12_spill] sm:$0xff] %v3412_v53  ;;  %v3417_v54 = vld [vmem:[%s5577_s4 + $0x8c] ss:$16 sps:$4 sm:$0xff]   ;;  %v3426_v55 = vld [vmem:[%s5577_s4 + $0x80] ss:$16 sps:$4 sm:$0xff]  }
  0x15   :  { %293 = vmatprep.subr.bf16.mxu0 %v3230_v21  ;;  %334 = vmatprep.subr.bf16.mxu1 %v3237_v22  ;;  %5941 = vst [vmem:[#allocation13_spill] sm:$0xff] %v3417_v54  ;;  %5942 = vst [vmem:[#allocation14_spill] sm:$0xff] %v3426_v55  ;;  %v3431_v56 = vld [vmem:[%s5577_s4 + $0x88] ss:$16 sps:$4 sm:$0xff]   ;;  %v3436_v57 = vld [vmem:[%s5577_s4 + $0xa4] ss:$16 sps:$4 sm:$0xff]  }
  0x16   :  { %5943 = vst [vmem:[#allocation15_spill] sm:$0xff] %v3431_v56  ;;  %5944 = vst [vmem:[#allocation16_spill] sm:$0xff] %v3436_v57  ;;  %v3441_v58 = vld [vmem:[%s5577_s4 + $0xac] ss:$16 sps:$4 sm:$0xff]   ;;  %v3450_v59 = vld [vmem:[%s5577_s4 + $0xa0] ss:$16 sps:$4 sm:$0xff]  }
  0x17   :  { %2002 = vperm.xlu0 %2563, %v2559_v38   ;;  %5945 = vst [vmem:[#allocation17_spill] sm:$0xff] %v3441_v58  ;;  %5946 = vst [vmem:[#allocation18_spill] sm:$0xff] %v3450_v59  ;;  %v3455_v60 = vld [vmem:[%s5577_s4 + $0xa8] ss:$16 sps:$4 sm:$0xff]   ;;  %v3464_v61 = vld [vmem:[%s5577_s4 + $0xc4] ss:$16 sps:$4 sm:$0xff]  }
  0x18   :  { %294 = vmatpush1.bf16.msra.mxu0 %v3244_v23  ;;  %335 = vmatpush1.bf16.msra.mxu1 %v3249_v24  ;;  %5947 = vst [vmem:[#allocation19_spill] sm:$0xff] %v3455_v60  ;;  %5948 = vst [vmem:[#allocation20_spill] sm:$0xff] %v3464_v61  ;;  %v3469_v62 = vld [vmem:[%s5577_s4 + $0xcc] ss:$16 sps:$4 sm:$0xff]   ;;  %v3478_v63 = vld [vmem:[%s5577_s4 + $0xc0] ss:$16 sps:$4 sm:$0xff]  }
  0x19   :  { %295 = vmatprep.subr.bf16.mxu0 %v3256_v25  ;;  %336 = vmatprep.subr.bf16.mxu1 %v3261_v26  ;;  %5949 = vst [vmem:[#allocation21_spill] sm:$0xff] %v3469_v62  ;;  %5950 = vst [vmem:[#allocation22_spill] sm:$0xff] %v3478_v63  ;;  %v3483_v27 = vld [vmem:[%s5577_s4 + $0xc8] ss:$16 sps:$4 sm:$0xff]   ;;  %v3490_v29 = vld [vmem:[%s5577_s4 + $0xe4] ss:$16 sps:$4 sm:$0xff]  }
  0x1a   :  { %5951 = vst [vmem:[#allocation23_spill] sm:$0xff] %v3483_v27  ;;  %5952 = vst [vmem:[#allocation24_spill] sm:$0xff] %v3490_v29  ;;  %v3495_v35 = vld [vmem:[%s5577_s4 + $0xec] ss:$16 sps:$4 sm:$0xff]   ;;  %v3500_v38 = vld [vmem:[%s5577_s4 + $0xe0] ss:$16 sps:$4 sm:$0xff]  }
  0x1b   :  { %5953 = vst [vmem:[#allocation25_spill] sm:$0xff] %v3495_v35  ;;  %5954 = vst [vmem:[#allocation26_spill] sm:$0xff] %v3500_v38 }
  0x1c   :  { %296 = vmatpush1.bf16.msra.mxu0 %v3269_v28  ;;  %337 = vmatpush1.bf16.msra.mxu1 %v3279_v30 }
  0x1d   :  { %297 = vmatprep.subr.bf16.mxu0 %v3284_v31  ;;  %338 = vmatprep.subr.bf16.mxu1 %v3291_v32 }
  0x20   :  { %298 = vmatpush1.bf16.msra.mxu0 %v3296_v33  ;;  %339 = vmatpush1.bf16.msra.mxu1 %v3301_v34 }
  0x21   :  { %793 = vmatprep.subr.bf16.mxu0 %v3311_v36  ;;  %834 = vmatprep.subr.bf16.mxu1 %v3318_v37 }
  0x23   :  { %316 = vmatmul.mubr.bf16.vlgmr.msra.gmra.mrb[0].mxu0 %v5584_v1  ;;  %357 = vmatmul.mubr.bf16.vlgmr.msra.gmra.mrb[0].mxu1 %v5584_v1 }
  0x24   :  { %794 = vmatpush1.bf16.msra.mxu0 %v3326_v39  ;;  %835 = vmatpush1.bf16.msra.mxu1 %v3333_v40 }
  0x25   :  { %795 = vmatprep.subr.bf16.mxu0 %v3338_v41  ;;  %836 = vmatprep.subr.bf16.mxu1 %v3345_v42 }
  0x26   :  { %825 = vmatprep.mubr.bf16.mxu0 %v5584_v1  ;;  %866 = vmatprep.mubr.bf16.mxu1 %v5584_v1  ;;  %v3505_v1 = vld [vmem:[%s5577_s4 + $0xe8] ss:$16 sps:$4 sm:$0xff]  }
  0x27   :  { %5955 = vst [vmem:[#allocation27_spill] sm:$0xff] %v3505_v1 }
  0x28   :  { %796 = vmatpush1.bf16.msra.mxu0 %v3352_v43  ;;  %837 = vmatpush1.bf16.msra.mxu1 %v3357_v44 }
  0x29   :  { %797 = vmatprep.subr.bf16.mxu0 %v3364_v45  ;;  %838 = vmatprep.subr.bf16.mxu1 %v3371_v46 }
  0x2c   :  { %798 = vmatpush1.bf16.msra.mxu0 %v3378_v47  ;;  %839 = vmatpush1.bf16.msra.mxu1 %v3385_v48 }
  0x2d   :  { %799 = vmatprep.subr.bf16.mxu0 %v3390_v49  ;;  %840 = vmatprep.subr.bf16.mxu1 %v3397_v50 }
  0x30   :  { %800 = vmatpush1.bf16.msra.mxu0 %v3402_v51  ;;  %841 = vmatpush1.bf16.msra.mxu1 %v3407_v52 }
  0x31   :  { %801 = vmatprep.subr.bf16.mxu0 %v3412_v53  ;;  %842 = vmatprep.subr.bf16.mxu1 %v3417_v54 }
  0x34   :  { %802 = vmatpush1.bf16.msra.mxu0 %v3426_v55  ;;  %843 = vmatpush1.bf16.msra.mxu1 %v3431_v56 }
  0x35   :  { %803 = vmatprep.subr.bf16.mxu0 %v3436_v57  ;;  %844 = vmatprep.subr.bf16.mxu1 %v3441_v58 }
  0x38   :  { %804 = vmatpush1.bf16.msra.mxu0 %v3450_v59  ;;  %845 = vmatpush1.bf16.msra.mxu1 %v3455_v60 }
  0x39   :  { %805 = vmatprep.subr.bf16.mxu0 %v3464_v61  ;;  %846 = vmatprep.subr.bf16.mxu1 %v3469_v62  ;;  %v31_v61 = vld [vmem:[%s5578_s1] sm:$0xf] }
  0x3c   :  { %806 = vmatpush1.bf16.msra.mxu0 %v3478_v63  ;;  %847 = vmatpush1.bf16.msra.mxu1 %v3483_v27  ;;  %v3514_v27 = vld [vmem:[%s5577_s4 + $0x104] ss:$16 sps:$4 sm:$0xff]   ;;  %v3519_v63 = vld [vmem:[%s5577_s4 + $0x10c] ss:$16 sps:$4 sm:$0xff]  }
  0x3d   :  { %807 = vmatprep.subr.bf16.mxu0 %v3490_v29  ;;  %848 = vmatprep.subr.bf16.mxu1 %v3495_v35  ;;  %5956 = vst [vmem:[#allocation28_spill] sm:$0xff] %v3514_v27  ;;  %5957 = vst [vmem:[#allocation29_spill] sm:$0xff] %v3519_v63  ;;  %v3524_v29 = vld [vmem:[%s5577_s4 + $0x100] ss:$16 sps:$4 sm:$0xff]   ;;  %v3543_v35 = vld [vmem:[%s5577_s4 + $0x12c] ss:$16 sps:$4 sm:$0xff]  }
  0x3e   :  { %5958 = vst [vmem:[#allocation30_spill] sm:$0xff] %v3524_v29  ;;  %5961 = vst [vmem:[#allocation33_spill] sm:$0xff] %v3543_v35 }
  0x40   :  { %808 = vmatpush1.bf16.msra.mxu0 %v3500_v38  ;;  %849 = vmatpush1.bf16.msra.mxu1 %v3505_v1  ;;  %v3529_v38 = vld [vmem:[%s5577_s4 + $0x108] ss:$16 sps:$4 sm:$0xff]   ;;  %v3538_v1 = vld [vmem:[%s5577_s4 + $0x124] ss:$16 sps:$4 sm:$0xff]  }
  0x41   :  { %5959 = vst [vmem:[#allocation31_spill] sm:$0xff] %v3529_v38  ;;  %809 = vmatprep.subr.bf16.mxu0 %v3514_v27  ;;  %850 = vmatprep.subr.bf16.mxu1 %v3519_v63  ;;  %5960 = vst [vmem:[#allocation32_spill] sm:$0xff] %v3538_v1  ;;  %v3548_v27 = vld [vmem:[%s5577_s4 + $0x120] ss:$16 sps:$4 sm:$0xff]   ;;  %v3567_v63 = vld [vmem:[%s5577_s4 + $0x14c] ss:$16 sps:$4 sm:$0xff]  }
  0x42   :  { %5962 = vst [vmem:[#allocation34_spill] sm:$0xff] %v3548_v27  ;;  %5965 = vst [vmem:[#allocation37_spill] sm:$0xff] %v3567_v63 }
  0x44   :  { %810 = vmatpush1.bf16.msra.mxu0 %v3524_v29  ;;  %851 = vmatpush1.bf16.msra.mxu1 %v3529_v38  ;;  %v3553_v29 = vld [vmem:[%s5577_s4 + $0x128] ss:$16 sps:$4 sm:$0xff]   ;;  %v3562_v38 = vld [vmem:[%s5577_s4 + $0x144] ss:$16 sps:$4 sm:$0xff]  }
  0x45   :  { %5963 = vst [vmem:[#allocation35_spill] sm:$0xff] %v3553_v29  ;;  %811 = vmatprep.subr.bf16.mxu0 %v3538_v1  ;;  %852 = vmatprep.subr.bf16.mxu1 %v3543_v35  ;;  %5964 = vst [vmem:[#allocation36_spill] sm:$0xff] %v3562_v38  ;;  %v3572_v1 = vld [vmem:[%s5577_s4 + $0x140] ss:$16 sps:$4 sm:$0xff]   ;;  %v3591_v35 = vld [vmem:[%s5577_s4 + $0x16c] ss:$16 sps:$4 sm:$0xff]  }
  0x46   :  { %5966 = vst [vmem:[#allocation38_spill] sm:$0xff] %v3572_v1  ;;  %5969 = vst [vmem:[#allocation41_spill] sm:$0xff] %v3591_v35 }
  0x48   :  { %812 = vmatpush1.bf16.msra.mxu0 %v3548_v27  ;;  %853 = vmatpush1.bf16.msra.mxu1 %v3553_v29  ;;  %v3577_v27 = vld [vmem:[%s5577_s4 + $0x148] ss:$16 sps:$4 sm:$0xff]   ;;  %v3586_v29 = vld [vmem:[%s5577_s4 + $0x164] ss:$16 sps:$4 sm:$0xff]  }
  0x49   :  { %5967 = vst [vmem:[#allocation39_spill] sm:$0xff] %v3577_v27  ;;  %813 = vmatprep.subr.bf16.mxu0 %v3562_v38  ;;  %854 = vmatprep.subr.bf16.mxu1 %v3567_v63  ;;  %5968 = vst [vmem:[#allocation40_spill] sm:$0xff] %v3586_v29  ;;  %v3596_v38 = vld [vmem:[%s5577_s4 + $0x160] ss:$16 sps:$4 sm:$0xff]   ;;  %v3615_v63 = vld [vmem:[%s5577_s4 + $0x18c] ss:$16 sps:$4 sm:$0xff]  }
  0x4a   :  { %5970 = vst [vmem:[#allocation42_spill] sm:$0xff] %v3596_v38  ;;  %5973 = vst [vmem:[#allocation45_spill] sm:$0xff] %v3615_v63 }
  0x4c   :  { %814 = vmatpush1.bf16.msra.mxu0 %v3572_v1  ;;  %855 = vmatpush1.bf16.msra.mxu1 %v3577_v27  ;;  %v3601_v1 = vld [vmem:[%s5577_s4 + $0x168] ss:$16 sps:$4 sm:$0xff]   ;;  %v3610_v27 = vld [vmem:[%s5577_s4 + $0x184] ss:$16 sps:$4 sm:$0xff]  }
  0x4d   :  { %5971 = vst [vmem:[#allocation43_spill] sm:$0xff] %v3601_v1  ;;  %815 = vmatprep.subr.bf16.mxu0 %v3586_v29  ;;  %856 = vmatprep.subr.bf16.mxu1 %v3591_v35  ;;  %5972 = vst [vmem:[#allocation44_spill] sm:$0xff] %v3610_v27  ;;  %v3620_v29 = vld [vmem:[%s5577_s4 + $0x180] ss:$16 sps:$4 sm:$0xff]   ;;  %v3639_v35 = vld [vmem:[%s5577_s4 + $0x1ac] ss:$16 sps:$4 sm:$0xff]  }
  0x4e   :  { %5974 = vst [vmem:[#allocation46_spill] sm:$0xff] %v3620_v29  ;;  %5977 = vst [vmem:[#allocation49_spill] sm:$0xff] %v3639_v35 }
  0x50   :  { %816 = vmatpush1.bf16.msra.mxu0 %v3596_v38  ;;  %857 = vmatpush1.bf16.msra.mxu1 %v3601_v1  ;;  %v3625_v38 = vld [vmem:[%s5577_s4 + $0x188] ss:$16 sps:$4 sm:$0xff]   ;;  %v3634_v1 = vld [vmem:[%s5577_s4 + $0x1a4] ss:$16 sps:$4 sm:$0xff]  }
  0x51   :  { %5975 = vst [vmem:[#allocation47_spill] sm:$0xff] %v3625_v38  ;;  %817 = vmatprep.subr.bf16.mxu0 %v3610_v27  ;;  %858 = vmatprep.subr.bf16.mxu1 %v3615_v63  ;;  %5976 = vst [vmem:[#allocation48_spill] sm:$0xff] %v3634_v1  ;;  %v3644_v27 = vld [vmem:[%s5577_s4 + $0x1a0] ss:$16 sps:$4 sm:$0xff]   ;;  %v3663_v63 = vld [vmem:[%s5577_s4 + $0x1cc] ss:$16 sps:$4 sm:$0xff]  }
  0x52   :  { %5978 = vst [vmem:[#allocation50_spill] sm:$0xff] %v3644_v27  ;;  %5981 = vst [vmem:[#allocation53_spill] sm:$0xff] %v3663_v63 }
  0x54   :  { %818 = vmatpush1.bf16.msra.mxu0 %v3620_v29  ;;  %859 = vmatpush1.bf16.msra.mxu1 %v3625_v38  ;;  %v3649_v29 = vld [vmem:[%s5577_s4 + $0x1a8] ss:$16 sps:$4 sm:$0xff]   ;;  %v3658_v38 = vld [vmem:[%s5577_s4 + $0x1c4] ss:$16 sps:$4 sm:$0xff]  }
  0x55   :  { %5979 = vst [vmem:[#allocation51_spill] sm:$0xff] %v3649_v29  ;;  %819 = vmatprep.subr.bf16.mxu0 %v3634_v1  ;;  %860 = vmatprep.subr.bf16.mxu1 %v3639_v35  ;;  %5980 = vst [vmem:[#allocation52_spill] sm:$0xff] %v3658_v38  ;;  %v3668_v1 = vld [vmem:[%s5577_s4 + $0x1c0] ss:$16 sps:$4 sm:$0xff]   ;;  %v3687_v35 = vld [vmem:[%s5577_s4 + $0x1ec] ss:$16 sps:$4 sm:$0xff]  }
  0x56   :  { %5982 = vst [vmem:[#allocation54_spill] sm:$0xff] %v3668_v1  ;;  %5985 = vst [vmem:[#allocation57_spill] sm:$0xff] %v3687_v35 }
  0x58   :  { %820 = vmatpush1.bf16.msra.mxu0 %v3644_v27  ;;  %861 = vmatpush1.bf16.msra.mxu1 %v3649_v29  ;;  %v3673_v27 = vld [vmem:[%s5577_s4 + $0x1c8] ss:$16 sps:$4 sm:$0xff]   ;;  %v3682_v29 = vld [vmem:[%s5577_s4 + $0x1e4] ss:$16 sps:$4 sm:$0xff]  }
  0x59   :  { %5983 = vst [vmem:[#allocation55_spill] sm:$0xff] %v3673_v27  ;;  %821 = vmatprep.subr.bf16.mxu0 %v3658_v38  ;;  %862 = vmatprep.subr.bf16.mxu1 %v3663_v63  ;;  %5984 = vst [vmem:[#allocation56_spill] sm:$0xff] %v3682_v29  ;;  %v3692_v38 = vld [vmem:[%s5577_s4 + $0x1e0] ss:$16 sps:$4 sm:$0xff]  }
  0x5a   :  { %5986 = vst [vmem:[#allocation58_spill] sm:$0xff] %v3692_v38 }
  0x5c   :  { %822 = vmatpush1.bf16.msra.mxu0 %v3668_v1  ;;  %863 = vmatpush1.bf16.msra.mxu1 %v3673_v27  ;;  %v3697_v1 = vld [vmem:[%s5577_s4 + $0x1e8] ss:$16 sps:$4 sm:$0xff]   ;;  %v42_v27 = vlaneseq }
  0x5d   :  { %5987 = vst [vmem:[#allocation59_spill] sm:$0xff] %v3697_v1  ;;  %823 = vmatprep.subr.bf16.mxu0 %v3682_v29  ;;  %864 = vmatprep.subr.bf16.mxu1 %v3687_v35 }
  0x5e   :  { %v43_v63 = vshrl.u32 %v42_v27, 7 }
  0x60   :  { %824 = vmatpush1.bf16.msra.mxu0 %v3692_v38  ;;  %865 = vmatpush1.bf16.msra.mxu1 %v3697_v1  ;;  %v3705_v62 = vsub.s32 0, %v43_v63  ;;  %v3710_v60 = vsub.s32 1, %v43_v63  ;;  %v3715_v38 = vsub.s32 2, %v43_v63  ;;  %v3730_v58 = vsub.s32 3, %v43_v63 }
  0x61   :  { %908 = vmatprep.subr.bf16.mxu0 %v3110_v0  ;;  %949 = vmatprep.subr.bf16.mxu1 %v3117_v2  ;;  %v32_v0 = vld [vmem:[%s5579_s3] sm:$0xf] }
  0x62   :  { %5988 = vst [vmem:[#allocation60_spill] sm:$0xff] %v3705_v62  ;;  %5989 = vst [vmem:[#allocation61_spill] sm:$0xff] %v3710_v60  ;;  %v3713_v35 = vrot.slane %v31_v61, %v3705_v62  ;;  %v3721_v2 = vrot.slane %v31_v61, %v3710_v60  ;;  %v3725_v29 = vrot.slane %v32_v0, %v3705_v62 }
  0x63   :  { %5991 = vst [vmem:[#allocation63_spill] sm:$0xff] %v3715_v38  ;;  %v3728_v59 = vrot.slane %v31_v61, %v3715_v38  ;;  %v3734_v56 = vrot.slane %v32_v0, %v3710_v60  ;;  %v3739_v53 = vrot.slane %v32_v0, %v3715_v38 }
  0x64   :  { %5990 = vst [vmem:[#allocation62_spill] sm:$0xff] %v3713_v35  ;;  %5992 = vst [vmem:[#allocation64_spill] sm:$0xff] %v3721_v2 }
  0x65   :  { %5993 = vst [vmem:[#allocation65_spill] sm:$0xff] %v3725_v29  ;;  %5994 = vst [vmem:[#allocation66_spill] sm:$0xff] %v3728_v59 }
  0x66   :  { %5995 = vst [vmem:[#allocation67_spill] sm:$0xff] %v3739_v53 }
  0x8a   :  { %v39_v27 = vpop.permute.xlu0 %38 }
  0x8b   :  { %v62_v1 = vmul.f32 %v3713_v35, %v39_v27  ;;  %v63_v57 = vmul.f32 %v3721_v2, %v39_v27  ;;  %v64_v54 = vmul.f32 %v3728_v59, %v39_v27  ;;  %v3742_v35 = vrot.slane %v31_v61, %v3730_v58 }
  0x8d   :  { %v87_v55 = vadd.f32 %v3725_v29, %v62_v1  ;;  %5996 = vst [vmem:[#allocation68_spill] sm:$0xff] %v3742_v35  ;;  %v88_v62 = vadd.f32 %v3734_v56, %v63_v57  ;;  %v89_v2 = vadd.f32 %v3739_v53, %v64_v54  ;;  %v65_v60 = vmul.f32 %v3742_v35, %v39_v27 }
  0x8e   :  { %v3748_v1 = vrot.slane %v32_v0, %v3730_v58 }
  0xf6   :  { %v317_v52 = vpop.f32.mrb[0].mxu0  ;;  %v358_v63 = vpop.f32.mrb[0].mxu1 }
  0xf7   :  { %v365_v51 = vadd.f32 %v317_v52, %v87_v55  ;;  %v319_v50 = vpop.f32.mrb[1].mxu0  ;;  %v360_v59 = vpop.f32.mrb[1].mxu1  ;;  %v367_v57 = vadd.f32 %v358_v63, %v89_v2  ;;  %v90_v52 = vadd.f32 %v3748_v1, %v65_v60  ;;  %v6023_v63 = vld [vmem:[#allocation30_spill] sm:$0xff] }
  0xf8   :  { %v366_v29 = vadd.f32 %v319_v50, %v88_v62  ;;  %v321_v38 = vpop.f32.mrb[2].mxu0  ;;  %v362_v49 = vpop.f32.mrb[2].mxu1 }
  0xf9   :  { %v369_v48 = vmul.f32 0.5, %v365_v51  ;;  %v322_v61 = vpop.f32.mrb[3].mxu0  ;;  %v363_v47 = vpop.f32.mrb[3].mxu1  ;;  %v368_v54 = vadd.f32 %v360_v59, %v90_v52  ;;  %v6026_v52 = vld [vmem:[#allocation33_spill] sm:$0xff] }
  0xfa   :  { %v373_v46 = vmul.f32 0.5, %v366_v29  ;;  %v6024_v61 = vld [vmem:[#allocation31_spill] sm:$0xff] }
  0xfb   :  { %2709 = vtanh.f32 %v369_v48  ;;  %v378_v55 = vmul.f32 0.5, %v368_v54  ;;  %v6027_v54 = vld [vmem:[#allocation34_spill] sm:$0xff] }
  0xfc   :  { %2711 = vtanh.f32 %v373_v46 }
  0xfd   :  { %2713 = vtanh.f32 %v367_v57  ;;  %v6025_v57 = vld [vmem:[#allocation32_spill] sm:$0xff] }
  0xfe   :  { %2715 = vtanh.f32 %v378_v55  ;;  %v6028_v55 = vld [vmem:[#allocation35_spill] sm:$0xff] }
 0x105   :  { %v2710_v27 = vpop.eup %2709 }
 0x106   :  { %v2712_v35 = vpop.eup %2711  ;;  %v371_v0 = vadd.f32 1.0, %v2710_v27  ;;  %v6029_v27 = vld [vmem:[#allocation36_spill] sm:$0xff] }
 0x107   :  { %v375_v53 = vadd.f32 1.0, %v2712_v35  ;;  %v2714_v62 = vpop.eup %2713  ;;  %v6022_v35 = vld [vmem:[#allocation29_spill] sm:$0xff] }
 0x108   :  { %v372_v50 = vmul.f32 0.5, %v371_v0  ;;  %v2716_v2 = vpop.eup %2715  ;;  %v6030_v0 = vld [vmem:[#allocation37_spill] sm:$0xff] }
 0x109   :  { %v376_v49 = vmul.f32 0.5, %v375_v53  ;;  %v380_v48 = vadd.f32 1.0, %v2716_v2  ;;  %v5997_v53 = vmov 0   ;;  %v6036_v2 = vld [vmem:[#allocation43_spill] sm:$0xff] }
 0x10a   :  { %v383_v51 = vmul.f32 %v2714_v62, %v372_v50  ;;  %v6031_v50 = vld [vmem:[#allocation38_spill] sm:$0xff]  ;;  %v6032_v62 = vld [vmem:[#allocation39_spill] sm:$0xff] }
 0x10b   :  { %v382_v38 = vmul.f32 0.0, %v376_v49  ;;  %v381_v46 = vmul.f32 0.5, %v380_v48  ;;  %v6033_v49 = vld [vmem:[#allocation40_spill] sm:$0xff] }
 0x10c   :  { %v6037_v48 = vld [vmem:[#allocation44_spill] sm:$0xff] }
 0x10d   :  { %v3751_v47 = vadd.f32 %v383_v51, %v382_v38  ;;  %v6034_v51 = vld [vmem:[#allocation41_spill] sm:$0xff]  ;;  %v6035_v38 = vld [vmem:[#allocation42_spill] sm:$0xff] }
 0x10f   :  { %2717 = vtanh.f32 %v3751_v47 }
 0x119   :  { %v2718_v60 = vpop.eup %2717 }
 0x11a   :  { %v386_v59 = vmul.f32 %v2718_v60, %v381_v46  ;;  %v6038_v46 = vld [vmem:[#allocation45_spill] sm:$0xff]  ;;  %v6039_v60 = vld [vmem:[#allocation46_spill] sm:$0xff] }
 0x11c   :  { %v387_v29 = vpack.c.bf16 %v386_v59, %v386_v59  ;;  %v6040_v59 = vld [vmem:[#allocation47_spill] sm:$0xff] }
 0x11e   :  { %826 = vmatmul.mubr.bf16.vlgmr.msra.gmra.mrb[4].mxu0 %v387_v29  ;;  %867 = vmatmul.mubr.bf16.vlgmr.msra.gmra.mrb[4].mxu1 %v387_v29 }
 0x11f   :  { %909 = vmatpush1.bf16.msra.mxu0 %v3125_v3  ;;  %950 = vmatpush1.bf16.msra.mxu1 %v3130_v4  ;;  %v5998_v3 = vld [vmem:[#allocation5_spill] sm:$0xff]  ;;  %v5999_v4 = vld [vmem:[#allocation6_spill] sm:$0xff] }
 0x120   :  { %910 = vmatprep.subr.bf16.mxu0 %v3136_v5  ;;  %951 = vmatprep.subr.bf16.mxu1 %v3143_v6  ;;  %v6000_v5 = vld [vmem:[#allocation7_spill] sm:$0xff]  ;;  %v6001_v6 = vld [vmem:[#allocation8_spill] sm:$0xff] }
 0x121   :  { %940 = vmatprep.mubr.bf16.mxu0 %v5997_v53  ;;  %981 = vmatprep.mubr.bf16.mxu1 %v5997_v53 }
 0x123   :  { %911 = vmatpush1.bf16.msra.mxu0 %v3148_v7  ;;  %952 = vmatpush1.bf16.msra.mxu1 %v3154_v8  ;;  %v6002_v7 = vld [vmem:[#allocation9_spill] sm:$0xff]  ;;  %v6003_v8 = vld [vmem:[#allocation10_spill] sm:$0xff] }
 0x124   :  { %912 = vmatprep.subr.bf16.mxu0 %v3160_v9  ;;  %953 = vmatprep.subr.bf16.mxu1 %v3165_v10  ;;  %v6004_v9 = vld [vmem:[#allocation11_spill] sm:$0xff]  ;;  %v6005_v10 = vld [vmem:[#allocation12_spill] sm:$0xff] }
 0x127   :  { %913 = vmatpush1.bf16.msra.mxu0 %v3170_v11  ;;  %954 = vmatpush1.bf16.msra.mxu1 %v3175_v12  ;;  %v6006_v11 = vld [vmem:[#allocation13_spill] sm:$0xff]  ;;  %v6007_v12 = vld [vmem:[#allocation14_spill] sm:$0xff] }
 0x128   :  { %914 = vmatprep.subr.bf16.mxu0 %v3182_v13  ;;  %955 = vmatprep.subr.bf16.mxu1 %v3189_v14  ;;  %v6008_v13 = vld [vmem:[#allocation15_spill] sm:$0xff]  ;;  %v6009_v14 = vld [vmem:[#allocation16_spill] sm:$0xff] }
 0x12b   :  { %915 = vmatpush1.bf16.msra.mxu0 %v3194_v15  ;;  %956 = vmatpush1.bf16.msra.mxu1 %v3201_v16  ;;  %v6010_v15 = vld [vmem:[#allocation17_spill] sm:$0xff]  ;;  %v6011_v16 = vld [vmem:[#allocation18_spill] sm:$0xff] }
 0x12c   :  { %916 = vmatprep.subr.bf16.mxu0 %v3206_v17  ;;  %957 = vmatprep.subr.bf16.mxu1 %v3213_v18  ;;  %v6012_v17 = vld [vmem:[#allocation19_spill] sm:$0xff]  ;;  %v6013_v18 = vld [vmem:[#allocation20_spill] sm:$0xff] }
 0x12f   :  { %917 = vmatpush1.bf16.msra.mxu0 %v3218_v19  ;;  %958 = vmatpush1.bf16.msra.mxu1 %v3223_v20  ;;  %v6014_v19 = vld [vmem:[#allocation21_spill] sm:$0xff]  ;;  %v6015_v20 = vld [vmem:[#allocation22_spill] sm:$0xff] }
 0x130   :  { %918 = vmatprep.subr.bf16.mxu0 %v3230_v21  ;;  %959 = vmatprep.subr.bf16.mxu1 %v3237_v22  ;;  %v6016_v21 = vld [vmem:[#allocation23_spill] sm:$0xff]  ;;  %v6017_v22 = vld [vmem:[#allocation24_spill] sm:$0xff] }
 0x133   :  { %919 = vmatpush1.bf16.msra.mxu0 %v3244_v23  ;;  %960 = vmatpush1.bf16.msra.mxu1 %v3249_v24  ;;  %v6018_v23 = vld [vmem:[#allocation25_spill] sm:$0xff]  ;;  %v6019_v24 = vld [vmem:[#allocation26_spill] sm:$0xff] }
 0x134   :  { %920 = vmatprep.subr.bf16.mxu0 %v3256_v25  ;;  %961 = vmatprep.subr.bf16.mxu1 %v3261_v26  ;;  %v6020_v25 = vld [vmem:[#allocation27_spill] sm:$0xff]  ;;  %v6021_v26 = vld [vmem:[#allocation28_spill] sm:$0xff] }
 0x137   :  { %921 = vmatpush1.bf16.msra.mxu0 %v3269_v28  ;;  %962 = vmatpush1.bf16.msra.mxu1 %v3279_v30 }
 0x138   :  { %922 = vmatprep.subr.bf16.mxu0 %v3284_v31  ;;  %963 = vmatprep.subr.bf16.mxu1 %v3291_v32 }
 0x13b   :  { %923 = vmatpush1.bf16.msra.mxu0 %v3296_v33  ;;  %964 = vmatpush1.bf16.msra.mxu1 %v3301_v34 }
 0x13c   :  { %1014 = vmatprep.subr.bf16.mxu0 %v3311_v36  ;;  %1055 = vmatprep.subr.bf16.mxu1 %v3318_v37 }
 0x13e   :  { %941 = vmatmul.mubr.bf16.vlgmr.msra.gmra.mrb[8].mxu0 %v387_v29  ;;  %982 = vmatmul.mubr.bf16.vlgmr.msra.gmra.mrb[8].mxu1 %v387_v29  ;;  %v6041_v29 = vld [vmem:[#allocation48_spill] sm:$0xff] }
 0x13f   :  { %1015 = vmatpush1.bf16.msra.mxu0 %v3326_v39  ;;  %1056 = vmatpush1.bf16.msra.mxu1 %v3333_v40 }
 0x140   :  { %1016 = vmatprep.subr.bf16.mxu0 %v3338_v41  ;;  %1057 = vmatprep.subr.bf16.mxu1 %v3345_v42 }
 0x143   :  { %1017 = vmatpush1.bf16.msra.mxu0 %v3352_v43  ;;  %1058 = vmatpush1.bf16.msra.mxu1 %v3357_v44 }
 0x144   :  { %1018 = vmatprep.subr.bf16.mxu0 %v3364_v45  ;;  %1059 = vmatprep.subr.bf16.mxu1 %v5998_v3 }
 0x147   :  { %1019 = vmatpush1.bf16.msra.mxu0 %v5999_v4  ;;  %1060 = vmatpush1.bf16.msra.mxu1 %v6000_v5 }
 0x148   :  { %1020 = vmatprep.subr.bf16.mxu0 %v6001_v6  ;;  %1061 = vmatprep.subr.bf16.mxu1 %v6002_v7 }
 0x14b   :  { %1021 = vmatpush1.bf16.msra.mxu0 %v6003_v8  ;;  %1062 = vmatpush1.bf16.msra.mxu1 %v6004_v9 }
 0x14c   :  { %1022 = vmatprep.subr.bf16.mxu0 %v6005_v10  ;;  %1063 = vmatprep.subr.bf16.mxu1 %v6006_v11 }
 0x14f   :  { %1023 = vmatpush1.bf16.msra.mxu0 %v6007_v12  ;;  %1064 = vmatpush1.bf16.msra.mxu1 %v6008_v13 }
 0x150   :  { %1024 = vmatprep.subr.bf16.mxu0 %v6009_v14  ;;  %1065 = vmatprep.subr.bf16.mxu1 %v6010_v15 }
 0x153   :  { %1025 = vmatpush1.bf16.msra.mxu0 %v6011_v16  ;;  %1066 = vmatpush1.bf16.msra.mxu1 %v6012_v17 }
 0x154   :  { %1026 = vmatprep.subr.bf16.mxu0 %v6013_v18  ;;  %1067 = vmatprep.subr.bf16.mxu1 %v6014_v19 }
 0x157   :  { %1027 = vmatpush1.bf16.msra.mxu0 %v6015_v20  ;;  %1068 = vmatpush1.bf16.msra.mxu1 %v6016_v21 }
 0x158   :  { %1028 = vmatprep.subr.bf16.mxu0 %v6017_v22  ;;  %1069 = vmatprep.subr.bf16.mxu1 %v6018_v23 }
 0x15b   :  { %1029 = vmatpush1.bf16.msra.mxu0 %v6019_v24  ;;  %1070 = vmatpush1.bf16.msra.mxu1 %v6020_v25  ;;  %v6067_v25 = vld [vmem:[#allocation67_spill] sm:$0xff] }
 0x15c   :  { %1030 = vmatprep.subr.bf16.mxu0 %v6021_v26  ;;  %1071 = vmatprep.subr.bf16.mxu1 %v6022_v35 }
 0x15f   :  { %1031 = vmatpush1.bf16.msra.mxu0 %v6023_v63  ;;  %1072 = vmatpush1.bf16.msra.mxu1 %v6024_v61 }
 0x160   :  { %1032 = vmatprep.subr.bf16.mxu0 %v6025_v57  ;;  %1073 = vmatprep.subr.bf16.mxu1 %v6026_v52 }
 0x163   :  { %1033 = vmatpush1.bf16.msra.mxu0 %v6027_v54  ;;  %1074 = vmatpush1.bf16.msra.mxu1 %v6028_v55 }
 0x164   :  { %1034 = vmatprep.subr.bf16.mxu0 %v6029_v27  ;;  %1075 = vmatprep.subr.bf16.mxu1 %v6030_v0 }
 0x167   :  { %1035 = vmatpush1.bf16.msra.mxu0 %v6031_v50  ;;  %1076 = vmatpush1.bf16.msra.mxu1 %v6032_v62  ;;  %v6042_v50 = vld [vmem:[#allocation49_spill] sm:$0xff]  ;;  %v6043_v62 = vld [vmem:[#allocation50_spill] sm:$0xff] }
 0x168   :  { %1036 = vmatprep.subr.bf16.mxu0 %v6033_v49  ;;  %1077 = vmatprep.subr.bf16.mxu1 %v6034_v51  ;;  %v6044_v49 = vld [vmem:[#allocation51_spill] sm:$0xff]  ;;  %v6045_v51 = vld [vmem:[#allocation52_spill] sm:$0xff] }
 0x16b   :  { %1037 = vmatpush1.bf16.msra.mxu0 %v6035_v38  ;;  %1078 = vmatpush1.bf16.msra.mxu1 %v6036_v2  ;;  %v6046_v38 = vld [vmem:[#allocation53_spill] sm:$0xff]  ;;  %v6047_v2 = vld [vmem:[#allocation54_spill] sm:$0xff] }
 0x16c   :  { %1038 = vmatprep.subr.bf16.mxu0 %v6037_v48  ;;  %1079 = vmatprep.subr.bf16.mxu1 %v6038_v46  ;;  %v6048_v48 = vld [vmem:[#allocation55_spill] sm:$0xff]  ;;  %v6049_v46 = vld [vmem:[#allocation56_spill] sm:$0xff] }
 0x16f   :  { %1039 = vmatpush1.bf16.msra.mxu0 %v6039_v60  ;;  %1080 = vmatpush1.bf16.msra.mxu1 %v6040_v59  ;;  %v6050_v60 = vld [vmem:[#allocation57_spill] sm:$0xff]  ;;  %v6051_v59 = vld [vmem:[#allocation58_spill] sm:$0xff] }
 0x170   :  { %1040 = vmatprep.subr.bf16.mxu0 %v6041_v29  ;;  %1081 = vmatprep.subr.bf16.mxu1 %v6042_v50  ;;  %v6052_v29 = vld [vmem:[#allocation59_spill] sm:$0xff] }
 0x171   :  { %v6053_v50 = vld [vmem:[#allocation3_spill] sm:$0xff] }
 0x173   :  { %1041 = vmatpush1.bf16.msra.mxu0 %v6043_v62  ;;  %1082 = vmatpush1.bf16.msra.mxu1 %v6044_v49  ;;  %v6054_v62 = vld [vmem:[#allocation4_spill] sm:$0xff] }
 0x174   :  { %1042 = vmatprep.subr.bf16.mxu0 %v6045_v51  ;;  %1083 = vmatprep.subr.bf16.mxu1 %v6046_v38  ;;  %v2555_v38 = vld [vmem:[%s5576_s0 + $0x10] sm:$0xff] }
 0x175   :  { %1118 = vperm.xlu1 %2564, %v2555_v38   ;;  %v6055_v38 = vld [vmem:[#allocation60_spill] sm:$0xff] }
 0x177   :  { %1043 = vmatpush1.bf16.msra.mxu0 %v6047_v2  ;;  %1084 = vmatpush1.bf16.msra.mxu1 %v6048_v48  ;;  %v2556_v48 = vld [vmem:[%s5576_s0 + $0x18] sm:$0xff] }
 0x178   :  { %1044 = vmatprep.subr.bf16.mxu0 %v6049_v46  ;;  %1085 = vmatprep.subr.bf16.mxu1 %v6050_v60  ;;  %v6057_v60 = vld [vmem:[#allocation61_spill] sm:$0xff] }
 0x179   :  { %1339 = vperm.xlu1 %2564, %v2556_v48  }
 0x17b   :  { %1045 = vmatpush1.bf16.msra.mxu0 %v6051_v59  ;;  %1086 = vmatpush1.bf16.msra.mxu1 %v6052_v29  ;;  %v2558_v59 = vld [vmem:[%s5576_s0 + $0x28] sm:$0xff] }
 0x17c   :  { %1129 = vmatprep.subr.bf16.mxu0 %v6053_v50  ;;  %1170 = vmatprep.subr.bf16.mxu1 %v6054_v62  ;;  %v2560_v50 = vld [vmem:[%s5576_s0 + $0x38] sm:$0xff]  ;;  %v33_v62 = vld [vmem:[%s5580_s5] sm:$0xf] }
 0x17d   :  { %1781 = vperm.xlu1 %2564, %v2558_v59   ;;  %v3868_v29 = vrot.slane %v33_v62, %v6055_v38  ;;  %v3871_v46 = vrot.slane %v33_v62, %v6057_v60  ;;  %v6059_v59 = vld [vmem:[#allocation63_spill] sm:$0xff]  ;;  %v3880_v63 = vrot.slane %v33_v62, %v3730_v58  ;;  %v898_v58 = vpop.permute.xlu0 %897 }
 0x17e   :  { %v3875_v49 = vrot.slane %v33_v62, %v6059_v59 }
 0x17f   :  { %6056 = vst [vmem:[#allocation5_spill] sm:$0xff] %v3868_v29  ;;  %6058 = vst [vmem:[#allocation6_spill] sm:$0xff] %v3871_v46 }
 0x180   :  { %6060 = vst [vmem:[#allocation7_spill] sm:$0xff] %v3875_v49  ;;  %6061 = vst [vmem:[#allocation8_spill] sm:$0xff] %v3880_v63 }
 0x181   :  { %2223 = vperm.xlu1 %2564, %v2560_v50  }
 0x1f1   :  { %v827_v48 = vpop.f32.mrb[4].mxu0  ;;  %v868_v2 = vpop.f32.mrb[4].mxu1 }
 0x1f2   :  { %v828_v51 = vadd.f32 %v827_v48, %v3868_v29  ;;  %v829_v0 = vpop.f32.mrb[5].mxu0  ;;  %v870_v27 = vpop.f32.mrb[5].mxu1  ;;  %v869_v60 = vadd.f32 %v868_v2, %v3875_v49  ;;  %v6063_v2 = vld [vmem:[#allocation62_spill] sm:$0xff] }
 0x1f3   :  { %v830_v50 = vadd.f32 %v829_v0, %v3871_v46  ;;  %v831_v55 = vpop.f32.mrb[6].mxu0  ;;  %v872_v54 = vpop.f32.mrb[6].mxu1  ;;  %v871_v48 = vadd.f32 %v870_v27, %v3880_v63  ;;  %v900_v62 = vmul.f32 %v898_v58, %v6063_v2  ;;  %v6064_v27 = vld [vmem:[#allocation64_spill] sm:$0xff]  ;;  %v6065_v63 = vld [vmem:[#allocation65_spill] sm:$0xff] }
 0x1f4   :  { %v875_v52 = vmul.f32 0.5, %v828_v51  ;;  %v832_v57 = vpop.f32.mrb[7].mxu0  ;;  %v873_v38 = vpop.f32.mrb[7].mxu1 }
 0x1f5   :  { %v879_v61 = vmul.f32 0.5, %v830_v50  ;;  %v884_v59 = vmul.f32 0.5, %v871_v48 }
 0x1f6   :  { %2719 = vtanh.f32 %v875_v52 }
 0x1f7   :  { %2721 = vtanh.f32 %v879_v61 }
 0x1f8   :  { %2723 = vtanh.f32 %v869_v60  ;;  %v901_v60 = vmul.f32 %v898_v58, %v6064_v27 }
 0x1f9   :  { %2725 = vtanh.f32 %v884_v59 }
 0x200   :  { %v2720_v29 = vpop.eup %2719 }
 0x201   :  { %v2722_v35 = vpop.eup %2721  ;;  %v877_v0 = vadd.f32 1.0, %v2720_v29  ;;  %v904_v29 = vadd.f32 %v900_v62, %v6065_v63 }
 0x202   :  { %v881_v55 = vadd.f32 1.0, %v2722_v35  ;;  %v2724_v57 = vpop.eup %2723  ;;  %v6066_v35 = vld [vmem:[#allocation66_spill] sm:$0xff] }
 0x203   :  { %v878_v54 = vmul.f32 0.5, %v877_v0  ;;  %v2726_v61 = vpop.eup %2725  ;;  %v902_v59 = vmul.f32 %v898_v58, %v6066_v35 }
 0x204   :  { %v882_v51 = vmul.f32 0.5, %v881_v55  ;;  %v886_v48 = vadd.f32 1.0, %v2726_v61  ;;  %v905_v55 = vadd.f32 %v901_v60, %v3734_v56  ;;  %v6068_v61 = vld [vmem:[#allocation68_spill] sm:$0xff] }
 0x205   :  { %v889_v50 = vmul.f32 %v2724_v57, %v878_v54  ;;  %v906_v27 = vadd.f32 %v902_v59, %v6067_v25  ;;  %v903_v24 = vmul.f32 %v898_v58, %v6068_v61 }
 0x206   :  { %v888_v52 = vmul.f32 0.0, %v882_v51 }
 0x208   :  { %v3883_v38 = vadd.f32 %v889_v50, %v888_v52  ;;  %v887_v50 = vmul.f32 0.5, %v886_v48 }
 0x20a   :  { %6062 = vst [vmem:[#allocation9_spill] sm:$0xff] %v3883_v38  ;;  %2727 = vtanh.f32 %v3883_v38 }
 0x211   :  { %v942_v0 = vpop.f32.mrb[8].mxu0  ;;  %v983_v49 = vpop.f32.mrb[8].mxu1 }
 0x212   :  { %v990_v54 = vadd.f32 %v942_v0, %v904_v29  ;;  %v944_v57 = vpop.f32.mrb[9].mxu0  ;;  %v985_v51 = vpop.f32.mrb[9].mxu1  ;;  %v992_v22 = vadd.f32 %v983_v49, %v906_v27  ;;  %v907_v29 = vadd.f32 %v903_v24, %v3748_v1 }
 0x213   :  { %v991_v52 = vadd.f32 %v944_v57, %v905_v55  ;;  %v946_v38 = vpop.f32.mrb[10].mxu0  ;;  %v987_v46 = vpop.f32.mrb[10].mxu1 }
 0x214   :  { %v2728_v26 = vpop.eup %2727  ;;  %v994_v2 = vmul.f32 0.5, %v990_v54  ;;  %v947_v62 = vpop.f32.mrb[11].mxu0  ;;  %v993_v46 = vadd.f32 %v985_v51, %v907_v29  ;;  %v3901_v51 = vld [vmem:[%s5575_s2] ss:$16 sps:$4 sm:$0xff]   ;;  %v3939_v29 = vld [vmem:[%s5575_s2 + $0x44] ss:$16 sps:$4 sm:$0xff]  }
 0x215   :  { %v988_v63 = vpop.f32.mrb[11].mxu1  ;;  %v998_v35 = vmul.f32 0.5, %v991_v52  ;;  %v892_v23 = vmul.f32 %v2728_v26, %v887_v50  ;;  %v3913_v50 = vld [vmem:[%s5575_s2 + $0x24] ss:$16 sps:$4 sm:$0xff]   ;;  %v3919_v52 = vld [vmem:[%s5575_s2 + $0x2c] ss:$16 sps:$4 sm:$0xff]  }
 0x216   :  { %2729 = vtanh.f32 %v994_v2  ;;  %v1003_v38 = vmul.f32 0.5, %v993_v46  ;;  %v3927_v62 = vld [vmem:[%s5575_s2 + $0x20] ss:$16 sps:$4 sm:$0xff]   ;;  %v3945_v46 = vld [vmem:[%s5575_s2 + $0x4c] ss:$16 sps:$4 sm:$0xff]  }
 0x217   :  { %2731 = vtanh.f32 %v998_v35  ;;  %v1013_v60 = vpack.c.bf16 %v892_v23, %v892_v23 }
 0x218   :  { %2733 = vtanh.f32 %v992_v22 }
 0x219   :  { %1046 = vmatprep.mubr.bf16.mxu0 %v1013_v60  ;;  %1087 = vmatprep.mubr.bf16.mxu1 %v1013_v60  ;;  %2735 = vtanh.f32 %v1003_v38  ;;  %v3933_v60 = vld [vmem:[%s5575_s2 + $0x28] ss:$16 sps:$4 sm:$0xff]   ;;  %v3951_v38 = vld [vmem:[%s5575_s2 + $0x40] ss:$16 sps:$4 sm:$0xff]  }
 0x220   :  { %v2730_v48 = vpop.eup %2729 }
 0x221   :  { %v2732_v0 = vpop.eup %2731  ;;  %v996_v59 = vadd.f32 1.0, %v2730_v48  ;;  %v3957_v48 = vld [vmem:[%s5575_s2 + $0x48] ss:$16 sps:$4 sm:$0xff]  }
 0x222   :  { %v1000_v55 = vadd.f32 1.0, %v2732_v0  ;;  %v2734_v63 = vpop.eup %2733  ;;  %v3963_v0 = vld [vmem:[%s5575_s2 + $0x64] ss:$16 sps:$4 sm:$0xff]  }
 0x223   :  { %v997_v58 = vmul.f32 0.5, %v996_v59  ;;  %v2736_v23 = vpop.eup %2735  ;;  %v3969_v59 = vld [vmem:[%s5575_s2 + $0x6c] ss:$16 sps:$4 sm:$0xff]  }
 0x224   :  { %v1001_v54 = vmul.f32 0.5, %v1000_v55  ;;  %v1005_v24 = vadd.f32 1.0, %v2736_v23  ;;  %v3975_v55 = vld [vmem:[%s5575_s2 + $0x60] ss:$16 sps:$4 sm:$0xff]   ;;  %v4011_v23 = vld [vmem:[%s5575_s2 + $0xa4] ss:$16 sps:$4 sm:$0xff]  }
 0x225   :  { %v1008_v26 = vmul.f32 %v2734_v63, %v997_v58  ;;  %v3981_v58 = vld [vmem:[%s5575_s2 + $0x68] ss:$16 sps:$4 sm:$0xff]   ;;  %v3987_v63 = vld [vmem:[%s5575_s2 + $0x84] ss:$16 sps:$4 sm:$0xff]  }
 0x226   :  { %v1007_v49 = vmul.f32 %v1001_v54, %v3751_v47  ;;  %v1006_v22 = vmul.f32 0.5, %v1005_v24  ;;  %v3907_v47 = vld [vmem:[%s5575_s2 + $0x8] ss:$16 sps:$4 sm:$0xff]   ;;  %v3993_v54 = vld [vmem:[%s5575_s2 + $0x8c] ss:$16 sps:$4 sm:$0xff]  }
 0x227   :  { %v4017_v24 = vld [vmem:[%s5575_s2 + $0xac] ss:$16 sps:$4 sm:$0xff]  }
 0x228   :  { %v3895_v2 = vadd.f32 %v1008_v26, %v1007_v49  ;;  %v3999_v26 = vld [vmem:[%s5575_s2 + $0x80] ss:$16 sps:$4 sm:$0xff]   ;;  %v4005_v49 = vld [vmem:[%s5575_s2 + $0x88] ss:$16 sps:$4 sm:$0xff]   ;;  %6069 = vst [vmem:[#allocation10_spill] sm:$0xff] %v4017_v24 }
 0x22a   :  { %2737 = vtanh.f32 %v3895_v2 }
 0x234   :  { %v2738_v27 = vpop.eup %2737 }
 0x235   :  { %v1011_v35 = vmul.f32 %v2738_v27, %v1006_v22  ;;  %v4023_v22 = vld [vmem:[%s5575_s2 + $0xa0] ss:$16 sps:$4 sm:$0xff]   ;;  %v4029_v27 = vld [vmem:[%s5575_s2 + $0xa8] ss:$16 sps:$4 sm:$0xff]  }
 0x237   :  { %v1012_v57 = vpack.c.bf16 %v1011_v35, %v1011_v35  ;;  %v4035_v35 = vld [vmem:[%s5575_s2 + $0xc4] ss:$16 sps:$4 sm:$0xff]  }
 0x239   :  { %1047 = vmatmul.mubr.bf16.vlgmr.msra.gmra.mrb[12].mxu0 %v1012_v57  ;;  %1088 = vmatmul.mubr.bf16.vlgmr.msra.gmra.mrb[12].mxu1 %v1012_v57 }
 0x23a   :  { %1130 = vmatpush1.bf16.msra.mxu0 %v3901_v51  ;;  %1171 = vmatpush1.bf16.msra.mxu1 %v3907_v47 }
 0x23b   :  { %1131 = vmatprep.subr.bf16.mxu0 %v3913_v50  ;;  %1172 = vmatprep.subr.bf16.mxu1 %v3919_v52 }
 0x23c   :  { %1161 = vmatprep.mubr.bf16.mxu0 %v5997_v53  ;;  %1202 = vmatprep.mubr.bf16.mxu1 %v5997_v53 }
 0x23e   :  { %1132 = vmatpush1.bf16.msra.mxu0 %v3927_v62  ;;  %1173 = vmatpush1.bf16.msra.mxu1 %v3933_v60 }
 0x23f   :  { %1133 = vmatprep.subr.bf16.mxu0 %v3939_v29  ;;  %1174 = vmatprep.subr.bf16.mxu1 %v3945_v46 }
 0x242   :  { %1134 = vmatpush1.bf16.msra.mxu0 %v3951_v38  ;;  %1175 = vmatpush1.bf16.msra.mxu1 %v3957_v48 }
 0x243   :  { %1135 = vmatprep.subr.bf16.mxu0 %v3963_v0  ;;  %1176 = vmatprep.subr.bf16.mxu1 %v3969_v59 }
 0x246   :  { %1136 = vmatpush1.bf16.msra.mxu0 %v3975_v55  ;;  %1177 = vmatpush1.bf16.msra.mxu1 %v3981_v58 }
 0x247   :  { %1137 = vmatprep.subr.bf16.mxu0 %v3987_v63  ;;  %1178 = vmatprep.subr.bf16.mxu1 %v3993_v54 }
 0x24a   :  { %1138 = vmatpush1.bf16.msra.mxu0 %v3999_v26  ;;  %1179 = vmatpush1.bf16.msra.mxu1 %v4005_v49 }
 0x24b   :  { %1139 = vmatprep.subr.bf16.mxu0 %v4011_v23  ;;  %1180 = vmatprep.subr.bf16.mxu1 %v4017_v24  ;;  %v4041_v24 = vld [vmem:[%s5575_s2 + $0xcc] ss:$16 sps:$4 sm:$0xff]  }
 0x24e   :  { %1140 = vmatpush1.bf16.msra.mxu0 %v4023_v22  ;;  %1181 = vmatpush1.bf16.msra.mxu1 %v4029_v27 }
 0x24f   :  { %1141 = vmatprep.subr.bf16.mxu0 %v4035_v35  ;;  %1182 = vmatprep.subr.bf16.mxu1 %v4041_v24 }
 0x252   :  { %1142 = vmatpush1.bf16.msra.mxu0 %v3269_v28  ;;  %1183 = vmatpush1.bf16.msra.mxu1 %v3279_v30  ;;  %v6070_v28 = vld [vmem:[#allocation24_spill] sm:$0xff]  ;;  %v6071_v30 = vld [vmem:[#allocation25_spill] sm:$0xff] }
 0x253   :  { %1143 = vmatprep.subr.bf16.mxu0 %v3284_v31  ;;  %1184 = vmatprep.subr.bf16.mxu1 %v3291_v32  ;;  %v6072_v31 = vld [vmem:[#allocation26_spill] sm:$0xff]  ;;  %v6073_v32 = vld [vmem:[#allocation27_spill] sm:$0xff] }
 0x256   :  { %1144 = vmatpush1.bf16.msra.mxu0 %v3296_v33  ;;  %1185 = vmatpush1.bf16.msra.mxu1 %v3301_v34  ;;  %v6074_v33 = vld [vmem:[#allocation28_spill] sm:$0xff]  ;;  %v6075_v34 = vld [vmem:[#allocation29_spill] sm:$0xff] }
 0x257   :  { %1235 = vmatprep.subr.bf16.mxu0 %v3311_v36  ;;  %1276 = vmatprep.subr.bf16.mxu1 %v3318_v37  ;;  %v6076_v36 = vld [vmem:[#allocation30_spill] sm:$0xff]  ;;  %v6077_v37 = vld [vmem:[#allocation31_spill] sm:$0xff] }
 0x259   :  { %1162 = vmatmul.mubr.bf16.vlgmr.msra.gmra.mrb[16].mxu0 %v1012_v57  ;;  %1203 = vmatmul.mubr.bf16.vlgmr.msra.gmra.mrb[16].mxu1 %v1012_v57  ;;  %v6104_v57 = vld [vmem:[#allocation58_spill] sm:$0xff] }
 0x25a   :  { %1236 = vmatpush1.bf16.msra.mxu0 %v3326_v39  ;;  %1277 = vmatpush1.bf16.msra.mxu1 %v3333_v40  ;;  %v6078_v39 = vld [vmem:[#allocation32_spill] sm:$0xff]  ;;  %v6079_v40 = vld [vmem:[#allocation33_spill] sm:$0xff] }
 0x25b   :  { %1237 = vmatprep.subr.bf16.mxu0 %v3338_v41  ;;  %1278 = vmatprep.subr.bf16.mxu1 %v3345_v42  ;;  %v6080_v41 = vld [vmem:[#allocation34_spill] sm:$0xff]  ;;  %v6081_v42 = vld [vmem:[#allocation35_spill] sm:$0xff] }
 0x25e   :  { %1238 = vmatpush1.bf16.msra.mxu0 %v3352_v43  ;;  %1279 = vmatpush1.bf16.msra.mxu1 %v3357_v44  ;;  %v6082_v43 = vld [vmem:[#allocation36_spill] sm:$0xff]  ;;  %v6083_v44 = vld [vmem:[#allocation37_spill] sm:$0xff] }
 0x25f   :  { %1239 = vmatprep.subr.bf16.mxu0 %v3364_v45  ;;  %1280 = vmatprep.subr.bf16.mxu1 %v5998_v3  ;;  %v6084_v45 = vld [vmem:[#allocation38_spill] sm:$0xff]  ;;  %v6085_v3 = vld [vmem:[#allocation39_spill] sm:$0xff] }
 0x262   :  { %1240 = vmatpush1.bf16.msra.mxu0 %v5999_v4  ;;  %1281 = vmatpush1.bf16.msra.mxu1 %v6000_v5  ;;  %v6086_v4 = vld [vmem:[#allocation40_spill] sm:$0xff]  ;;  %v6087_v5 = vld [vmem:[#allocation41_spill] sm:$0xff] }
 0x263   :  { %1241 = vmatprep.subr.bf16.mxu0 %v6001_v6  ;;  %1282 = vmatprep.subr.bf16.mxu1 %v6002_v7  ;;  %v6088_v6 = vld [vmem:[#allocation42_spill] sm:$0xff]  ;;  %v6089_v7 = vld [vmem:[#allocation43_spill] sm:$0xff] }
 0x266   :  { %1242 = vmatpush1.bf16.msra.mxu0 %v6003_v8  ;;  %1283 = vmatpush1.bf16.msra.mxu1 %v6004_v9  ;;  %v6090_v8 = vld [vmem:[#allocation44_spill] sm:$0xff]  ;;  %v6091_v9 = vld [vmem:[#allocation45_spill] sm:$0xff] }
 0x267   :  { %1243 = vmatprep.subr.bf16.mxu0 %v6005_v10  ;;  %1284 = vmatprep.subr.bf16.mxu1 %v6006_v11  ;;  %v6092_v10 = vld [vmem:[#allocation46_spill] sm:$0xff]  ;;  %v6093_v11 = vld [vmem:[#allocation47_spill] sm:$0xff] }
 0x26a   :  { %1244 = vmatpush1.bf16.msra.mxu0 %v6007_v12  ;;  %1285 = vmatpush1.bf16.msra.mxu1 %v6008_v13  ;;  %v6094_v12 = vld [vmem:[#allocation48_spill] sm:$0xff]  ;;  %v6095_v13 = vld [vmem:[#allocation49_spill] sm:$0xff] }
 0x26b   :  { %1245 = vmatprep.subr.bf16.mxu0 %v6009_v14  ;;  %1286 = vmatprep.subr.bf16.mxu1 %v6010_v15  ;;  %v6096_v14 = vld [vmem:[#allocation50_spill] sm:$0xff]  ;;  %v6097_v15 = vld [vmem:[#allocation51_spill] sm:$0xff] }
 0x26e   :  { %1246 = vmatpush1.bf16.msra.mxu0 %v6011_v16  ;;  %1287 = vmatpush1.bf16.msra.mxu1 %v6012_v17  ;;  %v6098_v16 = vld [vmem:[#allocation52_spill] sm:$0xff]  ;;  %v6099_v17 = vld [vmem:[#allocation53_spill] sm:$0xff] }
 0x26f   :  { %1247 = vmatprep.subr.bf16.mxu0 %v6013_v18  ;;  %1288 = vmatprep.subr.bf16.mxu1 %v6014_v19  ;;  %v6100_v18 = vld [vmem:[#allocation54_spill] sm:$0xff]  ;;  %v6101_v19 = vld [vmem:[#allocation55_spill] sm:$0xff] }
 0x272   :  { %1248 = vmatpush1.bf16.msra.mxu0 %v6015_v20  ;;  %1289 = vmatpush1.bf16.msra.mxu1 %v6016_v21  ;;  %v6102_v20 = vld [vmem:[#allocation56_spill] sm:$0xff]  ;;  %v6103_v21 = vld [vmem:[#allocation57_spill] sm:$0xff] }
 0x273   :  { %1249 = vmatprep.subr.bf16.mxu0 %v6070_v28  ;;  %1290 = vmatprep.subr.bf16.mxu1 %v6071_v30  ;;  %v6105_v28 = vld [vmem:[#allocation59_spill] sm:$0xff] }
 0x274   :  { %v4117_v30 = vld [vmem:[%s5575_s2 + $0x4] ss:$16 sps:$4 sm:$0xff]  }
 0x275   :  { %6106 = vst [vmem:[#allocation11_spill] sm:$0xff] %v4117_v30 }
 0x276   :  { %1250 = vmatpush1.bf16.msra.mxu0 %v6072_v31  ;;  %1291 = vmatpush1.bf16.msra.mxu1 %v6073_v32  ;;  %v4123_v31 = vld [vmem:[%s5575_s2 + $0xc] ss:$16 sps:$4 sm:$0xff]  }
 0x277   :  { %1251 = vmatprep.subr.bf16.mxu0 %v6074_v33  ;;  %1292 = vmatprep.subr.bf16.mxu1 %v6075_v34  ;;  %6107 = vst [vmem:[#allocation12_spill] sm:$0xff] %v4123_v31  ;;  %v6108_v34 = vld [vmem:[#allocation5_spill] sm:$0xff] }
 0x27a   :  { %1252 = vmatpush1.bf16.msra.mxu0 %v6076_v36  ;;  %1293 = vmatpush1.bf16.msra.mxu1 %v6077_v37 }
 0x27b   :  { %1253 = vmatprep.subr.bf16.mxu0 %v6078_v39  ;;  %1294 = vmatprep.subr.bf16.mxu1 %v6079_v40  ;;  %v6109_v40 = vld [vmem:[#allocation6_spill] sm:$0xff] }
 0x27e   :  { %1254 = vmatpush1.bf16.msra.mxu0 %v6080_v41  ;;  %1295 = vmatpush1.bf16.msra.mxu1 %v6081_v42 }
 0x27f   :  { %1255 = vmatprep.subr.bf16.mxu0 %v6082_v43  ;;  %1296 = vmatprep.subr.bf16.mxu1 %v6083_v44 }
 0x282   :  { %1256 = vmatpush1.bf16.msra.mxu0 %v6084_v45  ;;  %1297 = vmatpush1.bf16.msra.mxu1 %v6085_v3 }
 0x283   :  { %1257 = vmatprep.subr.bf16.mxu0 %v6086_v4  ;;  %1298 = vmatprep.subr.bf16.mxu1 %v6087_v5  ;;  %v6110_v5 = vld [vmem:[#allocation7_spill] sm:$0xff] }
 0x286   :  { %1258 = vmatpush1.bf16.msra.mxu0 %v6088_v6  ;;  %1299 = vmatpush1.bf16.msra.mxu1 %v6089_v7  ;;  %v6111_v7 = vld [vmem:[#allocation8_spill] sm:$0xff] }
 0x287   :  { %1259 = vmatprep.subr.bf16.mxu0 %v6090_v8  ;;  %1300 = vmatprep.subr.bf16.mxu1 %v6091_v9 }
 0x28a   :  { %1260 = vmatpush1.bf16.msra.mxu0 %v6092_v10  ;;  %1301 = vmatpush1.bf16.msra.mxu1 %v6093_v11 }
 0x28b   :  { %1261 = vmatprep.subr.bf16.mxu0 %v6094_v12  ;;  %1302 = vmatprep.subr.bf16.mxu1 %v6095_v13 }
 0x28e   :  { %1262 = vmatpush1.bf16.msra.mxu0 %v6096_v14  ;;  %1303 = vmatpush1.bf16.msra.mxu1 %v6097_v15 }
 0x28f   :  { %1263 = vmatprep.subr.bf16.mxu0 %v6098_v16  ;;  %1304 = vmatprep.subr.bf16.mxu1 %v6099_v17 }
 0x292   :  { %1264 = vmatpush1.bf16.msra.mxu0 %v6100_v18  ;;  %1305 = vmatpush1.bf16.msra.mxu1 %v6101_v19  ;;  %v6112_v18 = vld [vmem:[#allocation9_spill] sm:$0xff] }
 0x293   :  { %1265 = vmatprep.subr.bf16.mxu0 %v6102_v20  ;;  %1306 = vmatprep.subr.bf16.mxu1 %v6103_v21  ;;  %v1119_v21 = vpop.permute.xlu1 %1118 }
 0x296   :  { %1266 = vmatpush1.bf16.msra.mxu0 %v6104_v57  ;;  %1307 = vmatpush1.bf16.msra.mxu1 %v6105_v28  ;;  %v6113_v57 = vld [vmem:[#allocation62_spill] sm:$0xff] }
 0x297   :  { %1350 = vmatprep.subr.bf16.mxu0 %v4117_v30  ;;  %1391 = vmatprep.subr.bf16.mxu1 %v4123_v31  ;;  %v1121_v28 = vmul.f32 %v1119_v21, %v6113_v57 }
 0x30c   :  { %v1048_v32 = vpop.f32.mrb[12].mxu0  ;;  %v1089_v33 = vpop.f32.mrb[12].mxu1 }
 0x30d   :  { %v1049_v36 = vadd.f32 %v1048_v32, %v6108_v34  ;;  %v1050_v37 = vpop.f32.mrb[13].mxu0  ;;  %v1091_v39 = vpop.f32.mrb[13].mxu1  ;;  %v1090_v6 = vadd.f32 %v1089_v33, %v6110_v5  ;;  %v6114_v32 = vld [vmem:[#allocation64_spill] sm:$0xff] }
 0x30e   :  { %v1051_v41 = vadd.f32 %v1050_v37, %v6109_v40  ;;  %v1052_v42 = vpop.f32.mrb[14].mxu0  ;;  %v1093_v43 = vpop.f32.mrb[14].mxu1  ;;  %v1092_v8 = vadd.f32 %v1091_v39, %v6111_v7  ;;  %v1122_v33 = vmul.f32 %v1119_v21, %v6114_v32  ;;  %v6115_v37 = vld [vmem:[#allocation65_spill] sm:$0xff] }
 0x30f   :  { %v1096_v44 = vmul.f32 0.5, %v1049_v36  ;;  %v1053_v45 = vpop.f32.mrb[15].mxu0  ;;  %v1094_v3 = vpop.f32.mrb[15].mxu1  ;;  %v1125_v39 = vadd.f32 %v1121_v28, %v6115_v37 }
 0x310   :  { %v1100_v4 = vmul.f32 0.5, %v1051_v41  ;;  %v1105_v9 = vmul.f32 0.5, %v1092_v8  ;;  %v6116_v41 = vld [vmem:[#allocation66_spill] sm:$0xff] }
 0x311   :  { %2739 = vtanh.f32 %v1096_v44  ;;  %v1123_v42 = vmul.f32 %v1119_v21, %v6116_v41  ;;  %v1126_v44 = vadd.f32 %v1122_v33, %v3734_v56 }
 0x312   :  { %2741 = vtanh.f32 %v1100_v4 }
 0x313   :  { %2743 = vtanh.f32 %v1090_v6  ;;  %v1127_v6 = vadd.f32 %v1123_v42, %v6067_v25 }
 0x314   :  { %2745 = vtanh.f32 %v1105_v9  ;;  %v1124_v9 = vmul.f32 %v1119_v21, %v6068_v61 }
 0x31b   :  { %v2740_v10 = vpop.eup %2739 }
 0x31c   :  { %v2742_v11 = vpop.eup %2741  ;;  %v1098_v12 = vadd.f32 1.0, %v2740_v10 }
 0x31d   :  { %v1102_v13 = vadd.f32 1.0, %v2742_v11  ;;  %v2744_v15 = vpop.eup %2743 }
 0x31e   :  { %v1099_v14 = vmul.f32 0.5, %v1098_v12  ;;  %v2746_v36 = vpop.eup %2745 }
 0x31f   :  { %v1103_v16 = vmul.f32 0.5, %v1102_v13  ;;  %v1107_v43 = vadd.f32 1.0, %v2746_v36  ;;  %v1128_v36 = vadd.f32 %v1124_v9, %v3748_v1 }
 0x320   :  { %v1110_v17 = vmul.f32 %v2744_v15, %v1099_v14 }
 0x321   :  { %v1109_v19 = vmul.f32 %v1103_v16, %v6112_v18  ;;  %v1108_v11 = vmul.f32 0.5, %v1107_v43 }
 0x323   :  { %v4131_v20 = vadd.f32 %v1110_v17, %v1109_v19 }
 0x325   :  { %2747 = vtanh.f32 %v4131_v20 }
 0x32c   :  { %v1163_v45 = vpop.f32.mrb[16].mxu0  ;;  %v1204_v3 = vpop.f32.mrb[16].mxu1 }
 0x32d   :  { %v1211_v4 = vadd.f32 %v1163_v45, %v1125_v39  ;;  %v1165_v8 = vpop.f32.mrb[17].mxu0  ;;  %v1206_v10 = vpop.f32.mrb[17].mxu1  ;;  %v1213_v33 = vadd.f32 %v1204_v3, %v1127_v6 }
 0x32e   :  { %v1212_v12 = vadd.f32 %v1165_v8, %v1126_v44  ;;  %v1167_v13 = vpop.f32.mrb[18].mxu0  ;;  %v1208_v14 = vpop.f32.mrb[18].mxu1  ;;  %v1214_v21 = vadd.f32 %v1206_v10, %v1128_v36  ;;  %v4199_v36 = vld [vmem:[%s5575_s2 + $0xe0] ss:$16 sps:$4 sm:$0xff]  }
 0x32f   :  { %v2748_v15 = vpop.eup %2747  ;;  %v1215_v16 = vmul.f32 0.5, %v1211_v4  ;;  %v1168_v17 = vpop.f32.mrb[19].mxu0 }
 0x330   :  { %v1209_v18 = vpop.f32.mrb[19].mxu1  ;;  %v1219_v19 = vmul.f32 0.5, %v1212_v12  ;;  %v1113_v28 = vmul.f32 %v2748_v15, %v1108_v11  ;;  %v1224_v42 = vmul.f32 0.5, %v1214_v21  ;;  %v4211_v21 = vld [vmem:[%s5577_s4 + $0x4] ss:$16 sps:$4 sm:$0xff]  }
 0x331   :  { %2749 = vtanh.f32 %v1215_v16  ;;  %v4175_v18 = vld [vmem:[%s5575_s2 + $0xc0] ss:$16 sps:$4 sm:$0xff]  }
 0x332   :  { %2751 = vtanh.f32 %v1219_v19  ;;  %v1234_v39 = vpack.c.bf16 %v1113_v28, %v1113_v28  ;;  %v4181_v19 = vld [vmem:[%s5575_s2 + $0xc8] ss:$16 sps:$4 sm:$0xff]   ;;  %v4187_v28 = vld [vmem:[%s5575_s2 + $0xe4] ss:$16 sps:$4 sm:$0xff]  }
 0x333   :  { %2753 = vtanh.f32 %v1213_v33  ;;  %v4193_v33 = vld [vmem:[%s5575_s2 + $0xec] ss:$16 sps:$4 sm:$0xff]  }
 0x334   :  { %1267 = vmatprep.mubr.bf16.mxu0 %v1234_v39  ;;  %1308 = vmatprep.mubr.bf16.mxu1 %v1234_v39  ;;  %2755 = vtanh.f32 %v1224_v42  ;;  %v4205_v39 = vld [vmem:[%s5575_s2 + $0xe8] ss:$16 sps:$4 sm:$0xff]   ;;  %v4217_v42 = vld [vmem:[%s5577_s4 + $0xc] ss:$16 sps:$4 sm:$0xff]  }
 0x33b   :  { %v2750_v43 = vpop.eup %2749 }
 0x33c   :  { %v2752_v44 = vpop.eup %2751  ;;  %v1217_v45 = vadd.f32 1.0, %v2750_v43  ;;  %v4223_v43 = vld [vmem:[%s5577_s4] ss:$16 sps:$4 sm:$0xff]  }
 0x33d   :  { %v1221_v8 = vadd.f32 1.0, %v2752_v44  ;;  %v2754_v13 = vpop.eup %2753  ;;  %6118 = vst [vmem:[#allocation13_spill] sm:$0xff] %v4223_v43  ;;  %v4229_v44 = vld [vmem:[%s5577_s4 + $0x8] ss:$16 sps:$4 sm:$0xff]  }
 0x33e   :  { %v1218_v4 = vmul.f32 0.5, %v1217_v45  ;;  %v2756_v9 = vpop.eup %2755  ;;  %6119 = vst [vmem:[#allocation14_spill] sm:$0xff] %v4229_v44  ;;  %v4235_v45 = vld [vmem:[%s5577_s4 + $0x24] ss:$16 sps:$4 sm:$0xff]  }
 0x33f   :  { %v1222_v12 = vmul.f32 0.5, %v1221_v8  ;;  %v1226_v14 = vadd.f32 1.0, %v2756_v9  ;;  %6120 = vst [vmem:[#allocation15_spill] sm:$0xff] %v4235_v45  ;;  %v4241_v8 = vld [vmem:[%s5577_s4 + $0x2c] ss:$16 sps:$4 sm:$0xff]  }
 0x340   :  { %v1229_v11 = vmul.f32 %v2754_v13, %v1218_v4  ;;  %6121 = vst [vmem:[#allocation16_spill] sm:$0xff] %v4241_v8  ;;  %v4247_v4 = vld [vmem:[%s5577_s4 + $0x20] ss:$16 sps:$4 sm:$0xff]   ;;  %v4253_v13 = vld [vmem:[%s5577_s4 + $0x28] ss:$16 sps:$4 sm:$0xff]  }
 0x341   :  { %v1228_v3 = vmul.f32 %v1222_v12, %v3895_v2  ;;  %v1227_v15 = vmul.f32 0.5, %v1226_v14  ;;  %v6117_v2 = vld [vmem:[#allocation10_spill] sm:$0xff]  ;;  %6122 = vst [vmem:[#allocation17_spill] sm:$0xff] %v4247_v4  ;;  %6123 = vst [vmem:[#allocation18_spill] sm:$0xff] %v4253_v13  ;;  %v4259_v12 = vld [vmem:[%s5577_s4 + $0x44] ss:$16 sps:$4 sm:$0xff]  }
 0x342   :  { %6124 = vst [vmem:[#allocation19_spill] sm:$0xff] %v4259_v12  ;;  %v4277_v9 = vld [vmem:[%s5577_s4 + $0x48] ss:$16 sps:$4 sm:$0xff]   ;;  %v4283_v14 = vld [vmem:[%s5577_s4 + $0x64] ss:$16 sps:$4 sm:$0xff]  }
 0x343   :  { %v4143_v6 = vadd.f32 %v1229_v11, %v1228_v3  ;;  %v4265_v11 = vld [vmem:[%s5577_s4 + $0x4c] ss:$16 sps:$4 sm:$0xff]   ;;  %v4271_v3 = vld [vmem:[%s5577_s4 + $0x40] ss:$16 sps:$4 sm:$0xff]   ;;  %6127 = vst [vmem:[#allocation22_spill] sm:$0xff] %v4277_v9  ;;  %6128 = vst [vmem:[#allocation23_spill] sm:$0xff] %v4283_v14 }
 0x344   :  { %6125 = vst [vmem:[#allocation20_spill] sm:$0xff] %v4265_v11  ;;  %6126 = vst [vmem:[#allocation21_spill] sm:$0xff] %v4271_v3 }
 0x345   :  { %2757 = vtanh.f32 %v4143_v6 }
 0x34f   :  { %v2758_v10 = vpop.eup %2757 }
 0x350   :  { %v1232_v16 = vmul.f32 %v2758_v10, %v1227_v15  ;;  %v4289_v15 = vld [vmem:[%s5577_s4 + $0x6c] ss:$16 sps:$4 sm:$0xff]   ;;  %v4295_v10 = vld [vmem:[%s5577_s4 + $0x60] ss:$16 sps:$4 sm:$0xff]  }
 0x351   :  { %6129 = vst [vmem:[#allocation3_spill] sm:$0xff] %v4289_v15  ;;  %6130 = vst [vmem:[#allocation4_spill] sm:$0xff] %v4295_v10 }
 0x352   :  { %v1233_v17 = vpack.c.bf16 %v1232_v16, %v1232_v16  ;;  %v4301_v16 = vld [vmem:[%s5577_s4 + $0x68] ss:$16 sps:$4 sm:$0xff]  }
 0x353   :  { %6131 = vst [vmem:[#allocation60_spill] sm:$0xff] %v4301_v16 }
 0x354   :  { %1268 = vmatmul.mubr.bf16.vlgmr.msra.gmra.mrb[20].mxu0 %v1233_v17  ;;  %1309 = vmatmul.mubr.bf16.vlgmr.msra.gmra.mrb[20].mxu1 %v1233_v17 }
 0x355   :  { %1351 = vmatpush1.bf16.msra.mxu0 %v3901_v51  ;;  %1392 = vmatpush1.bf16.msra.mxu1 %v3907_v47 }
 0x356   :  { %1352 = vmatprep.subr.bf16.mxu0 %v3913_v50  ;;  %1393 = vmatprep.subr.bf16.mxu1 %v3919_v52 }
 0x357   :  { %1382 = vmatprep.mubr.bf16.mxu0 %v5997_v53  ;;  %1423 = vmatprep.mubr.bf16.mxu1 %v5997_v53 }
 0x359   :  { %1353 = vmatpush1.bf16.msra.mxu0 %v3927_v62  ;;  %1394 = vmatpush1.bf16.msra.mxu1 %v3933_v60 }
 0x35a   :  { %1354 = vmatprep.subr.bf16.mxu0 %v3939_v29  ;;  %1395 = vmatprep.subr.bf16.mxu1 %v3945_v46 }
 0x35d   :  { %1355 = vmatpush1.bf16.msra.mxu0 %v3951_v38  ;;  %1396 = vmatpush1.bf16.msra.mxu1 %v3957_v48 }
 0x35e   :  { %1356 = vmatprep.subr.bf16.mxu0 %v3963_v0  ;;  %1397 = vmatprep.subr.bf16.mxu1 %v3969_v59 }
 0x361   :  { %1357 = vmatpush1.bf16.msra.mxu0 %v3975_v55  ;;  %1398 = vmatpush1.bf16.msra.mxu1 %v3981_v58 }
 0x362   :  { %1358 = vmatprep.subr.bf16.mxu0 %v3987_v63  ;;  %1399 = vmatprep.subr.bf16.mxu1 %v3993_v54 }
 0x365   :  { %1359 = vmatpush1.bf16.msra.mxu0 %v3999_v26  ;;  %1400 = vmatpush1.bf16.msra.mxu1 %v4005_v49 }
 0x366   :  { %1360 = vmatprep.subr.bf16.mxu0 %v4011_v23  ;;  %1401 = vmatprep.subr.bf16.mxu1 %v6117_v2 }
 0x369   :  { %1361 = vmatpush1.bf16.msra.mxu0 %v4023_v22  ;;  %1402 = vmatpush1.bf16.msra.mxu1 %v4029_v27 }
 0x36a   :  { %1362 = vmatprep.subr.bf16.mxu0 %v4035_v35  ;;  %1403 = vmatprep.subr.bf16.mxu1 %v4041_v24 }
 0x36d   :  { %1363 = vmatpush1.bf16.msra.mxu0 %v4175_v18  ;;  %1404 = vmatpush1.bf16.msra.mxu1 %v4181_v19 }
 0x36e   :  { %1364 = vmatprep.subr.bf16.mxu0 %v4187_v28  ;;  %1405 = vmatprep.subr.bf16.mxu1 %v4193_v33 }
 0x371   :  { %1365 = vmatpush1.bf16.msra.mxu0 %v4199_v36  ;;  %1406 = vmatpush1.bf16.msra.mxu1 %v4205_v39 }
 0x372   :  { %1456 = vmatprep.subr.bf16.mxu0 %v4211_v21  ;;  %1497 = vmatprep.subr.bf16.mxu1 %v4217_v42 }
 0x374   :  { %1383 = vmatmul.mubr.bf16.vlgmr.msra.gmra.mrb[24].mxu0 %v1233_v17  ;;  %1424 = vmatmul.mubr.bf16.vlgmr.msra.gmra.mrb[24].mxu1 %v1233_v17  ;;  %v4307_v17 = vld [vmem:[%s5577_s4 + $0x84] ss:$16 sps:$4 sm:$0xff]  }
 0x375   :  { %1457 = vmatpush1.bf16.msra.mxu0 %v4223_v43  ;;  %1498 = vmatpush1.bf16.msra.mxu1 %v4229_v44  ;;  %6132 = vst [vmem:[#allocation61_spill] sm:$0xff] %v4307_v17 }
 0x376   :  { %1458 = vmatprep.subr.bf16.mxu0 %v4235_v45  ;;  %1499 = vmatprep.subr.bf16.mxu1 %v4241_v8 }
 0x379   :  { %1459 = vmatpush1.bf16.msra.mxu0 %v4247_v4  ;;  %1500 = vmatpush1.bf16.msra.mxu1 %v4253_v13 }
 0x37a   :  { %1460 = vmatprep.subr.bf16.mxu0 %v4259_v12  ;;  %1501 = vmatprep.subr.bf16.mxu1 %v4265_v11 }
 0x37d   :  { %1461 = vmatpush1.bf16.msra.mxu0 %v4271_v3  ;;  %1502 = vmatpush1.bf16.msra.mxu1 %v4277_v9 }
 0x37e   :  { %1462 = vmatprep.subr.bf16.mxu0 %v4283_v14  ;;  %1503 = vmatprep.subr.bf16.mxu1 %v4289_v15  ;;  %v4313_v15 = vld [vmem:[%s5577_s4 + $0x8c] ss:$16 sps:$4 sm:$0xff]  }
 0x37f   :  { %6133 = vst [vmem:[#allocation63_spill] sm:$0xff] %v4313_v15 }
 0x381   :  { %1463 = vmatpush1.bf16.msra.mxu0 %v4295_v10  ;;  %1504 = vmatpush1.bf16.msra.mxu1 %v4301_v16  ;;  %v4319_v10 = vld [vmem:[%s5577_s4 + $0x80] ss:$16 sps:$4 sm:$0xff]   ;;  %v4325_v16 = vld [vmem:[%s5577_s4 + $0x88] ss:$16 sps:$4 sm:$0xff]  }
 0x382   :  { %1464 = vmatprep.subr.bf16.mxu0 %v4307_v17  ;;  %1505 = vmatprep.subr.bf16.mxu1 %v4313_v15  ;;  %6134 = vst [vmem:[#allocation67_spill] sm:$0xff] %v4319_v10  ;;  %6135 = vst [vmem:[#allocation68_spill] sm:$0xff] %v4325_v16  ;;  %v4331_v17 = vld [vmem:[%s5577_s4 + $0xa4] ss:$16 sps:$4 sm:$0xff]   ;;  %v4337_v15 = vld [vmem:[%s5577_s4 + $0xac] ss:$16 sps:$4 sm:$0xff]  }
 0x383   :  { %6136 = vst [vmem:[#allocation24_spill] sm:$0xff] %v4331_v17  ;;  %6137 = vst [vmem:[#allocation25_spill] sm:$0xff] %v4337_v15 }
 0x385   :  { %1465 = vmatpush1.bf16.msra.mxu0 %v4319_v10  ;;  %1506 = vmatpush1.bf16.msra.mxu1 %v4325_v16  ;;  %v4343_v10 = vld [vmem:[%s5577_s4 + $0xa0] ss:$16 sps:$4 sm:$0xff]   ;;  %v4349_v16 = vld [vmem:[%s5577_s4 + $0xa8] ss:$16 sps:$4 sm:$0xff]  }
 0x386   :  { %1466 = vmatprep.subr.bf16.mxu0 %v4331_v17  ;;  %1507 = vmatprep.subr.bf16.mxu1 %v4337_v15  ;;  %6138 = vst [vmem:[#allocation26_spill] sm:$0xff] %v4343_v10  ;;  %6139 = vst [vmem:[#allocation27_spill] sm:$0xff] %v4349_v16  ;;  %v4355_v17 = vld [vmem:[%s5577_s4 + $0xc4] ss:$16 sps:$4 sm:$0xff]   ;;  %v4361_v15 = vld [vmem:[%s5577_s4 + $0xcc] ss:$16 sps:$4 sm:$0xff]  }
 0x387   :  { %6140 = vst [vmem:[#allocation28_spill] sm:$0xff] %v4355_v17  ;;  %6141 = vst [vmem:[#allocation29_spill] sm:$0xff] %v4361_v15 }
 0x389   :  { %1467 = vmatpush1.bf16.msra.mxu0 %v4343_v10  ;;  %1508 = vmatpush1.bf16.msra.mxu1 %v4349_v16  ;;  %v4367_v10 = vld [vmem:[%s5577_s4 + $0xc0] ss:$16 sps:$4 sm:$0xff]   ;;  %v4373_v16 = vld [vmem:[%s5577_s4 + $0xc8] ss:$16 sps:$4 sm:$0xff]  }
 0x38a   :  { %1468 = vmatprep.subr.bf16.mxu0 %v4355_v17  ;;  %1509 = vmatprep.subr.bf16.mxu1 %v4361_v15  ;;  %6142 = vst [vmem:[#allocation30_spill] sm:$0xff] %v4367_v10  ;;  %6143 = vst [vmem:[#allocation31_spill] sm:$0xff] %v4373_v16  ;;  %v4379_v17 = vld [vmem:[%s5577_s4 + $0xe4] ss:$16 sps:$4 sm:$0xff]   ;;  %v4385_v15 = vld [vmem:[%s5577_s4 + $0xec] ss:$16 sps:$4 sm:$0xff]  }
 0x38b   :  { %6144 = vst [vmem:[#allocation32_spill] sm:$0xff] %v4379_v17  ;;  %6145 = vst [vmem:[#allocation33_spill] sm:$0xff] %v4385_v15 }
 0x38d   :  { %1469 = vmatpush1.bf16.msra.mxu0 %v4367_v10  ;;  %1510 = vmatpush1.bf16.msra.mxu1 %v4373_v16  ;;  %v4391_v10 = vld [vmem:[%s5577_s4 + $0xe0] ss:$16 sps:$4 sm:$0xff]   ;;  %v4397_v16 = vld [vmem:[%s5577_s4 + $0xe8] ss:$16 sps:$4 sm:$0xff]  }
 0x38e   :  { %1470 = vmatprep.subr.bf16.mxu0 %v4379_v17  ;;  %1511 = vmatprep.subr.bf16.mxu1 %v4385_v15  ;;  %6146 = vst [vmem:[#allocation34_spill] sm:$0xff] %v4391_v10  ;;  %6147 = vst [vmem:[#allocation35_spill] sm:$0xff] %v4397_v16  ;;  %v4403_v17 = vld [vmem:[%s5577_s4 + $0x104] ss:$16 sps:$4 sm:$0xff]   ;;  %v4409_v15 = vld [vmem:[%s5577_s4 + $0x10c] ss:$16 sps:$4 sm:$0xff]  }
 0x38f   :  { %6148 = vst [vmem:[#allocation36_spill] sm:$0xff] %v4403_v17  ;;  %6149 = vst [vmem:[#allocation37_spill] sm:$0xff] %v4409_v15 }
 0x391   :  { %1471 = vmatpush1.bf16.msra.mxu0 %v4391_v10  ;;  %1512 = vmatpush1.bf16.msra.mxu1 %v4397_v16  ;;  %v4415_v10 = vld [vmem:[%s5577_s4 + $0x100] ss:$16 sps:$4 sm:$0xff]   ;;  %v4421_v16 = vld [vmem:[%s5577_s4 + $0x108] ss:$16 sps:$4 sm:$0xff]  }
 0x392   :  { %1472 = vmatprep.subr.bf16.mxu0 %v4403_v17  ;;  %1513 = vmatprep.subr.bf16.mxu1 %v4409_v15  ;;  %6150 = vst [vmem:[#allocation38_spill] sm:$0xff] %v4415_v10  ;;  %6151 = vst [vmem:[#allocation39_spill] sm:$0xff] %v4421_v16  ;;  %v4427_v17 = vld [vmem:[%s5577_s4 + $0x124] ss:$16 sps:$4 sm:$0xff]   ;;  %v4433_v15 = vld [vmem:[%s5577_s4 + $0x12c] ss:$16 sps:$4 sm:$0xff]  }
 0x393   :  { %6152 = vst [vmem:[#allocation40_spill] sm:$0xff] %v4427_v17  ;;  %6153 = vst [vmem:[#allocation41_spill] sm:$0xff] %v4433_v15 }
 0x395   :  { %1473 = vmatpush1.bf16.msra.mxu0 %v4415_v10  ;;  %1514 = vmatpush1.bf16.msra.mxu1 %v4421_v16  ;;  %v4439_v10 = vld [vmem:[%s5577_s4 + $0x120] ss:$16 sps:$4 sm:$0xff]   ;;  %v4445_v16 = vld [vmem:[%s5577_s4 + $0x128] ss:$16 sps:$4 sm:$0xff]  }
 0x396   :  { %1474 = vmatprep.subr.bf16.mxu0 %v4427_v17  ;;  %1515 = vmatprep.subr.bf16.mxu1 %v4433_v15  ;;  %6154 = vst [vmem:[#allocation42_spill] sm:$0xff] %v4439_v10  ;;  %6155 = vst [vmem:[#allocation43_spill] sm:$0xff] %v4445_v16  ;;  %v4451_v17 = vld [vmem:[%s5577_s4 + $0x144] ss:$16 sps:$4 sm:$0xff]   ;;  %v4457_v15 = vld [vmem:[%s5577_s4 + $0x14c] ss:$16 sps:$4 sm:$0xff]  }
 0x397   :  { %6156 = vst [vmem:[#allocation44_spill] sm:$0xff] %v4451_v17  ;;  %6157 = vst [vmem:[#allocation45_spill] sm:$0xff] %v4457_v15 }
 0x399   :  { %1475 = vmatpush1.bf16.msra.mxu0 %v4439_v10  ;;  %1516 = vmatpush1.bf16.msra.mxu1 %v4445_v16  ;;  %v4463_v10 = vld [vmem:[%s5577_s4 + $0x140] ss:$16 sps:$4 sm:$0xff]   ;;  %v4469_v16 = vld [vmem:[%s5577_s4 + $0x148] ss:$16 sps:$4 sm:$0xff]  }
 0x39a   :  { %1476 = vmatprep.subr.bf16.mxu0 %v4451_v17  ;;  %1517 = vmatprep.subr.bf16.mxu1 %v4457_v15  ;;  %6158 = vst [vmem:[#allocation46_spill] sm:$0xff] %v4463_v10  ;;  %6159 = vst [vmem:[#allocation47_spill] sm:$0xff] %v4469_v16  ;;  %v4475_v17 = vld [vmem:[%s5577_s4 + $0x164] ss:$16 sps:$4 sm:$0xff]   ;;  %v4481_v15 = vld [vmem:[%s5577_s4 + $0x16c] ss:$16 sps:$4 sm:$0xff]  }
 0x39b   :  { %6160 = vst [vmem:[#allocation48_spill] sm:$0xff] %v4475_v17  ;;  %6161 = vst [vmem:[#allocation49_spill] sm:$0xff] %v4481_v15 }
 0x39d   :  { %1477 = vmatpush1.bf16.msra.mxu0 %v4463_v10  ;;  %1518 = vmatpush1.bf16.msra.mxu1 %v4469_v16  ;;  %v4487_v10 = vld [vmem:[%s5577_s4 + $0x160] ss:$16 sps:$4 sm:$0xff]   ;;  %v4493_v16 = vld [vmem:[%s5577_s4 + $0x168] ss:$16 sps:$4 sm:$0xff]  }
 0x39e   :  { %1478 = vmatprep.subr.bf16.mxu0 %v4475_v17  ;;  %1519 = vmatprep.subr.bf16.mxu1 %v4481_v15  ;;  %6162 = vst [vmem:[#allocation50_spill] sm:$0xff] %v4487_v10  ;;  %6163 = vst [vmem:[#allocation51_spill] sm:$0xff] %v4493_v16  ;;  %v4499_v17 = vld [vmem:[%s5577_s4 + $0x184] ss:$16 sps:$4 sm:$0xff]   ;;  %v4505_v15 = vld [vmem:[%s5577_s4 + $0x18c] ss:$16 sps:$4 sm:$0xff]  }
 0x39f   :  { %6164 = vst [vmem:[#allocation52_spill] sm:$0xff] %v4499_v17  ;;  %6165 = vst [vmem:[#allocation53_spill] sm:$0xff] %v4505_v15 }
 0x3a1   :  { %1479 = vmatpush1.bf16.msra.mxu0 %v4487_v10  ;;  %1520 = vmatpush1.bf16.msra.mxu1 %v4493_v16  ;;  %v4511_v10 = vld [vmem:[%s5577_s4 + $0x180] ss:$16 sps:$4 sm:$0xff]   ;;  %v4517_v16 = vld [vmem:[%s5577_s4 + $0x188] ss:$16 sps:$4 sm:$0xff]  }
 0x3a2   :  { %1480 = vmatprep.subr.bf16.mxu0 %v4499_v17  ;;  %1521 = vmatprep.subr.bf16.mxu1 %v4505_v15  ;;  %6166 = vst [vmem:[#allocation54_spill] sm:$0xff] %v4511_v10  ;;  %6167 = vst [vmem:[#allocation55_spill] sm:$0xff] %v4517_v16  ;;  %v4523_v17 = vld [vmem:[%s5577_s4 + $0x1a4] ss:$16 sps:$4 sm:$0xff]   ;;  %v4529_v15 = vld [vmem:[%s5577_s4 + $0x1ac] ss:$16 sps:$4 sm:$0xff]  }
 0x3a3   :  { %6168 = vst [vmem:[#allocation56_spill] sm:$0xff] %v4523_v17  ;;  %6169 = vst [vmem:[#allocation57_spill] sm:$0xff] %v4529_v15 }
 0x3a5   :  { %1481 = vmatpush1.bf16.msra.mxu0 %v4511_v10  ;;  %1522 = vmatpush1.bf16.msra.mxu1 %v4517_v16  ;;  %v4535_v10 = vld [vmem:[%s5577_s4 + $0x1a0] ss:$16 sps:$4 sm:$0xff]   ;;  %v4541_v16 = vld [vmem:[%s5577_s4 + $0x1a8] ss:$16 sps:$4 sm:$0xff]  }
 0x3a6   :  { %1482 = vmatprep.subr.bf16.mxu0 %v4523_v17  ;;  %1523 = vmatprep.subr.bf16.mxu1 %v4529_v15  ;;  %6170 = vst [vmem:[#allocation58_spill] sm:$0xff] %v4535_v10  ;;  %6171 = vst [vmem:[#allocation59_spill] sm:$0xff] %v4541_v16  ;;  %v4547_v17 = vld [vmem:[%s5577_s4 + $0x1c4] ss:$16 sps:$4 sm:$0xff]   ;;  %v4553_v15 = vld [vmem:[%s5577_s4 + $0x1cc] ss:$16 sps:$4 sm:$0xff]  }
 0x3a7   :  { %6172 = vst [vmem:[#allocation9_spill] sm:$0xff] %v4547_v17  ;;  %6173 = vst [vmem:[#allocation10_spill] sm:$0xff] %v4553_v15 }
 0x3a9   :  { %1483 = vmatpush1.bf16.msra.mxu0 %v4535_v10  ;;  %1524 = vmatpush1.bf16.msra.mxu1 %v4541_v16  ;;  %v4559_v10 = vld [vmem:[%s5577_s4 + $0x1c0] ss:$16 sps:$4 sm:$0xff]   ;;  %v4565_v16 = vld [vmem:[%s5577_s4 + $0x1c8] ss:$16 sps:$4 sm:$0xff]  }
 0x3aa   :  { %1484 = vmatprep.subr.bf16.mxu0 %v4547_v17  ;;  %1525 = vmatprep.subr.bf16.mxu1 %v4553_v15  ;;  %6174 = vst [vmem:[#allocation69_spill] sm:$0xff] %v4559_v10  ;;  %6175 = vst [vmem:[#allocation70_spill] sm:$0xff] %v4565_v16  ;;  %v4571_v17 = vld [vmem:[%s5577_s4 + $0x1e4] ss:$16 sps:$4 sm:$0xff]   ;;  %v4577_v15 = vld [vmem:[%s5577_s4 + $0x1ec] ss:$16 sps:$4 sm:$0xff]  }
 0x3ab   :  { %6176 = vst [vmem:[#allocation71_spill] sm:$0xff] %v4571_v17  ;;  %6177 = vst [vmem:[#allocation72_spill] sm:$0xff] %v4577_v15 }
 0x3ad   :  { %1485 = vmatpush1.bf16.msra.mxu0 %v4559_v10  ;;  %1526 = vmatpush1.bf16.msra.mxu1 %v4565_v16  ;;  %v4583_v10 = vld [vmem:[%s5577_s4 + $0x1e0] ss:$16 sps:$4 sm:$0xff]   ;;  %v4589_v16 = vld [vmem:[%s5577_s4 + $0x1e8] ss:$16 sps:$4 sm:$0xff]  }
 0x3ae   :  { %1486 = vmatprep.subr.bf16.mxu0 %v4571_v17  ;;  %1527 = vmatprep.subr.bf16.mxu1 %v4577_v15  ;;  %6178 = vst [vmem:[#allocation73_spill] sm:$0xff] %v4583_v10  ;;  %6179 = vst [vmem:[#allocation74_spill] sm:$0xff] %v4589_v16 }
 0x3b1   :  { %1487 = vmatpush1.bf16.msra.mxu0 %v4583_v10  ;;  %1528 = vmatpush1.bf16.msra.mxu1 %v4589_v16 }
 0x3b2   :  { %1571 = vmatprep.subr.bf16.mxu0 %v4117_v30  ;;  %1612 = vmatprep.subr.bf16.mxu1 %v4123_v31 }
 0x427   :  { %v1269_v17 = vpop.f32.mrb[20].mxu0  ;;  %v1310_v15 = vpop.f32.mrb[20].mxu1 }
 0x428   :  { %v1270_v14 = vadd.f32 %v1269_v17, %v6108_v34  ;;  %v1271_v9 = vpop.f32.mrb[21].mxu0  ;;  %v1312_v3 = vpop.f32.mrb[21].mxu1  ;;  %v1311_v16 = vadd.f32 %v1310_v15, %v6110_v5 }
 0x429   :  { %v1272_v11 = vadd.f32 %v1271_v9, %v6109_v40  ;;  %v1273_v10 = vpop.f32.mrb[22].mxu0  ;;  %v1314_v12 = vpop.f32.mrb[22].mxu1  ;;  %v1313_v31 = vadd.f32 %v1312_v3, %v6111_v7 }
 0x42a   :  { %v1317_v13 = vmul.f32 0.5, %v1270_v14  ;;  %v1274_v4 = vpop.f32.mrb[23].mxu0  ;;  %v1315_v8 = vpop.f32.mrb[23].mxu1 }
 0x42b   :  { %v1321_v45 = vmul.f32 0.5, %v1272_v11  ;;  %v1326_v30 = vmul.f32 0.5, %v1313_v31 }
 0x42c   :  { %2759 = vtanh.f32 %v1317_v13 }
 0x42d   :  { %2761 = vtanh.f32 %v1321_v45  ;;  %v1340_v45 = vpop.permute.xlu1 %1339 }
 0x42e   :  { %2763 = vtanh.f32 %v1311_v16  ;;  %v1342_v11 = vmul.f32 %v1340_v45, %v6113_v57  ;;  %v1343_v31 = vmul.f32 %v1340_v45, %v6114_v32 }
 0x42f   :  { %2765 = vtanh.f32 %v1326_v30  ;;  %v1344_v30 = vmul.f32 %v1340_v45, %v6116_v41 }
 0x430   :  { %v1347_v15 = vadd.f32 %v1343_v31, %v3734_v56 }
 0x431   :  { %v1348_v32 = vadd.f32 %v1344_v30, %v6067_v25 }
 0x436   :  { %v2760_v44 = vpop.eup %2759 }
 0x437   :  { %v2762_v17 = vpop.eup %2761  ;;  %v1319_v34 = vadd.f32 1.0, %v2760_v44  ;;  %v1346_v44 = vadd.f32 %v1342_v11, %v6115_v37 }
 0x438   :  { %v1323_v43 = vadd.f32 1.0, %v2762_v17  ;;  %v2764_v10 = vpop.eup %2763 }
 0x439   :  { %v1320_v9 = vmul.f32 0.5, %v1319_v34  ;;  %v2766_v13 = vpop.eup %2765 }
 0x43a   :  { %v1324_v12 = vmul.f32 0.5, %v1323_v43  ;;  %v1328_v3 = vadd.f32 1.0, %v2766_v13  ;;  %v1345_v13 = vmul.f32 %v1340_v45, %v6068_v61 }
 0x43b   :  { %v1331_v14 = vmul.f32 %v2764_v10, %v1320_v9 }
 0x43c   :  { %v1330_v8 = vmul.f32 %v1324_v12, %v4131_v20  ;;  %v1329_v9 = vmul.f32 0.5, %v1328_v3 }
 0x43e   :  { %v4599_v4 = vadd.f32 %v1331_v14, %v1330_v8 }
 0x440   :  { %6180 = vst [vmem:[#allocation75_spill] sm:$0xff] %v4599_v4  ;;  %2767 = vtanh.f32 %v4599_v4 }
 0x447   :  { %v1384_v34 = vpop.f32.mrb[24].mxu0  ;;  %v1425_v43 = vpop.f32.mrb[24].mxu1 }
 0x448   :  { %v1432_v20 = vadd.f32 %v1384_v34, %v1346_v44  ;;  %v1386_v16 = vpop.f32.mrb[25].mxu0  ;;  %v1427_v17 = vpop.f32.mrb[25].mxu1  ;;  %v1434_v7 = vadd.f32 %v1425_v43, %v1348_v32  ;;  %v1349_v44 = vadd.f32 %v1345_v13, %v3748_v1  ;;  %v6208_v13 = vld [vmem:[#allocation33_spill] sm:$0xff] }
 0x449   :  { %v1433_v10 = vadd.f32 %v1386_v16, %v1347_v15  ;;  %v1388_v12 = vpop.f32.mrb[26].mxu0  ;;  %v1429_v14 = vpop.f32.mrb[26].mxu1 }
 0x44a   :  { %v2768_v8 = vpop.eup %2767  ;;  %v1436_v57 = vmul.f32 0.5, %v1432_v20  ;;  %v1389_v11 = vpop.f32.mrb[27].mxu0  ;;  %v1435_v3 = vadd.f32 %v1427_v17, %v1349_v44  ;;  %v6206_v14 = vld [vmem:[#allocation31_spill] sm:$0xff]  ;;  %v6211_v44 = vld [vmem:[#allocation36_spill] sm:$0xff] }
 0x44b   :  { %v1430_v37 = vpop.f32.mrb[27].mxu1  ;;  %v1440_v41 = vmul.f32 0.5, %v1433_v10  ;;  %v1334_v4 = vmul.f32 %v2768_v8, %v1329_v9  ;;  %v6207_v8 = vld [vmem:[#allocation32_spill] sm:$0xff]  ;;  %v6209_v11 = vld [vmem:[#allocation34_spill] sm:$0xff] }
 0x44c   :  { %2769 = vtanh.f32 %v1436_v57  ;;  %v1445_v34 = vmul.f32 0.5, %v1435_v3  ;;  %v6212_v3 = vld [vmem:[#allocation37_spill] sm:$0xff] }
 0x44d   :  { %2771 = vtanh.f32 %v1440_v41  ;;  %v1455_v31 = vpack.c.bf16 %v1334_v4, %v1334_v4 }
 0x44e   :  { %2773 = vtanh.f32 %v1434_v7 }
 0x44f   :  { %1488 = vmatprep.mubr.bf16.mxu0 %v1455_v31  ;;  %1529 = vmatprep.mubr.bf16.mxu1 %v1455_v31  ;;  %2775 = vtanh.f32 %v1445_v34  ;;  %v6210_v31 = vld [vmem:[#allocation35_spill] sm:$0xff]  ;;  %v6213_v34 = vld [vmem:[#allocation38_spill] sm:$0xff] }
 0x456   :  { %v2770_v15 = vpop.eup %2769 }
 0x457   :  { %v2772_v20 = vpop.eup %2771  ;;  %v1438_v30 = vadd.f32 1.0, %v2770_v15  ;;  %v6214_v15 = vld [vmem:[#allocation39_spill] sm:$0xff] }
 0x458   :  { %v1442_v16 = vadd.f32 1.0, %v2772_v20  ;;  %v2774_v37 = vpop.eup %2773  ;;  %v6215_v20 = vld [vmem:[#allocation40_spill] sm:$0xff] }
 0x459   :  { %v1439_v45 = vmul.f32 0.5, %v1438_v30  ;;  %v2776_v41 = vpop.eup %2775  ;;  %v6216_v30 = vld [vmem:[#allocation41_spill] sm:$0xff] }
 0x45a   :  { %v1443_v10 = vmul.f32 0.5, %v1442_v16  ;;  %v1447_v4 = vadd.f32 1.0, %v2776_v41  ;;  %v6217_v16 = vld [vmem:[#allocation42_spill] sm:$0xff]  ;;  %v6223_v41 = vld [vmem:[#allocation48_spill] sm:$0xff] }
 0x45b   :  { %v1450_v9 = vmul.f32 %v2774_v37, %v1439_v45  ;;  %v6218_v45 = vld [vmem:[#allocation43_spill] sm:$0xff]  ;;  %v6219_v37 = vld [vmem:[#allocation44_spill] sm:$0xff] }
 0x45c   :  { %v1449_v57 = vmul.f32 %v1443_v10, %v4143_v6  ;;  %v1448_v7 = vmul.f32 0.5, %v1447_v4  ;;  %v6204_v6 = vld [vmem:[#allocation29_spill] sm:$0xff] }
 0x45d   :  { %v6220_v10 = vld [vmem:[#allocation45_spill] sm:$0xff] }
 0x45e   :  { %v4611_v32 = vadd.f32 %v1450_v9, %v1449_v57  ;;  %v6221_v9 = vld [vmem:[#allocation46_spill] sm:$0xff]  ;;  %v6222_v57 = vld [vmem:[#allocation47_spill] sm:$0xff]  ;;  %v6224_v4 = vld [vmem:[#allocation49_spill] sm:$0xff] }
 0x460   :  { %2777 = vtanh.f32 %v4611_v32 }
 0x46a   :  { %v2778_v43 = vpop.eup %2777 }
 0x46b   :  { %v1453_v17 = vmul.f32 %v2778_v43, %v1448_v7  ;;  %v6225_v7 = vld [vmem:[#allocation50_spill] sm:$0xff]  ;;  %v6226_v43 = vld [vmem:[#allocation51_spill] sm:$0xff] }
 0x46d   :  { %v1454_v12 = vpack.c.bf16 %v1453_v17, %v1453_v17  ;;  %v6227_v17 = vld [vmem:[#allocation52_spill] sm:$0xff] }
 0x46f   :  { %1489 = vmatmul.mubr.bf16.vlgmr.msra.gmra.mrb[28].mxu0 %v1454_v12  ;;  %1530 = vmatmul.mubr.bf16.vlgmr.msra.gmra.mrb[28].mxu1 %v1454_v12 }
 0x470   :  { %1572 = vmatpush1.bf16.msra.mxu0 %v3901_v51  ;;  %1613 = vmatpush1.bf16.msra.mxu1 %v3907_v47  ;;  %v6181_v51 = vld [vmem:[#allocation13_spill] sm:$0xff]  ;;  %v6182_v47 = vld [vmem:[#allocation14_spill] sm:$0xff] }
 0x471   :  { %1573 = vmatprep.subr.bf16.mxu0 %v3913_v50  ;;  %1614 = vmatprep.subr.bf16.mxu1 %v3919_v52  ;;  %v6183_v50 = vld [vmem:[#allocation15_spill] sm:$0xff]  ;;  %v6184_v52 = vld [vmem:[#allocation16_spill] sm:$0xff] }
 0x472   :  { %1603 = vmatprep.mubr.bf16.mxu0 %v5997_v53  ;;  %1644 = vmatprep.mubr.bf16.mxu1 %v5997_v53 }
 0x474   :  { %1574 = vmatpush1.bf16.msra.mxu0 %v3927_v62  ;;  %1615 = vmatpush1.bf16.msra.mxu1 %v3933_v60  ;;  %v6185_v62 = vld [vmem:[#allocation17_spill] sm:$0xff]  ;;  %v6186_v60 = vld [vmem:[#allocation18_spill] sm:$0xff] }
 0x475   :  { %1575 = vmatprep.subr.bf16.mxu0 %v3939_v29  ;;  %1616 = vmatprep.subr.bf16.mxu1 %v3945_v46  ;;  %v6187_v29 = vld [vmem:[#allocation19_spill] sm:$0xff]  ;;  %v6188_v46 = vld [vmem:[#allocation20_spill] sm:$0xff] }
 0x478   :  { %1576 = vmatpush1.bf16.msra.mxu0 %v3951_v38  ;;  %1617 = vmatpush1.bf16.msra.mxu1 %v3957_v48  ;;  %v6189_v38 = vld [vmem:[#allocation21_spill] sm:$0xff]  ;;  %v6190_v48 = vld [vmem:[#allocation22_spill] sm:$0xff] }
 0x479   :  { %1577 = vmatprep.subr.bf16.mxu0 %v3963_v0  ;;  %1618 = vmatprep.subr.bf16.mxu1 %v3969_v59  ;;  %v6191_v0 = vld [vmem:[#allocation23_spill] sm:$0xff] }
 0x47a   :  { %v6192_v59 = vld [vmem:[#allocation3_spill] sm:$0xff] }
 0x47c   :  { %1578 = vmatpush1.bf16.msra.mxu0 %v3975_v55  ;;  %1619 = vmatpush1.bf16.msra.mxu1 %v3981_v58  ;;  %v6193_v55 = vld [vmem:[#allocation4_spill] sm:$0xff] }
 0x47d   :  { %1579 = vmatprep.subr.bf16.mxu0 %v3987_v63  ;;  %1620 = vmatprep.subr.bf16.mxu1 %v3993_v54  ;;  %v6194_v58 = vld [vmem:[#allocation60_spill] sm:$0xff]  ;;  %v6195_v63 = vld [vmem:[#allocation61_spill] sm:$0xff]  ;;  %v6196_v54 = vld [vmem:[#allocation63_spill] sm:$0xff] }
 0x480   :  { %1580 = vmatpush1.bf16.msra.mxu0 %v3999_v26  ;;  %1621 = vmatpush1.bf16.msra.mxu1 %v4005_v49  ;;  %v6197_v26 = vld [vmem:[#allocation67_spill] sm:$0xff]  ;;  %v6198_v49 = vld [vmem:[#allocation68_spill] sm:$0xff] }
 0x481   :  { %1581 = vmatprep.subr.bf16.mxu0 %v4011_v23  ;;  %1622 = vmatprep.subr.bf16.mxu1 %v6117_v2  ;;  %v6199_v23 = vld [vmem:[#allocation24_spill] sm:$0xff]  ;;  %v6205_v2 = vld [vmem:[#allocation30_spill] sm:$0xff] }
 0x484   :  { %1582 = vmatpush1.bf16.msra.mxu0 %v4023_v22  ;;  %1623 = vmatpush1.bf16.msra.mxu1 %v4029_v27  ;;  %v6201_v22 = vld [vmem:[#allocation26_spill] sm:$0xff]  ;;  %v6202_v27 = vld [vmem:[#allocation27_spill] sm:$0xff] }
 0x485   :  { %1583 = vmatprep.subr.bf16.mxu0 %v4035_v35  ;;  %1624 = vmatprep.subr.bf16.mxu1 %v4041_v24  ;;  %v6200_v24 = vld [vmem:[#allocation25_spill] sm:$0xff]  ;;  %v6203_v35 = vld [vmem:[#allocation28_spill] sm:$0xff] }
 0x488   :  { %1584 = vmatpush1.bf16.msra.mxu0 %v4175_v18  ;;  %1625 = vmatpush1.bf16.msra.mxu1 %v4181_v19 }
 0x489   :  { %1585 = vmatprep.subr.bf16.mxu0 %v4187_v28  ;;  %1626 = vmatprep.subr.bf16.mxu1 %v4193_v33 }
 0x48c   :  { %1586 = vmatpush1.bf16.msra.mxu0 %v4199_v36  ;;  %1627 = vmatpush1.bf16.msra.mxu1 %v4205_v39 }
 0x48d   :  { %1677 = vmatprep.subr.bf16.mxu0 %v4211_v21  ;;  %1718 = vmatprep.subr.bf16.mxu1 %v4217_v42 }
 0x48f   :  { %1604 = vmatmul.mubr.bf16.vlgmr.msra.gmra.mrb[32].mxu0 %v1454_v12  ;;  %1645 = vmatmul.mubr.bf16.vlgmr.msra.gmra.mrb[32].mxu1 %v1454_v12  ;;  %v6228_v12 = vld [vmem:[#allocation53_spill] sm:$0xff] }
 0x490   :  { %1678 = vmatpush1.bf16.msra.mxu0 %v6181_v51  ;;  %1719 = vmatpush1.bf16.msra.mxu1 %v6182_v47 }
 0x491   :  { %1679 = vmatprep.subr.bf16.mxu0 %v6183_v50  ;;  %1720 = vmatprep.subr.bf16.mxu1 %v6184_v52 }
 0x494   :  { %1680 = vmatpush1.bf16.msra.mxu0 %v6185_v62  ;;  %1721 = vmatpush1.bf16.msra.mxu1 %v6186_v60 }
 0x495   :  { %1681 = vmatprep.subr.bf16.mxu0 %v6187_v29  ;;  %1722 = vmatprep.subr.bf16.mxu1 %v6188_v46 }
 0x498   :  { %1682 = vmatpush1.bf16.msra.mxu0 %v6189_v38  ;;  %1723 = vmatpush1.bf16.msra.mxu1 %v6190_v48 }
 0x499   :  { %1683 = vmatprep.subr.bf16.mxu0 %v6191_v0  ;;  %1724 = vmatprep.subr.bf16.mxu1 %v6192_v59 }
 0x49c   :  { %1684 = vmatpush1.bf16.msra.mxu0 %v6193_v55  ;;  %1725 = vmatpush1.bf16.msra.mxu1 %v6194_v58 }
 0x49d   :  { %1685 = vmatprep.subr.bf16.mxu0 %v6195_v63  ;;  %1726 = vmatprep.subr.bf16.mxu1 %v6196_v54 }
 0x4a0   :  { %1686 = vmatpush1.bf16.msra.mxu0 %v6197_v26  ;;  %1727 = vmatpush1.bf16.msra.mxu1 %v6198_v49 }
 0x4a1   :  { %1687 = vmatprep.subr.bf16.mxu0 %v6199_v23  ;;  %1728 = vmatprep.subr.bf16.mxu1 %v6200_v24 }
 0x4a4   :  { %1688 = vmatpush1.bf16.msra.mxu0 %v6201_v22  ;;  %1729 = vmatpush1.bf16.msra.mxu1 %v6202_v27 }
 0x4a5   :  { %1689 = vmatprep.subr.bf16.mxu0 %v6203_v35  ;;  %1730 = vmatprep.subr.bf16.mxu1 %v6204_v6 }
 0x4a8   :  { %1690 = vmatpush1.bf16.msra.mxu0 %v6205_v2  ;;  %1731 = vmatpush1.bf16.msra.mxu1 %v6206_v14 }
 0x4a9   :  { %1691 = vmatprep.subr.bf16.mxu0 %v6207_v8  ;;  %1732 = vmatprep.subr.bf16.mxu1 %v6208_v13 }
 0x4ac   :  { %1692 = vmatpush1.bf16.msra.mxu0 %v6209_v11  ;;  %1733 = vmatpush1.bf16.msra.mxu1 %v6210_v31 }
 0x4ad   :  { %1693 = vmatprep.subr.bf16.mxu0 %v6211_v44  ;;  %1734 = vmatprep.subr.bf16.mxu1 %v6212_v3 }
 0x4b0   :  { %1694 = vmatpush1.bf16.msra.mxu0 %v6213_v34  ;;  %1735 = vmatpush1.bf16.msra.mxu1 %v6214_v15 }
 0x4b1   :  { %1695 = vmatprep.subr.bf16.mxu0 %v6215_v20  ;;  %1736 = vmatprep.subr.bf16.mxu1 %v6216_v30 }
 0x4b4   :  { %1696 = vmatpush1.bf16.msra.mxu0 %v6217_v16  ;;  %1737 = vmatpush1.bf16.msra.mxu1 %v6218_v45  ;;  %v6229_v45 = vld [vmem:[#allocation54_spill] sm:$0xff]  ;;  %v6245_v16 = vld [vmem:[#allocation5_spill] sm:$0xff] }
 0x4b5   :  { %1697 = vmatprep.subr.bf16.mxu0 %v6219_v37  ;;  %1738 = vmatprep.subr.bf16.mxu1 %v6220_v10  ;;  %v6230_v37 = vld [vmem:[#allocation55_spill] sm:$0xff]  ;;  %v6231_v10 = vld [vmem:[#allocation56_spill] sm:$0xff] }
 0x4b8   :  { %1698 = vmatpush1.bf16.msra.mxu0 %v6221_v9  ;;  %1739 = vmatpush1.bf16.msra.mxu1 %v6222_v57  ;;  %v6232_v9 = vld [vmem:[#allocation57_spill] sm:$0xff]  ;;  %v6233_v57 = vld [vmem:[#allocation58_spill] sm:$0xff] }
 0x4b9   :  { %1699 = vmatprep.subr.bf16.mxu0 %v6223_v41  ;;  %1740 = vmatprep.subr.bf16.mxu1 %v6224_v4  ;;  %v6234_v41 = vld [vmem:[#allocation59_spill] sm:$0xff]  ;;  %v6235_v4 = vld [vmem:[#allocation9_spill] sm:$0xff] }
 0x4bc   :  { %1700 = vmatpush1.bf16.msra.mxu0 %v6225_v7  ;;  %1741 = vmatpush1.bf16.msra.mxu1 %v6226_v43  ;;  %v6236_v7 = vld [vmem:[#allocation10_spill] sm:$0xff]  ;;  %v6237_v43 = vld [vmem:[#allocation69_spill] sm:$0xff] }
 0x4bd   :  { %1701 = vmatprep.subr.bf16.mxu0 %v6227_v17  ;;  %1742 = vmatprep.subr.bf16.mxu1 %v6228_v12  ;;  %v6238_v17 = vld [vmem:[#allocation70_spill] sm:$0xff]  ;;  %v6239_v12 = vld [vmem:[#allocation71_spill] sm:$0xff] }
 0x4c0   :  { %1702 = vmatpush1.bf16.msra.mxu0 %v6229_v45  ;;  %1743 = vmatpush1.bf16.msra.mxu1 %v6230_v37  ;;  %v6240_v45 = vld [vmem:[#allocation72_spill] sm:$0xff]  ;;  %v6241_v37 = vld [vmem:[#allocation73_spill] sm:$0xff] }
 0x4c1   :  { %1703 = vmatprep.subr.bf16.mxu0 %v6231_v10  ;;  %1744 = vmatprep.subr.bf16.mxu1 %v6232_v9  ;;  %v6242_v10 = vld [vmem:[#allocation74_spill] sm:$0xff]  ;;  %v6243_v9 = vld [vmem:[#allocation11_spill] sm:$0xff] }
 0x4c4   :  { %1704 = vmatpush1.bf16.msra.mxu0 %v6233_v57  ;;  %1745 = vmatpush1.bf16.msra.mxu1 %v6234_v41  ;;  %v6244_v57 = vld [vmem:[#allocation12_spill] sm:$0xff] }
 0x4c5   :  { %1705 = vmatprep.subr.bf16.mxu0 %v6235_v4  ;;  %1746 = vmatprep.subr.bf16.mxu1 %v6236_v7 }
 0x4c8   :  { %1706 = vmatpush1.bf16.msra.mxu0 %v6237_v43  ;;  %1747 = vmatpush1.bf16.msra.mxu1 %v6238_v17 }
 0x4c9   :  { %1707 = vmatprep.subr.bf16.mxu0 %v6239_v12  ;;  %1748 = vmatprep.subr.bf16.mxu1 %v6240_v45 }
 0x4cc   :  { %1708 = vmatpush1.bf16.msra.mxu0 %v6241_v37  ;;  %1749 = vmatpush1.bf16.msra.mxu1 %v6242_v10 }
 0x4cd   :  { %1792 = vmatprep.subr.bf16.mxu0 %v6243_v9  ;;  %1833 = vmatprep.subr.bf16.mxu1 %v6244_v57  ;;  %v6246_v9 = vld [vmem:[#allocation8_spill] sm:$0xff] }
 0x542   :  { %v1490_v41 = vpop.f32.mrb[28].mxu0  ;;  %v1531_v4 = vpop.f32.mrb[28].mxu1 }
 0x543   :  { %v1491_v7 = vadd.f32 %v1490_v41, %v6245_v16  ;;  %v1492_v30 = vpop.f32.mrb[29].mxu0  ;;  %v1533_v43 = vpop.f32.mrb[29].mxu1  ;;  %v1532_v10 = vadd.f32 %v1531_v4, %v6110_v5 }
 0x544   :  { %v1493_v17 = vadd.f32 %v1492_v30, %v6109_v40  ;;  %v1494_v20 = vpop.f32.mrb[30].mxu0  ;;  %v1535_v12 = vpop.f32.mrb[30].mxu1  ;;  %v1534_v57 = vadd.f32 %v1533_v43, %v6246_v9  ;;  %v6250_v43 = vld [vmem:[#allocation64_spill] sm:$0xff] }
 0x545   :  { %v1538_v15 = vmul.f32 0.5, %v1491_v7  ;;  %v1495_v45 = vpop.f32.mrb[31].mxu0  ;;  %v1536_v34 = vpop.f32.mrb[31].mxu1 }
 0x546   :  { %v1542_v37 = vmul.f32 0.5, %v1493_v17  ;;  %v1547_v3 = vmul.f32 0.5, %v1534_v57  ;;  %v6247_v45 = vld [vmem:[#allocation75_spill] sm:$0xff] }
 0x547   :  { %2779 = vtanh.f32 %v1538_v15  ;;  %v1561_v15 = vpop.permute.xlu0 %1560 }
 0x548   :  { %2781 = vtanh.f32 %v1542_v37  ;;  %v1564_v57 = vmul.f32 %v1561_v15, %v6250_v43 }
 0x549   :  { %2783 = vtanh.f32 %v1532_v10  ;;  %v6249_v10 = vld [vmem:[#allocation62_spill] sm:$0xff] }
 0x54a   :  { %2785 = vtanh.f32 %v1547_v3  ;;  %v1563_v4 = vmul.f32 %v1561_v15, %v6249_v10  ;;  %v6252_v3 = vld [vmem:[#allocation66_spill] sm:$0xff] }
 0x551   :  { %v2780_v44 = vpop.eup %2779 }
 0x552   :  { %v2782_v41 = vpop.eup %2781  ;;  %v1540_v16 = vadd.f32 1.0, %v2780_v44  ;;  %v6251_v44 = vld [vmem:[#allocation65_spill] sm:$0xff] }
 0x553   :  { %v1544_v31 = vadd.f32 1.0, %v2782_v41  ;;  %v2784_v20 = vpop.eup %2783  ;;  %v1567_v41 = vadd.f32 %v1563_v4, %v6251_v44 }
 0x554   :  { %v1541_v30 = vmul.f32 0.5, %v1540_v16  ;;  %v2786_v37 = vpop.eup %2785  ;;  %v1565_v16 = vmul.f32 %v1561_v15, %v6252_v3 }
 0x555   :  { %v1545_v12 = vmul.f32 0.5, %v1544_v31  ;;  %v1549_v9 = vadd.f32 1.0, %v2786_v37  ;;  %v1566_v37 = vmul.f32 %v1561_v15, %v6068_v61 }
 0x556   :  { %v1552_v7 = vmul.f32 %v2784_v20, %v1541_v30  ;;  %v1568_v30 = vadd.f32 %v1564_v57, %v3734_v56  ;;  %v1569_v43 = vadd.f32 %v1565_v16, %v6067_v25 }
 0x557   :  { %v1551_v34 = vmul.f32 %v1545_v12, %v6247_v45  ;;  %v1550_v45 = vmul.f32 0.5, %v1549_v9  ;;  %v1570_v57 = vadd.f32 %v1566_v37, %v3748_v1  ;;  %v4753_v37 = vld [vmem:[%s5575_s2 + $0x2c] ss:$16 sps:$4 sm:$0xff]  }
 0x559   :  { %v4717_v17 = vadd.f32 %v1552_v7, %v1551_v34 }
 0x55b   :  { %6248 = vst [vmem:[#allocation13_spill] sm:$0xff] %v4717_v17  ;;  %2787 = vtanh.f32 %v4717_v17 }
 0x562   :  { %v1605_v5 = vpop.f32.mrb[32].mxu0  ;;  %v1646_v31 = vpop.f32.mrb[32].mxu1 }
 0x563   :  { %v1653_v20 = vadd.f32 %v1605_v5, %v1567_v41  ;;  %v1607_v12 = vpop.f32.mrb[33].mxu0  ;;  %v1648_v7 = vpop.f32.mrb[33].mxu1  ;;  %v1655_v8 = vadd.f32 %v1646_v31, %v1569_v43 }
 0x564   :  { %v1654_v34 = vadd.f32 %v1607_v12, %v1568_v30  ;;  %v1609_v17 = vpop.f32.mrb[34].mxu0  ;;  %v1650_v40 = vpop.f32.mrb[34].mxu1 }
 0x565   :  { %v2788_v11 = vpop.eup %2787  ;;  %v1657_v10 = vmul.f32 0.5, %v1653_v20  ;;  %v1610_v4 = vpop.f32.mrb[35].mxu0  ;;  %v1656_v40 = vadd.f32 %v1648_v7, %v1570_v57  ;;  %v4773_v57 = vld [vmem:[%s5575_s2 + $0x44] ss:$16 sps:$4 sm:$0xff]  }
 0x566   :  { %v1651_v44 = vpop.f32.mrb[35].mxu1  ;;  %v1661_v3 = vmul.f32 0.5, %v1654_v34  ;;  %v1555_v13 = vmul.f32 %v2788_v11, %v1550_v45  ;;  %v4735_v45 = vld [vmem:[%s5575_s2] ss:$16 sps:$4 sm:$0xff]   ;;  %v4747_v34 = vld [vmem:[%s5575_s2 + $0x24] ss:$16 sps:$4 sm:$0xff]  }
 0x567   :  { %2789 = vtanh.f32 %v1657_v10  ;;  %v1666_v9 = vmul.f32 0.5, %v1656_v40  ;;  %v4761_v4 = vld [vmem:[%s5575_s2 + $0x20] ss:$16 sps:$4 sm:$0xff]   ;;  %v4779_v40 = vld [vmem:[%s5575_s2 + $0x4c] ss:$16 sps:$4 sm:$0xff]  }
 0x568   :  { %2791 = vtanh.f32 %v1661_v3  ;;  %v1676_v5 = vpack.c.bf16 %v1555_v13, %v1555_v13 }
 0x569   :  { %2793 = vtanh.f32 %v1655_v8 }
 0x56a   :  { %1709 = vmatprep.mubr.bf16.mxu0 %v1676_v5  ;;  %1750 = vmatprep.mubr.bf16.mxu1 %v1676_v5  ;;  %2795 = vtanh.f32 %v1666_v9  ;;  %v4767_v5 = vld [vmem:[%s5575_s2 + $0x28] ss:$16 sps:$4 sm:$0xff]   ;;  %v4785_v9 = vld [vmem:[%s5575_s2 + $0x40] ss:$16 sps:$4 sm:$0xff]  }
 0x571   :  { %v2790_v17 = vpop.eup %2789 }
 0x572   :  { %v2792_v41 = vpop.eup %2791  ;;  %v1659_v16 = vadd.f32 1.0, %v2790_v17  ;;  %v4791_v17 = vld [vmem:[%s5575_s2 + $0x48] ss:$16 sps:$4 sm:$0xff]  }
 0x573   :  { %v1663_v30 = vadd.f32 1.0, %v2792_v41  ;;  %v2794_v44 = vpop.eup %2793  ;;  %v4797_v41 = vld [vmem:[%s5575_s2 + $0x64] ss:$16 sps:$4 sm:$0xff]  }
 0x574   :  { %v1660_v15 = vmul.f32 0.5, %v1659_v16  ;;  %v2796_v13 = vpop.eup %2795  ;;  %v4803_v16 = vld [vmem:[%s5575_s2 + $0x6c] ss:$16 sps:$4 sm:$0xff]  }
 0x575   :  { %v1664_v20 = vmul.f32 0.5, %v1663_v30  ;;  %v1668_v3 = vadd.f32 1.0, %v2796_v13  ;;  %v4809_v30 = vld [vmem:[%s5575_s2 + $0x60] ss:$16 sps:$4 sm:$0xff]   ;;  %v4845_v13 = vld [vmem:[%s5575_s2 + $0xa4] ss:$16 sps:$4 sm:$0xff]  }
 0x576   :  { %v1671_v11 = vmul.f32 %v2794_v44, %v1660_v15  ;;  %v4815_v15 = vld [vmem:[%s5575_s2 + $0x68] ss:$16 sps:$4 sm:$0xff]   ;;  %v4821_v44 = vld [vmem:[%s5575_s2 + $0x84] ss:$16 sps:$4 sm:$0xff]  }
 0x577   :  { %v1670_v10 = vmul.f32 %v1664_v20, %v4611_v32  ;;  %v1669_v8 = vmul.f32 0.5, %v1668_v3  ;;  %v4741_v32 = vld [vmem:[%s5575_s2 + $0x8] ss:$16 sps:$4 sm:$0xff]   ;;  %v4827_v20 = vld [vmem:[%s5575_s2 + $0x8c] ss:$16 sps:$4 sm:$0xff]  }
 0x578   :  { %v4851_v3 = vld [vmem:[%s5575_s2 + $0xac] ss:$16 sps:$4 sm:$0xff]  }
 0x579   :  { %v4729_v43 = vadd.f32 %v1671_v11, %v1670_v10  ;;  %v4833_v11 = vld [vmem:[%s5575_s2 + $0x80] ss:$16 sps:$4 sm:$0xff]   ;;  %v4839_v10 = vld [vmem:[%s5575_s2 + $0x88] ss:$16 sps:$4 sm:$0xff]   ;;  %6253 = vst [vmem:[#allocation14_spill] sm:$0xff] %v4851_v3 }
 0x57b   :  { %2797 = vtanh.f32 %v4729_v43 }
 0x585   :  { %v2798_v31 = vpop.eup %2797 }
 0x586   :  { %v1674_v12 = vmul.f32 %v2798_v31, %v1669_v8  ;;  %v4857_v8 = vld [vmem:[%s5575_s2 + $0xa0] ss:$16 sps:$4 sm:$0xff]   ;;  %v4863_v31 = vld [vmem:[%s5575_s2 + $0xa8] ss:$16 sps:$4 sm:$0xff]  }
 0x588   :  { %v1675_v7 = vpack.c.bf16 %v1674_v12, %v1674_v12  ;;  %v4869_v12 = vld [vmem:[%s5575_s2 + $0xc4] ss:$16 sps:$4 sm:$0xff]  }
 0x58a   :  { %1710 = vmatmul.mubr.bf16.vlgmr.msra.gmra.mrb[36].mxu0 %v1675_v7  ;;  %1751 = vmatmul.mubr.bf16.vlgmr.msra.gmra.mrb[36].mxu1 %v1675_v7 }
 0x58b   :  { %1793 = vmatpush1.bf16.msra.mxu0 %v4735_v45  ;;  %1834 = vmatpush1.bf16.msra.mxu1 %v4741_v32 }
 0x58c   :  { %1794 = vmatprep.subr.bf16.mxu0 %v4747_v34  ;;  %1835 = vmatprep.subr.bf16.mxu1 %v4753_v37 }
 0x58d   :  { %1824 = vmatprep.mubr.bf16.mxu0 %v5997_v53  ;;  %1865 = vmatprep.mubr.bf16.mxu1 %v5997_v53 }
 0x58f   :  { %1795 = vmatpush1.bf16.msra.mxu0 %v4761_v4  ;;  %1836 = vmatpush1.bf16.msra.mxu1 %v4767_v5 }
 0x590   :  { %1796 = vmatprep.subr.bf16.mxu0 %v4773_v57  ;;  %1837 = vmatprep.subr.bf16.mxu1 %v4779_v40 }
 0x593   :  { %1797 = vmatpush1.bf16.msra.mxu0 %v4785_v9  ;;  %1838 = vmatpush1.bf16.msra.mxu1 %v4791_v17 }
 0x594   :  { %1798 = vmatprep.subr.bf16.mxu0 %v4797_v41  ;;  %1839 = vmatprep.subr.bf16.mxu1 %v4803_v16 }
 0x597   :  { %1799 = vmatpush1.bf16.msra.mxu0 %v4809_v30  ;;  %1840 = vmatpush1.bf16.msra.mxu1 %v4815_v15 }
 0x598   :  { %1800 = vmatprep.subr.bf16.mxu0 %v4821_v44  ;;  %1841 = vmatprep.subr.bf16.mxu1 %v4827_v20 }
 0x59b   :  { %1801 = vmatpush1.bf16.msra.mxu0 %v4833_v11  ;;  %1842 = vmatpush1.bf16.msra.mxu1 %v4839_v10 }
 0x59c   :  { %1802 = vmatprep.subr.bf16.mxu0 %v4845_v13  ;;  %1843 = vmatprep.subr.bf16.mxu1 %v4851_v3  ;;  %v4875_v3 = vld [vmem:[%s5575_s2 + $0xcc] ss:$16 sps:$4 sm:$0xff]  }
 0x59f   :  { %1803 = vmatpush1.bf16.msra.mxu0 %v4857_v8  ;;  %1844 = vmatpush1.bf16.msra.mxu1 %v4863_v31 }
 0x5a0   :  { %1804 = vmatprep.subr.bf16.mxu0 %v4869_v12  ;;  %1845 = vmatprep.subr.bf16.mxu1 %v4875_v3 }
 0x5a3   :  { %1805 = vmatpush1.bf16.msra.mxu0 %v4175_v18  ;;  %1846 = vmatpush1.bf16.msra.mxu1 %v4181_v19  ;;  %v6254_v18 = vld [vmem:[#allocation32_spill] sm:$0xff]  ;;  %v6255_v19 = vld [vmem:[#allocation33_spill] sm:$0xff] }
 0x5a4   :  { %1806 = vmatprep.subr.bf16.mxu0 %v4187_v28  ;;  %1847 = vmatprep.subr.bf16.mxu1 %v4193_v33  ;;  %v6256_v28 = vld [vmem:[#allocation34_spill] sm:$0xff]  ;;  %v6257_v33 = vld [vmem:[#allocation35_spill] sm:$0xff] }
 0x5a7   :  { %1807 = vmatpush1.bf16.msra.mxu0 %v4199_v36  ;;  %1848 = vmatpush1.bf16.msra.mxu1 %v4205_v39  ;;  %v6258_v36 = vld [vmem:[#allocation36_spill] sm:$0xff]  ;;  %v6259_v39 = vld [vmem:[#allocation37_spill] sm:$0xff] }
 0x5a8   :  { %1898 = vmatprep.subr.bf16.mxu0 %v4211_v21  ;;  %1939 = vmatprep.subr.bf16.mxu1 %v4217_v42  ;;  %v6260_v21 = vld [vmem:[#allocation38_spill] sm:$0xff]  ;;  %v6261_v42 = vld [vmem:[#allocation39_spill] sm:$0xff] }
 0x5aa   :  { %1825 = vmatmul.mubr.bf16.vlgmr.msra.gmra.mrb[40].mxu0 %v1675_v7  ;;  %1866 = vmatmul.mubr.bf16.vlgmr.msra.gmra.mrb[40].mxu1 %v1675_v7  ;;  %v6288_v7 = vld [vmem:[#allocation73_spill] sm:$0xff] }
 0x5ab   :  { %1899 = vmatpush1.bf16.msra.mxu0 %v6181_v51  ;;  %1940 = vmatpush1.bf16.msra.mxu1 %v6182_v47  ;;  %v6262_v51 = vld [vmem:[#allocation40_spill] sm:$0xff]  ;;  %v6263_v47 = vld [vmem:[#allocation41_spill] sm:$0xff] }
 0x5ac   :  { %1900 = vmatprep.subr.bf16.mxu0 %v6183_v50  ;;  %1941 = vmatprep.subr.bf16.mxu1 %v6184_v52  ;;  %v6264_v50 = vld [vmem:[#allocation42_spill] sm:$0xff]  ;;  %v6265_v52 = vld [vmem:[#allocation43_spill] sm:$0xff] }
 0x5af   :  { %1901 = vmatpush1.bf16.msra.mxu0 %v6185_v62  ;;  %1942 = vmatpush1.bf16.msra.mxu1 %v6186_v60  ;;  %v6266_v62 = vld [vmem:[#allocation44_spill] sm:$0xff]  ;;  %v6267_v60 = vld [vmem:[#allocation45_spill] sm:$0xff] }
 0x5b0   :  { %1902 = vmatprep.subr.bf16.mxu0 %v6187_v29  ;;  %1943 = vmatprep.subr.bf16.mxu1 %v6188_v46  ;;  %v6268_v29 = vld [vmem:[#allocation46_spill] sm:$0xff]  ;;  %v6269_v46 = vld [vmem:[#allocation47_spill] sm:$0xff] }
 0x5b3   :  { %1903 = vmatpush1.bf16.msra.mxu0 %v6189_v38  ;;  %1944 = vmatpush1.bf16.msra.mxu1 %v6190_v48  ;;  %v6270_v38 = vld [vmem:[#allocation48_spill] sm:$0xff]  ;;  %v6271_v48 = vld [vmem:[#allocation49_spill] sm:$0xff] }
 0x5b4   :  { %1904 = vmatprep.subr.bf16.mxu0 %v6191_v0  ;;  %1945 = vmatprep.subr.bf16.mxu1 %v6192_v59  ;;  %v6272_v0 = vld [vmem:[#allocation50_spill] sm:$0xff]  ;;  %v6273_v59 = vld [vmem:[#allocation51_spill] sm:$0xff] }
 0x5b7   :  { %1905 = vmatpush1.bf16.msra.mxu0 %v6193_v55  ;;  %1946 = vmatpush1.bf16.msra.mxu1 %v6194_v58  ;;  %v6274_v55 = vld [vmem:[#allocation52_spill] sm:$0xff]  ;;  %v6275_v58 = vld [vmem:[#allocation53_spill] sm:$0xff] }
 0x5b8   :  { %1906 = vmatprep.subr.bf16.mxu0 %v6195_v63  ;;  %1947 = vmatprep.subr.bf16.mxu1 %v6196_v54  ;;  %v6276_v63 = vld [vmem:[#allocation54_spill] sm:$0xff]  ;;  %v6277_v54 = vld [vmem:[#allocation55_spill] sm:$0xff] }
 0x5bb   :  { %1907 = vmatpush1.bf16.msra.mxu0 %v6197_v26  ;;  %1948 = vmatpush1.bf16.msra.mxu1 %v6198_v49  ;;  %v6278_v26 = vld [vmem:[#allocation56_spill] sm:$0xff]  ;;  %v6279_v49 = vld [vmem:[#allocation57_spill] sm:$0xff] }
 0x5bc   :  { %1908 = vmatprep.subr.bf16.mxu0 %v6199_v23  ;;  %1949 = vmatprep.subr.bf16.mxu1 %v6200_v24  ;;  %v6280_v23 = vld [vmem:[#allocation58_spill] sm:$0xff]  ;;  %v6281_v24 = vld [vmem:[#allocation59_spill] sm:$0xff] }
 0x5bf   :  { %1909 = vmatpush1.bf16.msra.mxu0 %v6201_v22  ;;  %1950 = vmatpush1.bf16.msra.mxu1 %v6202_v27  ;;  %v6282_v22 = vld [vmem:[#allocation9_spill] sm:$0xff]  ;;  %v6283_v27 = vld [vmem:[#allocation10_spill] sm:$0xff] }
 0x5c0   :  { %1910 = vmatprep.subr.bf16.mxu0 %v6203_v35  ;;  %1951 = vmatprep.subr.bf16.mxu1 %v6204_v6  ;;  %v6284_v35 = vld [vmem:[#allocation69_spill] sm:$0xff]  ;;  %v6285_v6 = vld [vmem:[#allocation70_spill] sm:$0xff] }
 0x5c3   :  { %1911 = vmatpush1.bf16.msra.mxu0 %v6205_v2  ;;  %1952 = vmatpush1.bf16.msra.mxu1 %v6206_v14  ;;  %v6286_v2 = vld [vmem:[#allocation71_spill] sm:$0xff]  ;;  %v6287_v14 = vld [vmem:[#allocation72_spill] sm:$0xff] }
 0x5c4   :  { %1912 = vmatprep.subr.bf16.mxu0 %v6254_v18  ;;  %1953 = vmatprep.subr.bf16.mxu1 %v6255_v19  ;;  %v6289_v18 = vld [vmem:[#allocation74_spill] sm:$0xff]  ;;  %v4951_v19 = vld [vmem:[%s5575_s2 + $0x4] ss:$16 sps:$4 sm:$0xff]  }
 0x5c7   :  { %1913 = vmatpush1.bf16.msra.mxu0 %v6256_v28  ;;  %1954 = vmatpush1.bf16.msra.mxu1 %v6257_v33  ;;  %v4957_v28 = vld [vmem:[%s5575_s2 + $0xc] ss:$16 sps:$4 sm:$0xff]  }
 0x5c8   :  { %1914 = vmatprep.subr.bf16.mxu0 %v6258_v36  ;;  %1955 = vmatprep.subr.bf16.mxu1 %v6259_v39  ;;  %v6290_v39 = vld [vmem:[#allocation5_spill] sm:$0xff] }
 0x5cb   :  { %1915 = vmatpush1.bf16.msra.mxu0 %v6260_v21  ;;  %1956 = vmatpush1.bf16.msra.mxu1 %v6261_v42 }
 0x5cc   :  { %1916 = vmatprep.subr.bf16.mxu0 %v6262_v51  ;;  %1957 = vmatprep.subr.bf16.mxu1 %v6263_v47  ;;  %v6291_v47 = vld [vmem:[#allocation6_spill] sm:$0xff] }
 0x5cf   :  { %1917 = vmatpush1.bf16.msra.mxu0 %v6264_v50  ;;  %1958 = vmatpush1.bf16.msra.mxu1 %v6265_v52 }
 0x5d0   :  { %1918 = vmatprep.subr.bf16.mxu0 %v6266_v62  ;;  %1959 = vmatprep.subr.bf16.mxu1 %v6267_v60 }
 0x5d3   :  { %1919 = vmatpush1.bf16.msra.mxu0 %v6268_v29  ;;  %1960 = vmatpush1.bf16.msra.mxu1 %v6269_v46 }
 0x5d4   :  { %1920 = vmatprep.subr.bf16.mxu0 %v6270_v38  ;;  %1961 = vmatprep.subr.bf16.mxu1 %v6271_v48  ;;  %v6292_v48 = vld [vmem:[#allocation7_spill] sm:$0xff] }
 0x5d7   :  { %1921 = vmatpush1.bf16.msra.mxu0 %v6272_v0  ;;  %1962 = vmatpush1.bf16.msra.mxu1 %v6273_v59  ;;  %v6293_v59 = vld [vmem:[#allocation8_spill] sm:$0xff] }
 0x5d8   :  { %1922 = vmatprep.subr.bf16.mxu0 %v6274_v55  ;;  %1963 = vmatprep.subr.bf16.mxu1 %v6275_v58 }
 0x5db   :  { %1923 = vmatpush1.bf16.msra.mxu0 %v6276_v63  ;;  %1964 = vmatpush1.bf16.msra.mxu1 %v6277_v54 }
 0x5dc   :  { %1924 = vmatprep.subr.bf16.mxu0 %v6278_v26  ;;  %1965 = vmatprep.subr.bf16.mxu1 %v6279_v49 }
 0x5df   :  { %1925 = vmatpush1.bf16.msra.mxu0 %v6280_v23  ;;  %1966 = vmatpush1.bf16.msra.mxu1 %v6281_v24 }
 0x5e0   :  { %1926 = vmatprep.subr.bf16.mxu0 %v6282_v22  ;;  %1967 = vmatprep.subr.bf16.mxu1 %v6283_v27 }
 0x5e3   :  { %1927 = vmatpush1.bf16.msra.mxu0 %v6284_v35  ;;  %1968 = vmatpush1.bf16.msra.mxu1 %v6285_v6  ;;  %v6294_v35 = vld [vmem:[#allocation13_spill] sm:$0xff] }
 0x5e4   :  { %1928 = vmatprep.subr.bf16.mxu0 %v6286_v2  ;;  %1969 = vmatprep.subr.bf16.mxu1 %v6287_v14  ;;  %v1782_v14 = vpop.permute.xlu1 %1781 }
 0x5e7   :  { %1929 = vmatpush1.bf16.msra.mxu0 %v6288_v7  ;;  %1970 = vmatpush1.bf16.msra.mxu1 %v6289_v18  ;;  %v6295_v18 = vld [vmem:[#allocation62_spill] sm:$0xff] }
 0x5e8   :  { %2013 = vmatprep.subr.bf16.mxu0 %v4951_v19  ;;  %2054 = vmatprep.subr.bf16.mxu1 %v4957_v28 }
 0x65d   :  { %v1711_v33 = vpop.f32.mrb[36].mxu0  ;;  %v1752_v36 = vpop.f32.mrb[36].mxu1 }
 0x65e   :  { %v1712_v21 = vadd.f32 %v1711_v33, %v6290_v39  ;;  %v1713_v42 = vpop.f32.mrb[37].mxu0  ;;  %v1754_v51 = vpop.f32.mrb[37].mxu1  ;;  %v1753_v0 = vadd.f32 %v1752_v36, %v6292_v48  ;;  %v1784_v33 = vmul.f32 %v1782_v14, %v6295_v18  ;;  %v6296_v36 = vld [vmem:[#allocation64_spill] sm:$0xff] }
 0x65f   :  { %v1714_v50 = vadd.f32 %v1713_v42, %v6291_v47  ;;  %v1715_v52 = vpop.f32.mrb[38].mxu0  ;;  %v1756_v62 = vpop.f32.mrb[38].mxu1  ;;  %v1755_v55 = vadd.f32 %v1754_v51, %v6293_v59  ;;  %v6297_v51 = vld [vmem:[#allocation65_spill] sm:$0xff] }
 0x660   :  { %v1759_v60 = vmul.f32 0.5, %v1712_v21  ;;  %v1716_v29 = vpop.f32.mrb[39].mxu0  ;;  %v1757_v46 = vpop.f32.mrb[39].mxu1  ;;  %v1785_v21 = vmul.f32 %v1782_v14, %v6296_v36  ;;  %v6298_v52 = vld [vmem:[#allocation66_spill] sm:$0xff] }
 0x661   :  { %v1763_v38 = vmul.f32 0.5, %v1714_v50  ;;  %v1768_v58 = vmul.f32 0.5, %v1755_v55  ;;  %v1788_v50 = vadd.f32 %v1784_v33, %v6297_v51  ;;  %v1786_v62 = vmul.f32 %v1782_v14, %v6298_v52 }
 0x662   :  { %2799 = vtanh.f32 %v1759_v60  ;;  %v1789_v46 = vadd.f32 %v1785_v21, %v3734_v56 }
 0x663   :  { %2801 = vtanh.f32 %v1763_v38 }
 0x664   :  { %2803 = vtanh.f32 %v1753_v0 }
 0x665   :  { %2805 = vtanh.f32 %v1768_v58 }
 0x66c   :  { %v2800_v63 = vpop.eup %2799 }
 0x66d   :  { %v2802_v54 = vpop.eup %2801  ;;  %v1761_v26 = vadd.f32 1.0, %v2800_v63 }
 0x66e   :  { %v1765_v49 = vadd.f32 1.0, %v2802_v54  ;;  %v2804_v24 = vpop.eup %2803 }
 0x66f   :  { %v1762_v23 = vmul.f32 0.5, %v1761_v26  ;;  %v2806_v7 = vpop.eup %2805 }
 0x670   :  { %v1766_v22 = vmul.f32 0.5, %v1765_v49  ;;  %v1770_v42 = vadd.f32 1.0, %v2806_v7 }
 0x671   :  { %v1773_v27 = vmul.f32 %v2804_v24, %v1762_v23  ;;  %v1790_v24 = vadd.f32 %v1786_v62, %v6067_v25 }
 0x672   :  { %v1772_v6 = vmul.f32 %v1766_v22, %v6294_v35  ;;  %v1771_v58 = vmul.f32 0.5, %v1770_v42  ;;  %v1787_v22 = vmul.f32 %v1782_v14, %v6068_v61 }
 0x674   :  { %v4965_v2 = vadd.f32 %v1773_v27, %v1772_v6 }
 0x676   :  { %2807 = vtanh.f32 %v4965_v2 }
 0x67d   :  { %v1826_v60 = vpop.f32.mrb[40].mxu0  ;;  %v1867_v29 = vpop.f32.mrb[40].mxu1 }
 0x67e   :  { %v1874_v38 = vadd.f32 %v1826_v60, %v1788_v50  ;;  %v1828_v0 = vpop.f32.mrb[41].mxu0  ;;  %v1869_v55 = vpop.f32.mrb[41].mxu1  ;;  %v1876_v33 = vadd.f32 %v1867_v29, %v1790_v24  ;;  %v1791_v50 = vadd.f32 %v1787_v22, %v3748_v1 }
 0x67f   :  { %v1875_v63 = vadd.f32 %v1828_v0, %v1789_v46  ;;  %v1830_v54 = vpop.f32.mrb[42].mxu0  ;;  %v1871_v26 = vpop.f32.mrb[42].mxu1 }
 0x680   :  { %v2808_v49 = vpop.eup %2807  ;;  %v1878_v23 = vmul.f32 0.5, %v1874_v38  ;;  %v1831_v27 = vpop.f32.mrb[43].mxu0  ;;  %v1877_v42 = vadd.f32 %v1869_v55, %v1791_v50  ;;  %v5039_v50 = vld [vmem:[%s5575_s2 + $0xe8] ss:$16 sps:$4 sm:$0xff]  }
 0x681   :  { %v1872_v35 = vpop.f32.mrb[43].mxu1  ;;  %v1882_v6 = vmul.f32 0.5, %v1875_v63  ;;  %v1776_v7 = vmul.f32 %v2808_v49, %v1771_v58 }
 0x682   :  { %2809 = vtanh.f32 %v1878_v23  ;;  %v1887_v60 = vmul.f32 0.5, %v1877_v42  ;;  %v5009_v35 = vld [vmem:[%s5575_s2 + $0xc0] ss:$16 sps:$4 sm:$0xff]   ;;  %v5045_v42 = vld [vmem:[%s5577_s4 + $0x4] ss:$16 sps:$4 sm:$0xff]  }
 0x683   :  { %2811 = vtanh.f32 %v1882_v6  ;;  %v1897_v21 = vpack.c.bf16 %v1776_v7, %v1776_v7  ;;  %v5015_v6 = vld [vmem:[%s5575_s2 + $0xc8] ss:$16 sps:$4 sm:$0xff]   ;;  %v5021_v7 = vld [vmem:[%s5575_s2 + $0xe4] ss:$16 sps:$4 sm:$0xff]  }
 0x684   :  { %2813 = vtanh.f32 %v1876_v33  ;;  %v5027_v33 = vld [vmem:[%s5575_s2 + $0xec] ss:$16 sps:$4 sm:$0xff]  }
 0x685   :  { %1930 = vmatprep.mubr.bf16.mxu0 %v1897_v21  ;;  %1971 = vmatprep.mubr.bf16.mxu1 %v1897_v21  ;;  %2815 = vtanh.f32 %v1887_v60  ;;  %v5033_v21 = vld [vmem:[%s5575_s2 + $0xe0] ss:$16 sps:$4 sm:$0xff]   ;;  %v5051_v60 = vld [vmem:[%s5577_s4 + $0xc] ss:$16 sps:$4 sm:$0xff]  }
 0x68c   :  { %v2810_v46 = vpop.eup %2809 }
 0x68d   :  { %v2812_v38 = vpop.eup %2811  ;;  %v1880_v62 = vadd.f32 1.0, %v2810_v46  ;;  %v5057_v46 = vld [vmem:[%s5577_s4] ss:$16 sps:$4 sm:$0xff]  }
 0x68e   :  { %v1884_v0 = vadd.f32 1.0, %v2812_v38  ;;  %v2814_v54 = vpop.eup %2813  ;;  %6300 = vst [vmem:[#allocation15_spill] sm:$0xff] %v5057_v46  ;;  %v5063_v38 = vld [vmem:[%s5577_s4 + $0x8] ss:$16 sps:$4 sm:$0xff]  }
 0x68f   :  { %v1881_v14 = vmul.f32 0.5, %v1880_v62  ;;  %v2816_v49 = vpop.eup %2815  ;;  %6301 = vst [vmem:[#allocation16_spill] sm:$0xff] %v5063_v38  ;;  %v5069_v62 = vld [vmem:[%s5577_s4 + $0x24] ss:$16 sps:$4 sm:$0xff]  }
 0x690   :  { %v1885_v63 = vmul.f32 0.5, %v1884_v0  ;;  %v1889_v23 = vadd.f32 1.0, %v2816_v49  ;;  %6302 = vst [vmem:[#allocation17_spill] sm:$0xff] %v5069_v62  ;;  %v5075_v0 = vld [vmem:[%s5577_s4 + $0x2c] ss:$16 sps:$4 sm:$0xff]  }
 0x691   :  { %v1892_v58 = vmul.f32 %v2814_v54, %v1881_v14  ;;  %6303 = vst [vmem:[#allocation18_spill] sm:$0xff] %v5075_v0  ;;  %v5081_v14 = vld [vmem:[%s5577_s4 + $0x20] ss:$16 sps:$4 sm:$0xff]   ;;  %v5087_v54 = vld [vmem:[%s5577_s4 + $0x28] ss:$16 sps:$4 sm:$0xff]  }
 0x692   :  { %v1891_v29 = vmul.f32 %v1885_v63, %v4729_v43  ;;  %v1890_v24 = vmul.f32 0.5, %v1889_v23  ;;  %v6299_v43 = vld [vmem:[#allocation14_spill] sm:$0xff]  ;;  %6304 = vst [vmem:[#allocation19_spill] sm:$0xff] %v5081_v14  ;;  %6305 = vst [vmem:[#allocation20_spill] sm:$0xff] %v5087_v54  ;;  %v5093_v63 = vld [vmem:[%s5577_s4 + $0x44] ss:$16 sps:$4 sm:$0xff]  }
 0x693   :  { %6306 = vst [vmem:[#allocation21_spill] sm:$0xff] %v5093_v63  ;;  %v5111_v49 = vld [vmem:[%s5577_s4 + $0x48] ss:$16 sps:$4 sm:$0xff]   ;;  %v5117_v23 = vld [vmem:[%s5577_s4 + $0x64] ss:$16 sps:$4 sm:$0xff]  }
 0x694   :  { %v4977_v26 = vadd.f32 %v1892_v58, %v1891_v29  ;;  %v5099_v58 = vld [vmem:[%s5577_s4 + $0x4c] ss:$16 sps:$4 sm:$0xff]   ;;  %v5105_v29 = vld [vmem:[%s5577_s4 + $0x40] ss:$16 sps:$4 sm:$0xff]   ;;  %6309 = vst [vmem:[#allocation3_spill] sm:$0xff] %v5111_v49  ;;  %6310 = vst [vmem:[#allocation4_spill] sm:$0xff] %v5117_v23 }
 0x695   :  { %6307 = vst [vmem:[#allocation22_spill] sm:$0xff] %v5099_v58  ;;  %6308 = vst [vmem:[#allocation23_spill] sm:$0xff] %v5105_v29 }
 0x696   :  { %2817 = vtanh.f32 %v4977_v26 }
 0x6a0   :  { %v2818_v55 = vpop.eup %2817 }
 0x6a1   :  { %v1895_v22 = vmul.f32 %v2818_v55, %v1890_v24  ;;  %v5123_v24 = vld [vmem:[%s5577_s4 + $0x6c] ss:$16 sps:$4 sm:$0xff]   ;;  %v5129_v55 = vld [vmem:[%s5577_s4 + $0x60] ss:$16 sps:$4 sm:$0xff]  }
 0x6a2   :  { %6311 = vst [vmem:[#allocation60_spill] sm:$0xff] %v5123_v24  ;;  %6312 = vst [vmem:[#allocation61_spill] sm:$0xff] %v5129_v55 }
 0x6a3   :  { %v1896_v27 = vpack.c.bf16 %v1895_v22, %v1895_v22  ;;  %v5135_v22 = vld [vmem:[%s5577_s4 + $0x68] ss:$16 sps:$4 sm:$0xff]  }
 0x6a4   :  { %6313 = vst [vmem:[#allocation63_spill] sm:$0xff] %v5135_v22 }
 0x6a5   :  { %1931 = vmatmul.mubr.bf16.vlgmr.msra.gmra.mrb[44].mxu0 %v1896_v27  ;;  %1972 = vmatmul.mubr.bf16.vlgmr.msra.gmra.mrb[44].mxu1 %v1896_v27 }
 0x6a6   :  { %2014 = vmatpush1.bf16.msra.mxu0 %v4735_v45  ;;  %2055 = vmatpush1.bf16.msra.mxu1 %v4741_v32 }
 0x6a7   :  { %2015 = vmatprep.subr.bf16.mxu0 %v4747_v34  ;;  %2056 = vmatprep.subr.bf16.mxu1 %v4753_v37 }
 0x6a8   :  { %2045 = vmatprep.mubr.bf16.mxu0 %v5997_v53  ;;  %2086 = vmatprep.mubr.bf16.mxu1 %v5997_v53 }
 0x6aa   :  { %2016 = vmatpush1.bf16.msra.mxu0 %v4761_v4  ;;  %2057 = vmatpush1.bf16.msra.mxu1 %v4767_v5 }
 0x6ab   :  { %2017 = vmatprep.subr.bf16.mxu0 %v4773_v57  ;;  %2058 = vmatprep.subr.bf16.mxu1 %v4779_v40 }
 0x6ae   :  { %2018 = vmatpush1.bf16.msra.mxu0 %v4785_v9  ;;  %2059 = vmatpush1.bf16.msra.mxu1 %v4791_v17 }
 0x6af   :  { %2019 = vmatprep.subr.bf16.mxu0 %v4797_v41  ;;  %2060 = vmatprep.subr.bf16.mxu1 %v4803_v16 }
 0x6b2   :  { %2020 = vmatpush1.bf16.msra.mxu0 %v4809_v30  ;;  %2061 = vmatpush1.bf16.msra.mxu1 %v4815_v15 }
 0x6b3   :  { %2021 = vmatprep.subr.bf16.mxu0 %v4821_v44  ;;  %2062 = vmatprep.subr.bf16.mxu1 %v4827_v20 }
 0x6b6   :  { %2022 = vmatpush1.bf16.msra.mxu0 %v4833_v11  ;;  %2063 = vmatpush1.bf16.msra.mxu1 %v4839_v10 }
 0x6b7   :  { %2023 = vmatprep.subr.bf16.mxu0 %v4845_v13  ;;  %2064 = vmatprep.subr.bf16.mxu1 %v6299_v43 }
 0x6ba   :  { %2024 = vmatpush1.bf16.msra.mxu0 %v4857_v8  ;;  %2065 = vmatpush1.bf16.msra.mxu1 %v4863_v31 }
 0x6bb   :  { %2025 = vmatprep.subr.bf16.mxu0 %v4869_v12  ;;  %2066 = vmatprep.subr.bf16.mxu1 %v4875_v3 }
 0x6be   :  { %2026 = vmatpush1.bf16.msra.mxu0 %v5009_v35  ;;  %2067 = vmatpush1.bf16.msra.mxu1 %v5015_v6 }
 0x6bf   :  { %2027 = vmatprep.subr.bf16.mxu0 %v5021_v7  ;;  %2068 = vmatprep.subr.bf16.mxu1 %v5027_v33 }
 0x6c2   :  { %2028 = vmatpush1.bf16.msra.mxu0 %v5033_v21  ;;  %2069 = vmatpush1.bf16.msra.mxu1 %v5039_v50 }
 0x6c3   :  { %2119 = vmatprep.subr.bf16.mxu0 %v5045_v42  ;;  %2160 = vmatprep.subr.bf16.mxu1 %v5051_v60 }
 0x6c5   :  { %2046 = vmatmul.mubr.bf16.vlgmr.msra.gmra.mrb[48].mxu0 %v1896_v27  ;;  %2087 = vmatmul.mubr.bf16.vlgmr.msra.gmra.mrb[48].mxu1 %v1896_v27  ;;  %v5141_v27 = vld [vmem:[%s5577_s4 + $0x84] ss:$16 sps:$4 sm:$0xff]  }
 0x6c6   :  { %2120 = vmatpush1.bf16.msra.mxu0 %v5057_v46  ;;  %2161 = vmatpush1.bf16.msra.mxu1 %v5063_v38  ;;  %6314 = vst [vmem:[#allocation67_spill] sm:$0xff] %v5141_v27 }
 0x6c7   :  { %2121 = vmatprep.subr.bf16.mxu0 %v5069_v62  ;;  %2162 = vmatprep.subr.bf16.mxu1 %v5075_v0 }
 0x6ca   :  { %2122 = vmatpush1.bf16.msra.mxu0 %v5081_v14  ;;  %2163 = vmatpush1.bf16.msra.mxu1 %v5087_v54 }
 0x6cb   :  { %2123 = vmatprep.subr.bf16.mxu0 %v5093_v63  ;;  %2164 = vmatprep.subr.bf16.mxu1 %v5099_v58 }
 0x6ce   :  { %2124 = vmatpush1.bf16.msra.mxu0 %v5105_v29  ;;  %2165 = vmatpush1.bf16.msra.mxu1 %v5111_v49 }
 0x6cf   :  { %2125 = vmatprep.subr.bf16.mxu0 %v5117_v23  ;;  %2166 = vmatprep.subr.bf16.mxu1 %v5123_v24  ;;  %v5147_v24 = vld [vmem:[%s5577_s4 + $0x8c] ss:$16 sps:$4 sm:$0xff]  }
 0x6d0   :  { %6315 = vst [vmem:[#allocation68_spill] sm:$0xff] %v5147_v24 }
 0x6d2   :  { %2126 = vmatpush1.bf16.msra.mxu0 %v5129_v55  ;;  %2167 = vmatpush1.bf16.msra.mxu1 %v5135_v22  ;;  %v5153_v55 = vld [vmem:[%s5577_s4 + $0x80] ss:$16 sps:$4 sm:$0xff]   ;;  %v5159_v22 = vld [vmem:[%s5577_s4 + $0x88] ss:$16 sps:$4 sm:$0xff]  }
 0x6d3   :  { %2127 = vmatprep.subr.bf16.mxu0 %v5141_v27  ;;  %2168 = vmatprep.subr.bf16.mxu1 %v5147_v24  ;;  %6316 = vst [vmem:[#allocation24_spill] sm:$0xff] %v5153_v55  ;;  %6317 = vst [vmem:[#allocation25_spill] sm:$0xff] %v5159_v22  ;;  %v5165_v27 = vld [vmem:[%s5577_s4 + $0xa4] ss:$16 sps:$4 sm:$0xff]   ;;  %v5171_v24 = vld [vmem:[%s5577_s4 + $0xac] ss:$16 sps:$4 sm:$0xff]  }
 0x6d4   :  { %6318 = vst [vmem:[#allocation26_spill] sm:$0xff] %v5165_v27  ;;  %6319 = vst [vmem:[#allocation27_spill] sm:$0xff] %v5171_v24 }
 0x6d6   :  { %2128 = vmatpush1.bf16.msra.mxu0 %v5153_v55  ;;  %2169 = vmatpush1.bf16.msra.mxu1 %v5159_v22  ;;  %v5177_v55 = vld [vmem:[%s5577_s4 + $0xa0] ss:$16 sps:$4 sm:$0xff]   ;;  %v5183_v22 = vld [vmem:[%s5577_s4 + $0xa8] ss:$16 sps:$4 sm:$0xff]  }
 0x6d7   :  { %2129 = vmatprep.subr.bf16.mxu0 %v5165_v27  ;;  %2170 = vmatprep.subr.bf16.mxu1 %v5171_v24  ;;  %6320 = vst [vmem:[#allocation28_spill] sm:$0xff] %v5177_v55  ;;  %6321 = vst [vmem:[#allocation29_spill] sm:$0xff] %v5183_v22  ;;  %v5189_v27 = vld [vmem:[%s5577_s4 + $0xc4] ss:$16 sps:$4 sm:$0xff]   ;;  %v5195_v24 = vld [vmem:[%s5577_s4 + $0xcc] ss:$16 sps:$4 sm:$0xff]  }
 0x6d8   :  { %6322 = vst [vmem:[#allocation30_spill] sm:$0xff] %v5189_v27  ;;  %6323 = vst [vmem:[#allocation31_spill] sm:$0xff] %v5195_v24 }
 0x6da   :  { %2130 = vmatpush1.bf16.msra.mxu0 %v5177_v55  ;;  %2171 = vmatpush1.bf16.msra.mxu1 %v5183_v22  ;;  %v5201_v55 = vld [vmem:[%s5577_s4 + $0xc0] ss:$16 sps:$4 sm:$0xff]   ;;  %v5207_v22 = vld [vmem:[%s5577_s4 + $0xc8] ss:$16 sps:$4 sm:$0xff]  }
 0x6db   :  { %2131 = vmatprep.subr.bf16.mxu0 %v5189_v27  ;;  %2172 = vmatprep.subr.bf16.mxu1 %v5195_v24  ;;  %6324 = vst [vmem:[#allocation11_spill] sm:$0xff] %v5201_v55  ;;  %6325 = vst [vmem:[#allocation12_spill] sm:$0xff] %v5207_v22  ;;  %v5213_v27 = vld [vmem:[%s5577_s4 + $0xe4] ss:$16 sps:$4 sm:$0xff]   ;;  %v5219_v24 = vld [vmem:[%s5577_s4 + $0xec] ss:$16 sps:$4 sm:$0xff]  }
 0x6dc   :  { %6326 = vst [vmem:[#allocation75_spill] sm:$0xff] %v5213_v27  ;;  %6327 = vst [vmem:[#allocation32_spill] sm:$0xff] %v5219_v24 }
 0x6de   :  { %2132 = vmatpush1.bf16.msra.mxu0 %v5201_v55  ;;  %2173 = vmatpush1.bf16.msra.mxu1 %v5207_v22  ;;  %v5225_v55 = vld [vmem:[%s5577_s4 + $0xe0] ss:$16 sps:$4 sm:$0xff]   ;;  %v5231_v22 = vld [vmem:[%s5577_s4 + $0xe8] ss:$16 sps:$4 sm:$0xff]  }
 0x6df   :  { %2133 = vmatprep.subr.bf16.mxu0 %v5213_v27  ;;  %2174 = vmatprep.subr.bf16.mxu1 %v5219_v24  ;;  %6328 = vst [vmem:[#allocation33_spill] sm:$0xff] %v5225_v55  ;;  %6329 = vst [vmem:[#allocation34_spill] sm:$0xff] %v5231_v22  ;;  %v5237_v27 = vld [vmem:[%s5577_s4 + $0x104] ss:$16 sps:$4 sm:$0xff]   ;;  %v5243_v24 = vld [vmem:[%s5577_s4 + $0x10c] ss:$16 sps:$4 sm:$0xff]  }
 0x6e0   :  { %6330 = vst [vmem:[#allocation35_spill] sm:$0xff] %v5237_v27  ;;  %6331 = vst [vmem:[#allocation36_spill] sm:$0xff] %v5243_v24 }
 0x6e2   :  { %2134 = vmatpush1.bf16.msra.mxu0 %v5225_v55  ;;  %2175 = vmatpush1.bf16.msra.mxu1 %v5231_v22  ;;  %v5249_v55 = vld [vmem:[%s5577_s4 + $0x100] ss:$16 sps:$4 sm:$0xff]   ;;  %v5255_v22 = vld [vmem:[%s5577_s4 + $0x108] ss:$16 sps:$4 sm:$0xff]  }
 0x6e3   :  { %2135 = vmatprep.subr.bf16.mxu0 %v5237_v27  ;;  %2176 = vmatprep.subr.bf16.mxu1 %v5243_v24  ;;  %6332 = vst [vmem:[#allocation37_spill] sm:$0xff] %v5249_v55  ;;  %6333 = vst [vmem:[#allocation38_spill] sm:$0xff] %v5255_v22  ;;  %v5261_v27 = vld [vmem:[%s5577_s4 + $0x124] ss:$16 sps:$4 sm:$0xff]   ;;  %v5267_v24 = vld [vmem:[%s5577_s4 + $0x12c] ss:$16 sps:$4 sm:$0xff]  }
 0x6e4   :  { %6334 = vst [vmem:[#allocation39_spill] sm:$0xff] %v5261_v27  ;;  %6335 = vst [vmem:[#allocation40_spill] sm:$0xff] %v5267_v24 }
 0x6e6   :  { %2136 = vmatpush1.bf16.msra.mxu0 %v5249_v55  ;;  %2177 = vmatpush1.bf16.msra.mxu1 %v5255_v22  ;;  %v5273_v55 = vld [vmem:[%s5577_s4 + $0x120] ss:$16 sps:$4 sm:$0xff]   ;;  %v5279_v22 = vld [vmem:[%s5577_s4 + $0x128] ss:$16 sps:$4 sm:$0xff]  }
 0x6e7   :  { %2137 = vmatprep.subr.bf16.mxu0 %v5261_v27  ;;  %2178 = vmatprep.subr.bf16.mxu1 %v5267_v24  ;;  %6336 = vst [vmem:[#allocation41_spill] sm:$0xff] %v5273_v55  ;;  %6337 = vst [vmem:[#allocation42_spill] sm:$0xff] %v5279_v22  ;;  %v5285_v27 = vld [vmem:[%s5577_s4 + $0x144] ss:$16 sps:$4 sm:$0xff]   ;;  %v5291_v24 = vld [vmem:[%s5577_s4 + $0x14c] ss:$16 sps:$4 sm:$0xff]  }
 0x6e8   :  { %6338 = vst [vmem:[#allocation43_spill] sm:$0xff] %v5285_v27  ;;  %6339 = vst [vmem:[#allocation44_spill] sm:$0xff] %v5291_v24 }
 0x6ea   :  { %2138 = vmatpush1.bf16.msra.mxu0 %v5273_v55  ;;  %2179 = vmatpush1.bf16.msra.mxu1 %v5279_v22  ;;  %v5297_v55 = vld [vmem:[%s5577_s4 + $0x140] ss:$16 sps:$4 sm:$0xff]   ;;  %v5303_v22 = vld [vmem:[%s5577_s4 + $0x148] ss:$16 sps:$4 sm:$0xff]  }
 0x6eb   :  { %2139 = vmatprep.subr.bf16.mxu0 %v5285_v27  ;;  %2180 = vmatprep.subr.bf16.mxu1 %v5291_v24  ;;  %6340 = vst [vmem:[#allocation45_spill] sm:$0xff] %v5297_v55  ;;  %6341 = vst [vmem:[#allocation46_spill] sm:$0xff] %v5303_v22  ;;  %v5309_v27 = vld [vmem:[%s5577_s4 + $0x164] ss:$16 sps:$4 sm:$0xff]   ;;  %v5315_v24 = vld [vmem:[%s5577_s4 + $0x16c] ss:$16 sps:$4 sm:$0xff]  }
 0x6ec   :  { %6342 = vst [vmem:[#allocation47_spill] sm:$0xff] %v5309_v27  ;;  %6343 = vst [vmem:[#allocation48_spill] sm:$0xff] %v5315_v24 }
 0x6ee   :  { %2140 = vmatpush1.bf16.msra.mxu0 %v5297_v55  ;;  %2181 = vmatpush1.bf16.msra.mxu1 %v5303_v22  ;;  %v5321_v55 = vld [vmem:[%s5577_s4 + $0x160] ss:$16 sps:$4 sm:$0xff]   ;;  %v5327_v22 = vld [vmem:[%s5577_s4 + $0x168] ss:$16 sps:$4 sm:$0xff]  }
 0x6ef   :  { %2141 = vmatprep.subr.bf16.mxu0 %v5309_v27  ;;  %2182 = vmatprep.subr.bf16.mxu1 %v5315_v24  ;;  %6344 = vst [vmem:[#allocation49_spill] sm:$0xff] %v5321_v55  ;;  %6345 = vst [vmem:[#allocation50_spill] sm:$0xff] %v5327_v22  ;;  %v5333_v27 = vld [vmem:[%s5577_s4 + $0x184] ss:$16 sps:$4 sm:$0xff]   ;;  %v5339_v24 = vld [vmem:[%s5577_s4 + $0x18c] ss:$16 sps:$4 sm:$0xff]  }
 0x6f0   :  { %6346 = vst [vmem:[#allocation51_spill] sm:$0xff] %v5333_v27  ;;  %6347 = vst [vmem:[#allocation52_spill] sm:$0xff] %v5339_v24 }
 0x6f2   :  { %2142 = vmatpush1.bf16.msra.mxu0 %v5321_v55  ;;  %2183 = vmatpush1.bf16.msra.mxu1 %v5327_v22  ;;  %v5345_v55 = vld [vmem:[%s5577_s4 + $0x180] ss:$16 sps:$4 sm:$0xff]   ;;  %v5351_v22 = vld [vmem:[%s5577_s4 + $0x188] ss:$16 sps:$4 sm:$0xff]  }
 0x6f3   :  { %2143 = vmatprep.subr.bf16.mxu0 %v5333_v27  ;;  %2184 = vmatprep.subr.bf16.mxu1 %v5339_v24  ;;  %6348 = vst [vmem:[#allocation53_spill] sm:$0xff] %v5345_v55  ;;  %6349 = vst [vmem:[#allocation54_spill] sm:$0xff] %v5351_v22  ;;  %v5357_v27 = vld [vmem:[%s5577_s4 + $0x1a4] ss:$16 sps:$4 sm:$0xff]   ;;  %v5363_v24 = vld [vmem:[%s5577_s4 + $0x1ac] ss:$16 sps:$4 sm:$0xff]  }
 0x6f4   :  { %6350 = vst [vmem:[#allocation55_spill] sm:$0xff] %v5357_v27  ;;  %6351 = vst [vmem:[#allocation56_spill] sm:$0xff] %v5363_v24 }
 0x6f6   :  { %2144 = vmatpush1.bf16.msra.mxu0 %v5345_v55  ;;  %2185 = vmatpush1.bf16.msra.mxu1 %v5351_v22  ;;  %v5369_v55 = vld [vmem:[%s5577_s4 + $0x1a0] ss:$16 sps:$4 sm:$0xff]   ;;  %v5375_v22 = vld [vmem:[%s5577_s4 + $0x1a8] ss:$16 sps:$4 sm:$0xff]  }
 0x6f7   :  { %2145 = vmatprep.subr.bf16.mxu0 %v5357_v27  ;;  %2186 = vmatprep.subr.bf16.mxu1 %v5363_v24  ;;  %6352 = vst [vmem:[#allocation57_spill] sm:$0xff] %v5369_v55  ;;  %6353 = vst [vmem:[#allocation58_spill] sm:$0xff] %v5375_v22  ;;  %v5381_v27 = vld [vmem:[%s5577_s4 + $0x1c4] ss:$16 sps:$4 sm:$0xff]   ;;  %v5387_v24 = vld [vmem:[%s5577_s4 + $0x1cc] ss:$16 sps:$4 sm:$0xff]  }
 0x6f8   :  { %6354 = vst [vmem:[#allocation59_spill] sm:$0xff] %v5381_v27  ;;  %6355 = vst [vmem:[#allocation9_spill] sm:$0xff] %v5387_v24 }
 0x6fa   :  { %2146 = vmatpush1.bf16.msra.mxu0 %v5369_v55  ;;  %2187 = vmatpush1.bf16.msra.mxu1 %v5375_v22  ;;  %v5393_v55 = vld [vmem:[%s5577_s4 + $0x1c0] ss:$16 sps:$4 sm:$0xff]   ;;  %v5399_v22 = vld [vmem:[%s5577_s4 + $0x1c8] ss:$16 sps:$4 sm:$0xff]  }
 0x6fb   :  { %2147 = vmatprep.subr.bf16.mxu0 %v5381_v27  ;;  %2188 = vmatprep.subr.bf16.mxu1 %v5387_v24  ;;  %6356 = vst [vmem:[#allocation10_spill] sm:$0xff] %v5393_v55  ;;  %6357 = vst [vmem:[#allocation69_spill] sm:$0xff] %v5399_v22  ;;  %v5405_v27 = vld [vmem:[%s5577_s4 + $0x1e4] ss:$16 sps:$4 sm:$0xff]   ;;  %v5411_v24 = vld [vmem:[%s5577_s4 + $0x1ec] ss:$16 sps:$4 sm:$0xff]  }
 0x6fc   :  { %6358 = vst [vmem:[#allocation70_spill] sm:$0xff] %v5405_v27  ;;  %6359 = vst [vmem:[#allocation71_spill] sm:$0xff] %v5411_v24 }
 0x6fe   :  { %2148 = vmatpush1.bf16.msra.mxu0 %v5393_v55  ;;  %2189 = vmatpush1.bf16.msra.mxu1 %v5399_v22  ;;  %v5417_v55 = vld [vmem:[%s5577_s4 + $0x1e0] ss:$16 sps:$4 sm:$0xff]   ;;  %v5423_v22 = vld [vmem:[%s5577_s4 + $0x1e8] ss:$16 sps:$4 sm:$0xff]  }
 0x6ff   :  { %2149 = vmatprep.subr.bf16.mxu0 %v5405_v27  ;;  %2190 = vmatprep.subr.bf16.mxu1 %v5411_v24  ;;  %6360 = vst [vmem:[#allocation72_spill] sm:$0xff] %v5417_v55  ;;  %6361 = vst [vmem:[#allocation73_spill] sm:$0xff] %v5423_v22 }
 0x702   :  { %2150 = vmatpush1.bf16.msra.mxu0 %v5417_v55  ;;  %2191 = vmatpush1.bf16.msra.mxu1 %v5423_v22 }
 0x703   :  { %2234 = vmatprep.subr.bf16.mxu0 %v4951_v19  ;;  %2275 = vmatprep.subr.bf16.mxu1 %v4957_v28 }
 0x778   :  { %v1932_v27 = vpop.f32.mrb[44].mxu0  ;;  %v1973_v24 = vpop.f32.mrb[44].mxu1 }
 0x779   :  { %v1933_v23 = vadd.f32 %v1932_v27, %v6290_v39  ;;  %v1934_v49 = vpop.f32.mrb[45].mxu0  ;;  %v1975_v29 = vpop.f32.mrb[45].mxu1  ;;  %v1974_v22 = vadd.f32 %v1973_v24, %v6292_v48 }
 0x77a   :  { %v1935_v58 = vadd.f32 %v1934_v49, %v6291_v47  ;;  %v1936_v55 = vpop.f32.mrb[46].mxu0  ;;  %v1977_v63 = vpop.f32.mrb[46].mxu1  ;;  %v1976_v19 = vadd.f32 %v1975_v29, %v6293_v59 }
 0x77b   :  { %v1980_v54 = vmul.f32 0.5, %v1933_v23  ;;  %v1937_v14 = vpop.f32.mrb[47].mxu0  ;;  %v1978_v0 = vpop.f32.mrb[47].mxu1 }
 0x77c   :  { %v1984_v62 = vmul.f32 0.5, %v1935_v58  ;;  %v1989_v28 = vmul.f32 0.5, %v1976_v19 }
 0x77d   :  { %2819 = vtanh.f32 %v1980_v54  ;;  %v2003_v54 = vpop.permute.xlu0 %2002 }
 0x77e   :  { %2821 = vtanh.f32 %v1984_v62  ;;  %v2005_v58 = vmul.f32 %v2003_v54, %v6295_v18  ;;  %v2006_v29 = vmul.f32 %v2003_v54, %v6296_v36 }
 0x77f   :  { %2823 = vtanh.f32 %v1974_v22 }
 0x780   :  { %2825 = vtanh.f32 %v1989_v28  ;;  %v2010_v19 = vadd.f32 %v2006_v29, %v3734_v56 }
 0x787   :  { %v2820_v38 = vpop.eup %2819 }
 0x788   :  { %v2822_v27 = vpop.eup %2821  ;;  %v1982_v39 = vadd.f32 1.0, %v2820_v38  ;;  %v2009_v38 = vadd.f32 %v2005_v58, %v6297_v51 }
 0x789   :  { %v1986_v46 = vadd.f32 1.0, %v2822_v27  ;;  %v2824_v55 = vpop.eup %2823 }
 0x78a   :  { %v1983_v49 = vmul.f32 0.5, %v1982_v39  ;;  %v2826_v62 = vpop.eup %2825  ;;  %v2007_v39 = vmul.f32 %v2003_v54, %v6298_v52 }
 0x78b   :  { %v1987_v63 = vmul.f32 0.5, %v1986_v46  ;;  %v1991_v24 = vadd.f32 1.0, %v2826_v62  ;;  %v2008_v62 = vmul.f32 %v2003_v54, %v6068_v61 }
 0x78c   :  { %v1994_v23 = vmul.f32 %v2824_v55, %v1983_v49  ;;  %v2011_v36 = vadd.f32 %v2007_v39, %v6067_v25 }
 0x78d   :  { %v1993_v0 = vmul.f32 %v1987_v63, %v4965_v2  ;;  %v1992_v49 = vmul.f32 0.5, %v1991_v24 }
 0x78f   :  { %v5433_v14 = vadd.f32 %v1994_v23, %v1993_v0 }
 0x791   :  { %6362 = vst [vmem:[#allocation74_spill] sm:$0xff] %v5433_v14  ;;  %2827 = vtanh.f32 %v5433_v14 }
 0x798   :  { %v2047_v22 = vpop.f32.mrb[48].mxu0  ;;  %v2088_v46 = vpop.f32.mrb[48].mxu1 }
 0x799   :  { %v2095_v2 = vadd.f32 %v2047_v22, %v2009_v38  ;;  %v2049_v28 = vpop.f32.mrb[49].mxu0  ;;  %v2090_v27 = vpop.f32.mrb[49].mxu1  ;;  %v2097_v59 = vadd.f32 %v2088_v46, %v2011_v36  ;;  %v2012_v38 = vadd.f32 %v2008_v62, %v3748_v1  ;;  %v6399_v62 = vld [vmem:[#allocation41_spill] sm:$0xff] }
 0x79a   :  { %v2096_v55 = vadd.f32 %v2049_v28, %v2010_v19  ;;  %v2051_v63 = vpop.f32.mrb[50].mxu0  ;;  %v2092_v23 = vpop.f32.mrb[50].mxu1 }
 0x79b   :  { %v2828_v0 = vpop.eup %2827  ;;  %v2099_v18 = vmul.f32 0.5, %v2095_v2  ;;  %v2052_v58 = vpop.f32.mrb[51].mxu0  ;;  %v2098_v24 = vadd.f32 %v2090_v27, %v2012_v38  ;;  %v6397_v23 = vld [vmem:[#allocation39_spill] sm:$0xff]  ;;  %v6402_v38 = vld [vmem:[#allocation44_spill] sm:$0xff] }
 0x79c   :  { %v2093_v51 = vpop.f32.mrb[51].mxu1  ;;  %v2103_v52 = vmul.f32 0.5, %v2096_v55  ;;  %v1997_v14 = vmul.f32 %v2828_v0, %v1992_v49  ;;  %v6398_v0 = vld [vmem:[#allocation40_spill] sm:$0xff]  ;;  %v6400_v58 = vld [vmem:[#allocation42_spill] sm:$0xff] }
 0x79d   :  { %2829 = vtanh.f32 %v2099_v18  ;;  %v2108_v22 = vmul.f32 0.5, %v2098_v24  ;;  %v6403_v24 = vld [vmem:[#allocation45_spill] sm:$0xff] }
 0x79e   :  { %2831 = vtanh.f32 %v2103_v52  ;;  %v2118_v29 = vpack.c.bf16 %v1997_v14, %v1997_v14 }
 0x79f   :  { %2833 = vtanh.f32 %v2097_v59 }
 0x7a0   :  { %2151 = vmatprep.mubr.bf16.mxu0 %v2118_v29  ;;  %2192 = vmatprep.mubr.bf16.mxu1 %v2118_v29  ;;  %2835 = vtanh.f32 %v2108_v22  ;;  %v6401_v29 = vld [vmem:[#allocation43_spill] sm:$0xff]  ;;  %v6404_v22 = vld [vmem:[#allocation46_spill] sm:$0xff] }
 0x7a7   :  { %v2830_v19 = vpop.eup %2829 }
 0x7a8   :  { %v2832_v2 = vpop.eup %2831  ;;  %v2101_v39 = vadd.f32 1.0, %v2830_v19  ;;  %v6405_v19 = vld [vmem:[#allocation47_spill] sm:$0xff] }
 0x7a9   :  { %v2105_v28 = vadd.f32 1.0, %v2832_v2  ;;  %v2834_v51 = vpop.eup %2833  ;;  %v6406_v2 = vld [vmem:[#allocation48_spill] sm:$0xff] }
 0x7aa   :  { %v2102_v54 = vmul.f32 0.5, %v2101_v39  ;;  %v2836_v52 = vpop.eup %2835  ;;  %v6407_v39 = vld [vmem:[#allocation49_spill] sm:$0xff] }
 0x7ab   :  { %v2106_v55 = vmul.f32 0.5, %v2105_v28  ;;  %v2110_v14 = vadd.f32 1.0, %v2836_v52  ;;  %v6408_v28 = vld [vmem:[#allocation50_spill] sm:$0xff]  ;;  %v6414_v52 = vld [vmem:[#allocation56_spill] sm:$0xff] }
 0x7ac   :  { %v2113_v49 = vmul.f32 %v2834_v51, %v2102_v54  ;;  %v6409_v54 = vld [vmem:[#allocation51_spill] sm:$0xff]  ;;  %v6410_v51 = vld [vmem:[#allocation52_spill] sm:$0xff] }
 0x7ad   :  { %v2112_v18 = vmul.f32 %v2106_v55, %v4977_v26  ;;  %v2111_v59 = vmul.f32 0.5, %v2110_v14  ;;  %v6387_v26 = vld [vmem:[#allocation11_spill] sm:$0xff]  ;;  %v6411_v55 = vld [vmem:[#allocation53_spill] sm:$0xff] }
 0x7ae   :  { %v6415_v14 = vld [vmem:[#allocation57_spill] sm:$0xff] }
 0x7af   :  { %v5445_v36 = vadd.f32 %v2113_v49, %v2112_v18  ;;  %v6412_v49 = vld [vmem:[#allocation54_spill] sm:$0xff]  ;;  %v6413_v18 = vld [vmem:[#allocation55_spill] sm:$0xff] }
 0x7b1   :  { %2837 = vtanh.f32 %v5445_v36 }
 0x7bb   :  { %v2838_v46 = vpop.eup %2837 }
 0x7bc   :  { %v2116_v27 = vmul.f32 %v2838_v46, %v2111_v59  ;;  %v6416_v59 = vld [vmem:[#allocation58_spill] sm:$0xff]  ;;  %v6417_v46 = vld [vmem:[#allocation59_spill] sm:$0xff] }
 0x7be   :  { %v2117_v63 = vpack.c.bf16 %v2116_v27, %v2116_v27  ;;  %v6418_v27 = vld [vmem:[#allocation9_spill] sm:$0xff] }
 0x7c0   :  { %2152 = vmatmul.mubr.bf16.vlgmr.msra.gmra.mrb[52].mxu0 %v2117_v63  ;;  %2193 = vmatmul.mubr.bf16.vlgmr.msra.gmra.mrb[52].mxu1 %v2117_v63 }
 0x7c1   :  { %2235 = vmatpush1.bf16.msra.mxu0 %v4735_v45  ;;  %2276 = vmatpush1.bf16.msra.mxu1 %v4741_v32  ;;  %v6364_v45 = vld [vmem:[#allocation16_spill] sm:$0xff]  ;;  %v6365_v32 = vld [vmem:[#allocation17_spill] sm:$0xff] }
 0x7c2   :  { %2236 = vmatprep.subr.bf16.mxu0 %v4747_v34  ;;  %2277 = vmatprep.subr.bf16.mxu1 %v4753_v37  ;;  %v6366_v34 = vld [vmem:[#allocation18_spill] sm:$0xff]  ;;  %v6367_v37 = vld [vmem:[#allocation19_spill] sm:$0xff] }
 0x7c3   :  { %2266 = vmatprep.mubr.bf16.mxu0 %v5997_v53  ;;  %2307 = vmatprep.mubr.bf16.mxu1 %v5997_v53  ;;  %v6363_v53 = vld [vmem:[#allocation15_spill] sm:$0xff] }
 0x7c5   :  { %2237 = vmatpush1.bf16.msra.mxu0 %v4761_v4  ;;  %2278 = vmatpush1.bf16.msra.mxu1 %v4767_v5  ;;  %v6368_v4 = vld [vmem:[#allocation20_spill] sm:$0xff]  ;;  %v6369_v5 = vld [vmem:[#allocation21_spill] sm:$0xff] }
 0x7c6   :  { %2238 = vmatprep.subr.bf16.mxu0 %v4773_v57  ;;  %2279 = vmatprep.subr.bf16.mxu1 %v4779_v40  ;;  %v6370_v57 = vld [vmem:[#allocation22_spill] sm:$0xff]  ;;  %v6371_v40 = vld [vmem:[#allocation23_spill] sm:$0xff] }
 0x7c9   :  { %2239 = vmatpush1.bf16.msra.mxu0 %v4785_v9  ;;  %2280 = vmatpush1.bf16.msra.mxu1 %v4791_v17  ;;  %v6372_v9 = vld [vmem:[#allocation3_spill] sm:$0xff]  ;;  %v6373_v17 = vld [vmem:[#allocation4_spill] sm:$0xff] }
 0x7ca   :  { %2240 = vmatprep.subr.bf16.mxu0 %v4797_v41  ;;  %2281 = vmatprep.subr.bf16.mxu1 %v4803_v16  ;;  %v6374_v41 = vld [vmem:[#allocation60_spill] sm:$0xff]  ;;  %v6375_v16 = vld [vmem:[#allocation61_spill] sm:$0xff] }
 0x7cd   :  { %2241 = vmatpush1.bf16.msra.mxu0 %v4809_v30  ;;  %2282 = vmatpush1.bf16.msra.mxu1 %v4815_v15  ;;  %v6376_v30 = vld [vmem:[#allocation63_spill] sm:$0xff] }
 0x7ce   :  { %2242 = vmatprep.subr.bf16.mxu0 %v4821_v44  ;;  %2283 = vmatprep.subr.bf16.mxu1 %v4827_v20  ;;  %v6377_v15 = vld [vmem:[#allocation67_spill] sm:$0xff]  ;;  %v6378_v44 = vld [vmem:[#allocation68_spill] sm:$0xff] }
 0x7cf   :  { %v6379_v20 = vld [vmem:[#allocation24_spill] sm:$0xff] }
 0x7d1   :  { %2243 = vmatpush1.bf16.msra.mxu0 %v4833_v11  ;;  %2284 = vmatpush1.bf16.msra.mxu1 %v4839_v10  ;;  %v6380_v11 = vld [vmem:[#allocation25_spill] sm:$0xff]  ;;  %v6381_v10 = vld [vmem:[#allocation26_spill] sm:$0xff] }
 0x7d2   :  { %2244 = vmatprep.subr.bf16.mxu0 %v4845_v13  ;;  %2285 = vmatprep.subr.bf16.mxu1 %v6299_v43  ;;  %v6382_v13 = vld [vmem:[#allocation27_spill] sm:$0xff]  ;;  %v6388_v43 = vld [vmem:[#allocation12_spill] sm:$0xff] }
 0x7d5   :  { %2245 = vmatpush1.bf16.msra.mxu0 %v4857_v8  ;;  %2286 = vmatpush1.bf16.msra.mxu1 %v4863_v31  ;;  %v6384_v8 = vld [vmem:[#allocation29_spill] sm:$0xff]  ;;  %v6385_v31 = vld [vmem:[#allocation30_spill] sm:$0xff] }
 0x7d6   :  { %2246 = vmatprep.subr.bf16.mxu0 %v4869_v12  ;;  %2287 = vmatprep.subr.bf16.mxu1 %v4875_v3  ;;  %v6383_v3 = vld [vmem:[#allocation28_spill] sm:$0xff]  ;;  %v6386_v12 = vld [vmem:[#allocation31_spill] sm:$0xff] }
 0x7d9   :  { %2247 = vmatpush1.bf16.msra.mxu0 %v5009_v35  ;;  %2288 = vmatpush1.bf16.msra.mxu1 %v5015_v6  ;;  %v6389_v35 = vld [vmem:[#allocation75_spill] sm:$0xff]  ;;  %v6390_v6 = vld [vmem:[#allocation32_spill] sm:$0xff] }
 0x7da   :  { %2248 = vmatprep.subr.bf16.mxu0 %v5021_v7  ;;  %2289 = vmatprep.subr.bf16.mxu1 %v5027_v33  ;;  %v6391_v7 = vld [vmem:[#allocation33_spill] sm:$0xff]  ;;  %v6392_v33 = vld [vmem:[#allocation34_spill] sm:$0xff] }
 0x7dd   :  { %2249 = vmatpush1.bf16.msra.mxu0 %v5033_v21  ;;  %2290 = vmatpush1.bf16.msra.mxu1 %v5039_v50  ;;  %v6393_v21 = vld [vmem:[#allocation35_spill] sm:$0xff]  ;;  %v6394_v50 = vld [vmem:[#allocation36_spill] sm:$0xff] }
 0x7de   :  { %2340 = vmatprep.subr.bf16.mxu0 %v5045_v42  ;;  %2381 = vmatprep.subr.bf16.mxu1 %v5051_v60  ;;  %v6395_v42 = vld [vmem:[#allocation37_spill] sm:$0xff]  ;;  %v6396_v60 = vld [vmem:[#allocation38_spill] sm:$0xff] }
 0x7e0   :  { %2267 = vmatmul.mubr.bf16.vlgmr.msra.gmra.mrb[56].mxu0 %v2117_v63  ;;  %2308 = vmatmul.mubr.bf16.vlgmr.msra.gmra.mrb[56].mxu1 %v2117_v63  ;;  %v6419_v63 = vld [vmem:[#allocation10_spill] sm:$0xff] }
 0x7e1   :  { %2341 = vmatpush1.bf16.msra.mxu0 %v6363_v53  ;;  %2382 = vmatpush1.bf16.msra.mxu1 %v6364_v45  ;;  %v6420_v53 = vld [vmem:[#allocation69_spill] sm:$0xff]  ;;  %v6421_v45 = vld [vmem:[#allocation70_spill] sm:$0xff] }
 0x7e2   :  { %2342 = vmatprep.subr.bf16.mxu0 %v6365_v32  ;;  %2383 = vmatprep.subr.bf16.mxu1 %v6366_v34  ;;  %v6422_v32 = vld [vmem:[#allocation71_spill] sm:$0xff]  ;;  %v6423_v34 = vld [vmem:[#allocation72_spill] sm:$0xff] }
 0x7e5   :  { %2343 = vmatpush1.bf16.msra.mxu0 %v6367_v37  ;;  %2384 = vmatpush1.bf16.msra.mxu1 %v6368_v4  ;;  %v6424_v37 = vld [vmem:[#allocation73_spill] sm:$0xff] }
 0x7e6   :  { %2344 = vmatprep.subr.bf16.mxu0 %v6369_v5  ;;  %2385 = vmatprep.subr.bf16.mxu1 %v6370_v57  ;;  %v6425_v57 = vld [vmem:[#allocation5_spill] sm:$0xff] }
 0x7e9   :  { %2345 = vmatpush1.bf16.msra.mxu0 %v6371_v40  ;;  %2386 = vmatpush1.bf16.msra.mxu1 %v6372_v9 }
 0x7ea   :  { %2346 = vmatprep.subr.bf16.mxu0 %v6373_v17  ;;  %2387 = vmatprep.subr.bf16.mxu1 %v6374_v41 }
 0x7ed   :  { %2347 = vmatpush1.bf16.msra.mxu0 %v6375_v16  ;;  %2388 = vmatpush1.bf16.msra.mxu1 %v6376_v30 }
 0x7ee   :  { %2348 = vmatprep.subr.bf16.mxu0 %v6377_v15  ;;  %2389 = vmatprep.subr.bf16.mxu1 %v6378_v44 }
 0x7f1   :  { %2349 = vmatpush1.bf16.msra.mxu0 %v6379_v20  ;;  %2390 = vmatpush1.bf16.msra.mxu1 %v6380_v11 }
 0x7f2   :  { %2350 = vmatprep.subr.bf16.mxu0 %v6381_v10  ;;  %2391 = vmatprep.subr.bf16.mxu1 %v6382_v13  ;;  %v6426_v13 = vld [vmem:[#allocation8_spill] sm:$0xff] }
 0x7f5   :  { %2351 = vmatpush1.bf16.msra.mxu0 %v6383_v3  ;;  %2392 = vmatpush1.bf16.msra.mxu1 %v6384_v8 }
 0x7f6   :  { %2352 = vmatprep.subr.bf16.mxu0 %v6385_v31  ;;  %2393 = vmatprep.subr.bf16.mxu1 %v6386_v12 }
 0x7f9   :  { %2353 = vmatpush1.bf16.msra.mxu0 %v6387_v26  ;;  %2394 = vmatpush1.bf16.msra.mxu1 %v6388_v43 }
 0x7fa   :  { %2354 = vmatprep.subr.bf16.mxu0 %v6389_v35  ;;  %2395 = vmatprep.subr.bf16.mxu1 %v6390_v6 }
 0x7fd   :  { %2355 = vmatpush1.bf16.msra.mxu0 %v6391_v7  ;;  %2396 = vmatpush1.bf16.msra.mxu1 %v6392_v33 }
 0x7fe   :  { %2356 = vmatprep.subr.bf16.mxu0 %v6393_v21  ;;  %2397 = vmatprep.subr.bf16.mxu1 %v6394_v50  ;;  %v6427_v21 = vld [vmem:[#allocation74_spill] sm:$0xff] }
 0x801   :  { %2357 = vmatpush1.bf16.msra.mxu0 %v6395_v42  ;;  %2398 = vmatpush1.bf16.msra.mxu1 %v6396_v60  ;;  %v2224_v60 = vpop.permute.xlu1 %2223 }
 0x802   :  { %2358 = vmatprep.subr.bf16.mxu0 %v6397_v23  ;;  %2399 = vmatprep.subr.bf16.mxu1 %v6398_v0  ;;  %v6428_v0 = vld [vmem:[#allocation62_spill] sm:$0xff] }
 0x805   :  { %2359 = vmatpush1.bf16.msra.mxu0 %v6399_v62  ;;  %2400 = vmatpush1.bf16.msra.mxu1 %v6400_v58  ;;  %v2226_v62 = vmul.f32 %v2224_v60, %v6428_v0  ;;  %v6429_v58 = vld [vmem:[#allocation64_spill] sm:$0xff] }
 0x806   :  { %2360 = vmatprep.subr.bf16.mxu0 %v6401_v29  ;;  %2401 = vmatprep.subr.bf16.mxu1 %v6402_v38  ;;  %v2227_v29 = vmul.f32 %v2224_v60, %v6429_v58 }
 0x809   :  { %2361 = vmatpush1.bf16.msra.mxu0 %v6403_v24  ;;  %2402 = vmatpush1.bf16.msra.mxu1 %v6404_v22  ;;  %v6430_v24 = vld [vmem:[#allocation66_spill] sm:$0xff] }
 0x80a   :  { %2362 = vmatprep.subr.bf16.mxu0 %v6405_v19  ;;  %2403 = vmatprep.subr.bf16.mxu1 %v6406_v2  ;;  %v2228_v22 = vmul.f32 %v2224_v60, %v6430_v24  ;;  %v6431_v19 = vld [vmem:[#allocation65_spill] sm:$0xff] }
 0x80b   :  { %v2230_v2 = vadd.f32 %v2226_v62, %v6431_v19 }
 0x80d   :  { %2363 = vmatpush1.bf16.msra.mxu0 %v6407_v39  ;;  %2404 = vmatpush1.bf16.msra.mxu1 %v6408_v28 }
 0x80e   :  { %2364 = vmatprep.subr.bf16.mxu0 %v6409_v54  ;;  %2405 = vmatprep.subr.bf16.mxu1 %v6410_v51  ;;  %v2231_v54 = vadd.f32 %v2227_v29, %v3734_v56 }
 0x811   :  { %2365 = vmatpush1.bf16.msra.mxu0 %v6411_v55  ;;  %2406 = vmatpush1.bf16.msra.mxu1 %v6412_v49 }
 0x812   :  { %2366 = vmatprep.subr.bf16.mxu0 %v6413_v18  ;;  %2407 = vmatprep.subr.bf16.mxu1 %v6414_v52 }
 0x815   :  { %2367 = vmatpush1.bf16.msra.mxu0 %v6415_v14  ;;  %2408 = vmatpush1.bf16.msra.mxu1 %v6416_v59 }
 0x816   :  { %2368 = vmatprep.subr.bf16.mxu0 %v6417_v46  ;;  %2409 = vmatprep.subr.bf16.mxu1 %v6418_v27  ;;  %v2229_v27 = vmul.f32 %v2224_v60, %v6068_v61 }
 0x819   :  { %2369 = vmatpush1.bf16.msra.mxu0 %v6419_v63  ;;  %2410 = vmatpush1.bf16.msra.mxu1 %v6420_v53  ;;  %v2232_v53 = vadd.f32 %v2228_v22, %v6067_v25 }
 0x81a   :  { %2370 = vmatprep.subr.bf16.mxu0 %v6421_v45  ;;  %2411 = vmatprep.subr.bf16.mxu1 %v6422_v32 }
 0x81d   :  { %2371 = vmatpush1.bf16.msra.mxu0 %v6423_v34  ;;  %2412 = vmatpush1.bf16.msra.mxu1 %v6424_v37 }
 0x893   :  { %v2153_v4 = vpop.f32.mrb[52].mxu0  ;;  %v2194_v5 = vpop.f32.mrb[52].mxu1 }
 0x894   :  { %v2154_v40 = vadd.f32 %v2153_v4, %v6425_v57  ;;  %v2155_v9 = vpop.f32.mrb[53].mxu0  ;;  %v2196_v17 = vpop.f32.mrb[53].mxu1  ;;  %v2195_v10 = vadd.f32 %v2194_v5, %v6292_v48  ;;  %v2233_v5 = vadd.f32 %v2229_v27, %v3748_v1 }
 0x895   :  { %v2156_v41 = vadd.f32 %v2155_v9, %v6291_v47  ;;  %v2157_v16 = vpop.f32.mrb[54].mxu0  ;;  %v2198_v30 = vpop.f32.mrb[54].mxu1  ;;  %v2197_v3 = vadd.f32 %v2196_v17, %v6426_v13 }
 0x896   :  { %v2201_v15 = vmul.f32 0.5, %v2154_v40  ;;  %v2158_v44 = vpop.f32.mrb[55].mxu0  ;;  %v2199_v20 = vpop.f32.mrb[55].mxu1 }
 0x897   :  { %v2205_v11 = vmul.f32 0.5, %v2156_v41  ;;  %v2210_v8 = vmul.f32 0.5, %v2197_v3 }
 0x898   :  { %2839 = vtanh.f32 %v2201_v15 }
 0x899   :  { %2841 = vtanh.f32 %v2205_v11 }
 0x89a   :  { %2843 = vtanh.f32 %v2195_v10 }
 0x89b   :  { %2845 = vtanh.f32 %v2210_v8 }
 0x8a2   :  { %v2840_v31 = vpop.eup %2839 }
 0x8a3   :  { %v2842_v12 = vpop.eup %2841  ;;  %v2203_v26 = vadd.f32 1.0, %v2840_v31 }
 0x8a4   :  { %v2207_v43 = vadd.f32 1.0, %v2842_v12  ;;  %v2844_v6 = vpop.eup %2843 }
 0x8a5   :  { %v2204_v35 = vmul.f32 0.5, %v2203_v26  ;;  %v2846_v23 = vpop.eup %2845 }
 0x8a6   :  { %v2208_v7 = vmul.f32 0.5, %v2207_v43  ;;  %v2212_v38 = vadd.f32 1.0, %v2846_v23 }
 0x8a7   :  { %v2215_v33 = vmul.f32 %v2844_v6, %v2204_v35 }
 0x8a8   :  { %v2214_v50 = vmul.f32 %v2208_v7, %v6427_v21  ;;  %v2213_v18 = vmul.f32 0.5, %v2212_v38 }
 0x8aa   :  { %v5549_v42 = vadd.f32 %v2215_v33, %v2214_v50 }
 0x8ac   :  { %2847 = vtanh.f32 %v5549_v42 }
 0x8b3   :  { %v2268_v39 = vpop.f32.mrb[56].mxu0  ;;  %v2309_v28 = vpop.f32.mrb[56].mxu1 }
 0x8b4   :  { %v2316_v51 = vadd.f32 %v2268_v39, %v2230_v2  ;;  %v2270_v55 = vpop.f32.mrb[57].mxu0  ;;  %v2311_v49 = vpop.f32.mrb[57].mxu1  ;;  %v2318_v4 = vadd.f32 %v2309_v28, %v2232_v53 }
 0x8b5   :  { %v2317_v52 = vadd.f32 %v2270_v55, %v2231_v54  ;;  %v2272_v14 = vpop.f32.mrb[58].mxu0  ;;  %v2313_v59 = vpop.f32.mrb[58].mxu1  ;;  %v2319_v40 = vadd.f32 %v2311_v49, %v2233_v5 }
 0x8b6   :  { %v2848_v46 = vpop.eup %2847  ;;  %v2320_v63 = vmul.f32 0.5, %v2316_v51  ;;  %v2273_v45 = vpop.f32.mrb[59].mxu0  ;;  %v2450_v14 = vstv %s5582_s7 }
 0x8b7   :  { %v2314_v32 = vpop.f32.mrb[59].mxu1  ;;  %v2324_v34 = vmul.f32 0.5, %v2317_v52  ;;  %v2218_v37 = vmul.f32 %v2848_v46, %v2213_v18  ;;  %v2329_v9 = vmul.f32 0.5, %v2319_v40 }
 0x8b8   :  { %2849 = vtanh.f32 %v2320_v63 }
 0x8b9   :  { %2851 = vtanh.f32 %v2324_v34  ;;  %v2339_v56 = vpack.c.bf16 %v2218_v37, %v2218_v37 }
 0x8ba   :  { %2853 = vtanh.f32 %v2318_v4 }
 0x8bb   :  { %2372 = vmatprep.mubr.bf16.mxu0 %v2339_v56  ;;  %2413 = vmatprep.mubr.bf16.mxu1 %v2339_v56  ;;  %2855 = vtanh.f32 %v2329_v9 }
 0x8c2   :  { %v2850_v17 = vpop.eup %2849 }
 0x8c3   :  { %v2852_v61 = vpop.eup %2851  ;;  %v2322_v41 = vadd.f32 1.0, %v2850_v17 }
 0x8c4   :  { %v2326_v16 = vadd.f32 1.0, %v2852_v61  ;;  %v2854_v30 = vpop.eup %2853 }
 0x8c5   :  { %v2323_v25 = vmul.f32 0.5, %v2322_v41  ;;  %v2856_v10 = vpop.eup %2855 }
 0x8c6   :  { %v2327_v15 = vmul.f32 0.5, %v2326_v16  ;;  %v2331_v1 = vadd.f32 1.0, %v2856_v10 }
 0x8c7   :  { %v2334_v44 = vmul.f32 %v2854_v30, %v2323_v25 }
 0x8c8   :  { %v2333_v20 = vmul.f32 %v2327_v15, %v5445_v36  ;;  %v2332_v3 = vmul.f32 0.5, %v2331_v1 }
 0x8ca   :  { %v2335_v11 = vadd.f32 %v2334_v44, %v2333_v20 }
 0x8cc   :  { %2857 = vtanh.f32 %v2335_v11 }
 0x8d6   :  { %v2858_v8 = vpop.eup %2857 }
 0x8d7   :  { %v2337_v31 = vmul.f32 %v2858_v8, %v2332_v3 }
 0x8d9   :  { %v2338_v12 = vpack.c.bf16 %v2337_v31, %v2337_v31 }
 0x8db   :  { %2373 = vmatmul.mubr.bf16.vlgmr.msra.gmra.mrb[60].mxu0 %v2338_v12  ;;  %2414 = vmatmul.mubr.bf16.vlgmr.msra.gmra.mrb[60].mxu1 %v2338_v12 }
 0x9ae   :  { %v2374_v26 = vpop.f32.mrb[60].mxu0  ;;  %v2415_v43 = vpop.f32.mrb[60].mxu1 }
 0x9af   :  { %v2375_v35 = vadd.f32 %v2374_v26, %v6425_v57  ;;  %v2376_v6 = vpop.f32.mrb[61].mxu0  ;;  %v2417_v7 = vpop.f32.mrb[61].mxu1  ;;  %v2416_v62 = vadd.f32 %v2415_v43, %v6292_v48 }
 0x9b0   :  { %v2377_v33 = vadd.f32 %v2376_v6, %v6291_v47  ;;  %v2378_v21 = vpop.f32.mrb[62].mxu0  ;;  %v2419_v36 = vpop.f32.mrb[62].mxu1  ;;  %v2418_v58 = vadd.f32 %v2417_v7, %v6426_v13  ;;  %v2561_v13 = vld [vmem:[%s5581_s6] ss:$0 sm:$0xff] }
 0x9b1   :  { %v2422_v50 = vmul.f32 0.5, %v2375_v35  ;;  %v2379_v60 = vpop.f32.mrb[63].mxu0  ;;  %v2420_v23 = vpop.f32.mrb[63].mxu1 }
 0x9b2   :  { %v2426_v0 = vmul.f32 0.5, %v2377_v33  ;;  %v2431_v29 = vmul.f32 0.5, %v2418_v58 }
 0x9b3   :  { %2859 = vtanh.f32 %v2422_v50 }
 0x9b4   :  { %2861 = vtanh.f32 %v2426_v0 }
 0x9b5   :  { %2863 = vtanh.f32 %v2416_v62 }
 0x9b6   :  { %2865 = vtanh.f32 %v2431_v29 }
 0x9bd   :  { %v2860_v38 = vpop.eup %2859 }
 0x9be   :  { %v2862_v57 = vpop.eup %2861  ;;  %v2424_v24 = vadd.f32 1.0, %v2860_v38 }
 0x9bf   :  { %v2428_v22 = vadd.f32 1.0, %v2862_v57  ;;  %v2864_v19 = vpop.eup %2863 }
 0x9c0   :  { %v2425_v47 = vmul.f32 0.5, %v2424_v24  ;;  %v2866_v51 = vpop.eup %2865 }
 0x9c1   :  { %v2429_v2 = vmul.f32 0.5, %v2428_v22  ;;  %v2433_v48 = vadd.f32 1.0, %v2866_v51 }
 0x9c2   :  { %v2436_v39 = vmul.f32 %v2864_v19, %v2425_v47 }
 0x9c3   :  { %v2435_v28 = vmul.f32 %v2429_v2, %v5549_v42  ;;  %v2434_v55 = vmul.f32 0.5, %v2433_v48 }
 0x9c5   :  { %v2437_v54 = vadd.f32 %v2436_v39, %v2435_v28 }
 0x9c7   :  { %2867 = vtanh.f32 %v2437_v54 }
 0x9d1   :  { %v2868_v49 = vpop.eup %2867 }
 0x9d2   :  { %v2439_v18 = vmul.f32 %v2868_v49, %v2434_v55 }
 0x9d4   :  { %v2446_v52 = vmul.f32 %v2561_v13, %v2439_v18 }
 0x9d6   :  { %2447 = vadd.xlane.f32.xlu0 %v2446_v52 }
 0xa63   :  { %v2448_v59 = vpop.xlane.xlu0 %2447 }
 0xa64   :  { %v2451_v42 = vadd.f32 %v2450_v14, %v2448_v59 }
 0xa66   :  { %2453 = vst.msk [vmem:[%s5583_s8] sm:$0xff] %vm2452_vm0, %v2451_v42 }

</bundles_post_ra>
